<compile_context>
chip_gen: v7x
topology: tpu7x:2x2x1
jax: 0.10.0
libtpu: 0.0.40
codegen_flags: <defaults>
</compile_context>

<pallas_src>
import functools

import jax
import jax.numpy as jnp
import numpy as np
from jax import lax
from jax.experimental import pallas as pl
from jax.experimental.pallas import tpu as pltpu

IN_H = IN_W = 20
IN_FEATS = IN_H * IN_W      # 400 real input features (cin = 1)
IN_BLOCK = 512              # padded to a multiple of 128 -> clean MXU K
P1_BLOCK = 512              # 9*9*6  = 486 real columns per pool phase
P2_BLOCK = 128              # 3*3*12 = 108 real columns per pool phase
FC_BLOCK = 128              # lane-dense padded width of the whole FC chain


# ------------------------------ Pallas kernel -------------------------------

def _fused_forward_kernel(x_ref, m1_ref, b1_ref, m2_ref, b2_ref,
                          wf1_ref, c1_ref, wf2_ref, c2_ref, wf3_ref, c3_ref,
                          o_ref):
    f32 = jnp.float32
    wdt = m1_ref.dtype                    # bf16 (default) or f32 dot inputs

    def max4(h, blk):
        # 2x2 max-pool = elementwise max over the four 128-aligned phase blocks
        return jnp.maximum(
            jnp.maximum(h[:, 0 * blk:1 * blk], h[:, 1 * blk:2 * blk]),
            jnp.maximum(h[:, 2 * blk:3 * blk], h[:, 3 * blk:4 * blk]))

    x = x_ref[...]                                            # (bt, 512) f32
    # conv1 + bias + relu as one MXU matmul (f32 accumulation), then pool
    h1 = jnp.maximum(
        jnp.dot(x.astype(wdt), m1_ref[...], preferred_element_type=f32)
        + b1_ref[...], 0.0)
    p1 = max4(h1, P1_BLOCK)                                   # (bt, 512) ~ 9x9x6
    # conv2 + bias + relu, then pool
    h2 = jnp.maximum(
        jnp.dot(p1.astype(wdt), m2_ref[...], preferred_element_type=f32)
        + b2_ref[...], 0.0)
    p2 = max4(h2, P2_BLOCK)                                   # (bt, 128) ~ 3x3x12
    # MLP head (all widths padded to 128 lanes; pad rows/cols are zero)
    z = jnp.maximum(
        jnp.dot(p2.astype(wdt), wf1_ref[...], preferred_element_type=f32)
        + c1_ref[...], 0.0)
    z = jnp.maximum(
        jnp.dot(z.astype(wdt), wf2_ref[...], preferred_element_type=f32)
        + c2_ref[...], 0.0)
    o_ref[...] = (jnp.dot(z.astype(wdt), wf3_ref[...], preferred_element_type=f32)
                  + c3_ref[...])                              # (bt, 128) lane-dense


# --------------------- weight -> matmul-matrix preparation ------------------
# Host-side (numpy), run ONCE per set of parameters; the returned tuple is
# reused across every forward() call.

def _conv_pool_matrix(w_oihw, in_w, in_block, pool_out, out_block):
    """Dense matrix implementing a valid 3x3 conv with pool-phase column grouping.

    Rows : input features in (h, w, cin) order, zero-padded to `in_block`.
    Cols : 4 blocks of `out_block` (one per 2x2 pool phase (hpar, wpar)),
           each block in (h_pooled, w_pooled, cout) order, zero-padded.
    """
    w = np.asarray(w_oihw, np.float32)
    cout, cin, kh, kw = w.shape
    hpar, wpar, hp, wp, co, ci, ki, kj = np.meshgrid(
        np.arange(2), np.arange(2), np.arange(pool_out), np.arange(pool_out),
        np.arange(cout), np.arange(cin), np.arange(kh), np.arange(kw),
        indexing="ij")
    h = hp * 2 + hpar
    ww = wp * 2 + wpar
    rows = ((h + ki) * in_w + (ww + kj)) * cin + ci
    cols = (hpar * 2 + wpar) * out_block + (hp * pool_out + wp) * cout + co
    m = np.zeros((in_block, 4 * out_block), np.float32)
    m[rows.ravel(), cols.ravel()] = w[co.ravel(), ci.ravel(), ki.ravel(), kj.ravel()]
    return m


def _conv_pool_bias(b, pool_out, out_block):
    b = np.asarray(b, np.float32)
    cout = b.shape[0]
    blk = np.zeros((out_block,), np.float32)
    blk[:pool_out * pool_out * cout] = np.tile(b, pool_out * pool_out)
    return np.tile(blk, 4).reshape(1, 4 * out_block)


def _pad2(a, rows, cols):
    a = np.asarray(a, np.float32)
    out = np.zeros((rows, cols), np.float32)
    out[:a.shape[0], :a.shape[1]] = a
    return out


def prepare_weights(params, weight_dtype=jnp.bfloat16):
    """Build fused matmul weights ONCE (host-side).  Call OUTSIDE jit / the
    training loop and pass the returned tuple to forward()."""
    m1 = _conv_pool_matrix(params["conv1_w"], IN_W, IN_BLOCK, 9, P1_BLOCK)
    b1 = _conv_pool_bias(params["conv1_b"], 9, P1_BLOCK)
    m2 = _conv_pool_matrix(params["conv2_w"], 9, P1_BLOCK, 3, P2_BLOCK)
    b2 = _conv_pool_bias(params["conv2_b"], 3, P2_BLOCK)

    # torch.flatten on NCHW is (c, h, w) order; pooled map columns are (h, w, c),
    # so permute fc1's weight rows once and zero-pad the whole FC chain to 128.
    wf1 = np.asarray(params["fc1_w"], np.float32).reshape(80, 12, 3, 3)
    wf1 = wf1.transpose(2, 3, 1, 0).reshape(108, 80)
    wf1 = _pad2(wf1, P2_BLOCK, FC_BLOCK)
    wf2 = _pad2(np.asarray(params["fc2_w"], np.float32).T, FC_BLOCK, FC_BLOCK)
    wf3 = _pad2(np.asarray(params["fc3_w"], np.float32).T, FC_BLOCK, FC_BLOCK)
    c1 = _pad2(np.asarray(params["fc1_b"], np.float32).reshape(1, -1), 1, FC_BLOCK)
    c2 = _pad2(np.asarray(params["fc2_b"], np.float32).reshape(1, -1), 1, FC_BLOCK)
    c3 = _pad2(np.asarray(params["fc3_b"], np.float32).reshape(1, -1), 1, FC_BLOCK)

    to_w = lambda a: jnp.asarray(a, weight_dtype)   # big matrices: bf16 by default
    to_f = lambda a: jnp.asarray(a, jnp.float32)    # biases stay f32 (VPU adds)
    return (to_w(m1), to_f(b1), to_w(m2), to_f(b2),
            to_w(wf1), to_f(c1), to_w(wf2), to_f(c2), to_w(wf3), to_f(c3))


# ------------------------------ forward wrapper ------------------------------

def _round_up(x, m):
    return (x + m - 1) // m * m


@functools.partial(jax.jit, static_argnames=("batch_tile",))
def forward(weights, x_nchw, *, batch_tile=256):
    """Fused forward pass.  `weights` must come from prepare_weights()."""
    n = x_nchw.shape[0]
    x = x_nchw.astype(jnp.float32).reshape(n, IN_FEATS)     # cin=1 -> (h, w) order

    # Batch tile: multiple of 8; keep >=2 grid steps whenever n > 8 so both
    # v7x TensorCores get work; cap at batch_tile (256 fills v6e/v7x's 256-wide
    # MXU while staying far under v7x's 64 MiB VMEM).
    bt = min(batch_tile, max(8, _round_up(-(-n // 2), 8)))
    n_pad = _round_up(n, bt)
    # Single pad: ragged batch rows + features 400 -> 512 (lane/K alignment).
    # (Callers with bt-aligned batches skip the row pad entirely.)
    x = jnp.pad(x, ((0, n_pad - n), (0, IN_BLOCK - IN_FEATS)))

    row_spec = lambda width: pl.BlockSpec((bt, width), lambda i: (i, 0))
    # Weights never change across grid steps: constant index_map keeps them
    # VMEM-resident; Buffered(1) avoids allocating a useless second buffer.
    const_spec = lambda w: pl.BlockSpec(
        w.shape, lambda i: (0, 0), pipeline_mode=pl.Buffered(buffer_count=1))

    out = pl.pallas_call(
        _fused_forward_kernel,
        out_shape=jax.ShapeDtypeStruct((n_pad, FC_BLOCK), jnp.float32),
        grid=(n_pad // bt,),
        in_specs=[row_spec(IN_BLOCK)] + [const_spec(w) for w in weights],
        out_specs=row_spec(FC_BLOCK),
        compiler_params=pltpu.CompilerParams(
            dimension_semantics=("parallel",),
            vmem_limit_bytes=48 * 1024 * 1024),
    )(x, *weights)
    return out[:n, :10]


# ----------------------- params & pure-JAX reference ------------------------

def init_params(key):
    def uniform(k, shape, fan_in):
        bound = 1.0 / (fan_in ** 0.5)
        return jax.random.uniform(k, shape, jnp.float32, -bound, bound)

    ks = jax.random.split(key, 10)
    return {
        "conv1_w": uniform(ks[0], (6, 1, 3, 3), 1 * 9),
        "conv1_b": uniform(ks[1], (6,), 1 * 9),
        "conv2_w": uniform(ks[2], (12, 6, 3, 3), 6 * 9),
        "conv2_b": uniform(ks[3], (12,), 6 * 9),
        "fc1_w": uniform(ks[4], (80, 108), 108),
        "fc1_b": uniform(ks[5], (80,), 108),
        "fc2_w": uniform(ks[6], (40, 80), 80),
        "fc2_b": uniform(ks[7], (40,), 80),
        "fc3_w": uniform(ks[8], (10, 40), 40),
        "fc3_b": uniform(ks[9], (10,), 40),
    }


def reference_forward(params, x_nchw):
    dn = ("NCHW", "OIHW", "NCHW")
    y = lax.conv_general_dilated(x_nchw, params["conv1_w"], (1, 1), "VALID",
                                 dimension_numbers=dn)
    y = jax.nn.relu(y + params["conv1_b"].reshape(1, -1, 1, 1))
    y = lax.reduce_window(y, -jnp.inf, lax.max, (1, 1, 2, 2), (1, 1, 2, 2), "VALID")
    y = lax.conv_general_dilated(y, params["conv2_w"], (1, 1), "VALID",
                                 dimension_numbers=dn)
    y = jax.nn.relu(y + params["conv2_b"].reshape(1, -1, 1, 1))
    y = lax.reduce_window(y, -jnp.inf, lax.max, (1, 1, 2, 2), (1, 1, 2, 2), "VALID")
    y = y.reshape(y.shape[0], -1)
    y = jax.nn.relu(y @ params["fc1_w"].T + params["fc1_b"])
    y = jax.nn.relu(y @ params["fc2_w"].T + params["fc2_b"])
    return y @ params["fc3_w"].T + params["fc3_b"]


if __name__ == "__main__":
    key = jax.random.PRNGKey(0)
    pkey, xkey = jax.random.split(key)
    params = init_params(pkey)
    x = jax.random.normal(xkey, (16, 1, 20, 20), jnp.float32)  # batch=16, 1x20x20

    # Weight prep hoisted out of forward(): built once, reused for every call.
    w_f32 = prepare_weights(params, jnp.float32)     # bit-exact path
    w_bf16 = prepare_weights(params, jnp.bfloat16)   # default: halved weight DMA

    ref = reference_forward(params, x)

    out32 = jax.block_until_ready(forward(w_f32, x))            # grid=(2,)
    assert out32.shape == (16, 10), out32.shape
    err32 = float(jnp.max(jnp.abs(out32 - ref)))
    assert jnp.allclose(out32, ref, rtol=1e-3, atol=1e-3), err32

    out16 = jax.block_until_ready(forward(w_bf16, x))
    err16 = float(jnp.max(jnp.abs(out16 - ref)))
    assert jnp.allclose(out16, ref, rtol=5e-2, atol=5e-2), err16

    print("KERNEL_OK")
</pallas_src>

<mosaic_0001>
module attributes {stable_mosaic.version = 11 : i64} {
  func.func @_fused_forward_kernel(%arg0: i32, %arg1: memref<8x512xf32, #tpu.memory_space<vmem>>, %arg2: memref<512x2048xf32, #tpu.memory_space<vmem>>, %arg3: memref<1x2048xf32, #tpu.memory_space<vmem>>, %arg4: memref<512x512xf32, #tpu.memory_space<vmem>>, %arg5: memref<1x512xf32, #tpu.memory_space<vmem>>, %arg6: memref<128x128xf32, #tpu.memory_space<vmem>>, %arg7: memref<1x128xf32, #tpu.memory_space<vmem>>, %arg8: memref<128x128xf32, #tpu.memory_space<vmem>>, %arg9: memref<1x128xf32, #tpu.memory_space<vmem>>, %arg10: memref<128x128xf32, #tpu.memory_space<vmem>>, %arg11: memref<1x128xf32, #tpu.memory_space<vmem>>, %arg12: memref<8x128xf32, #tpu.memory_space<vmem>>) attributes {dimension_semantics = [#tpu.dimension_semantics<parallel>], iteration_bounds = array<i64: 2>, scalar_prefetch = 0 : i64, scratch_operands = 0 : i64, tpu.core_type = #tpu.core_type<tc>, window_params = [{transform_indices = @transform_0, window_bounds = array<i64: 8, 512>}, {pipeline_mode = #tpu.pipeline_mode<synchronous>, transform_indices = @transform_1, window_bounds = array<i64: 512, 2048>}, {pipeline_mode = #tpu.pipeline_mode<synchronous>, transform_indices = @transform_2, window_bounds = array<i64: 1, 2048>}, {pipeline_mode = #tpu.pipeline_mode<synchronous>, transform_indices = @transform_3, window_bounds = array<i64: 512, 512>}, {pipeline_mode = #tpu.pipeline_mode<synchronous>, transform_indices = @transform_4, window_bounds = array<i64: 1, 512>}, {pipeline_mode = #tpu.pipeline_mode<synchronous>, transform_indices = @transform_5, window_bounds = array<i64: 128, 128>}, {pipeline_mode = #tpu.pipeline_mode<synchronous>, transform_indices = @transform_6, window_bounds = array<i64: 1, 128>}, {pipeline_mode = #tpu.pipeline_mode<synchronous>, transform_indices = @transform_7, window_bounds = array<i64: 128, 128>}, {pipeline_mode = #tpu.pipeline_mode<synchronous>, transform_indices = @transform_8, window_bounds = array<i64: 1, 128>}, {pipeline_mode = #tpu.pipeline_mode<synchronous>, transform_indices = @transform_9, window_bounds = array<i64: 128, 128>}, {pipeline_mode = #tpu.pipeline_mode<synchronous>, transform_indices = @transform_10, window_bounds = array<i64: 1, 128>}, {transform_indices = @transform_11, window_bounds = array<i64: 8, 128>}]} {
    %c0 = arith.constant 0 : index
    %c0_0 = arith.constant 0 : index
    %0 = vector.load %arg1[%c0, %c0_0] : memref<8x512xf32, #tpu.memory_space<vmem>>, vector<8x512xf32>
    %c0_1 = arith.constant 0 : index
    %c0_2 = arith.constant 0 : index
    %1 = vector.load %arg2[%c0_1, %c0_2] : memref<512x2048xf32, #tpu.memory_space<vmem>>, vector<512x2048xf32>
    %cst = arith.constant dense<0.000000e+00> : vector<8x2048xf32>
    %2 = tpu.matmul %0, %1, %cst {dimension_numbers = #tpu.dot_dimension_numbers<[1], [0], [0], [1], [0, 0, 1, 1], [], []>} : vector<8x512xf32>, vector<512x2048xf32>, vector<8x2048xf32> -> vector<8x2048xf32>
    %c0_3 = arith.constant 0 : index
    %c0_4 = arith.constant 0 : index
    %3 = vector.load %arg3[%c0_3, %c0_4] : memref<1x2048xf32, #tpu.memory_space<vmem>>, vector<1x2048xf32>
    %4 = vector.broadcast %3 : vector<1x2048xf32> to vector<8x2048xf32>
    %5 = arith.addf %2, %4 : vector<8x2048xf32>
    %cst_5 = arith.constant 0.000000e+00 : f32
    %6 = vector.broadcast %cst_5 : f32 to vector<8x2048xf32>
    %7 = arith.maximumf %5, %6 : vector<8x2048xf32>
    %8 = vector.extract_strided_slice %7 {offsets = [0, 0], sizes = [8, 512], strides = [1, 1]} : vector<8x2048xf32> to vector<8x512xf32>
    %9 = vector.extract_strided_slice %7 {offsets = [0, 512], sizes = [8, 512], strides = [1, 1]} : vector<8x2048xf32> to vector<8x512xf32>
    %10 = arith.maximumf %8, %9 : vector<8x512xf32>
    %11 = vector.extract_strided_slice %7 {offsets = [0, 1024], sizes = [8, 512], strides = [1, 1]} : vector<8x2048xf32> to vector<8x512xf32>
    %12 = vector.extract_strided_slice %7 {offsets = [0, 1536], sizes = [8, 512], strides = [1, 1]} : vector<8x2048xf32> to vector<8x512xf32>
    %13 = arith.maximumf %11, %12 : vector<8x512xf32>
    %14 = arith.maximumf %10, %13 : vector<8x512xf32>
    %c0_6 = arith.constant 0 : index
    %c0_7 = arith.constant 0 : index
    %15 = vector.load %arg4[%c0_6, %c0_7] : memref<512x512xf32, #tpu.memory_space<vmem>>, vector<512x512xf32>
    %cst_8 = arith.constant dense<0.000000e+00> : vector<8x512xf32>
    %16 = tpu.matmul %14, %15, %cst_8 {dimension_numbers = #tpu.dot_dimension_numbers<[1], [0], [0], [1], [0, 0, 1, 1], [], []>} : vector<8x512xf32>, vector<512x512xf32>, vector<8x512xf32> -> vector<8x512xf32>
    %c0_9 = arith.constant 0 : index
    %c0_10 = arith.constant 0 : index
    %17 = vector.load %arg5[%c0_9, %c0_10] : memref<1x512xf32, #tpu.memory_space<vmem>>, vector<1x512xf32>
    %18 = vector.broadcast %17 : vector<1x512xf32> to vector<8x512xf32>
    %19 = arith.addf %16, %18 : vector<8x512xf32>
    %cst_11 = arith.constant 0.000000e+00 : f32
    %20 = vector.broadcast %cst_11 : f32 to vector<8x512xf32>
    %21 = arith.maximumf %19, %20 : vector<8x512xf32>
    %22 = vector.extract_strided_slice %21 {offsets = [0, 0], sizes = [8, 128], strides = [1, 1]} : vector<8x512xf32> to vector<8x128xf32>
    %23 = vector.extract_strided_slice %21 {offsets = [0, 128], sizes = [8, 128], strides = [1, 1]} : vector<8x512xf32> to vector<8x128xf32>
    %24 = arith.maximumf %22, %23 : vector<8x128xf32>
    %25 = vector.extract_strided_slice %21 {offsets = [0, 256], sizes = [8, 128], strides = [1, 1]} : vector<8x512xf32> to vector<8x128xf32>
    %26 = vector.extract_strided_slice %21 {offsets = [0, 384], sizes = [8, 128], strides = [1, 1]} : vector<8x512xf32> to vector<8x128xf32>
    %27 = arith.maximumf %25, %26 : vector<8x128xf32>
    %28 = arith.maximumf %24, %27 : vector<8x128xf32>
    %c0_12 = arith.constant 0 : index
    %c0_13 = arith.constant 0 : index
    %29 = vector.load %arg6[%c0_12, %c0_13] : memref<128x128xf32, #tpu.memory_space<vmem>>, vector<128x128xf32>
    %cst_14 = arith.constant dense<0.000000e+00> : vector<8x128xf32>
    %30 = tpu.matmul %28, %29, %cst_14 {dimension_numbers = #tpu.dot_dimension_numbers<[1], [0], [0], [1], [0, 0, 1, 1], [], []>} : vector<8x128xf32>, vector<128x128xf32>, vector<8x128xf32> -> vector<8x128xf32>
    %c0_15 = arith.constant 0 : index
    %c0_16 = arith.constant 0 : index
    %31 = vector.load %arg7[%c0_15, %c0_16] : memref<1x128xf32, #tpu.memory_space<vmem>>, vector<1x128xf32>
    %32 = vector.broadcast %31 : vector<1x128xf32> to vector<8x128xf32>
    %33 = arith.addf %30, %32 : vector<8x128xf32>
    %cst_17 = arith.constant 0.000000e+00 : f32
    %34 = vector.broadcast %cst_17 : f32 to vector<8x128xf32>
    %35 = arith.maximumf %33, %34 : vector<8x128xf32>
    %c0_18 = arith.constant 0 : index
    %c0_19 = arith.constant 0 : index
    %36 = vector.load %arg8[%c0_18, %c0_19] : memref<128x128xf32, #tpu.memory_space<vmem>>, vector<128x128xf32>
    %cst_20 = arith.constant dense<0.000000e+00> : vector<8x128xf32>
    %37 = tpu.matmul %35, %36, %cst_20 {dimension_numbers = #tpu.dot_dimension_numbers<[1], [0], [0], [1], [0, 0, 1, 1], [], []>} : vector<8x128xf32>, vector<128x128xf32>, vector<8x128xf32> -> vector<8x128xf32>
    %c0_21 = arith.constant 0 : index
    %c0_22 = arith.constant 0 : index
    %38 = vector.load %arg9[%c0_21, %c0_22] : memref<1x128xf32, #tpu.memory_space<vmem>>, vector<1x128xf32>
    %39 = vector.broadcast %38 : vector<1x128xf32> to vector<8x128xf32>
    %40 = arith.addf %37, %39 : vector<8x128xf32>
    %cst_23 = arith.constant 0.000000e+00 : f32
    %41 = vector.broadcast %cst_23 : f32 to vector<8x128xf32>
    %42 = arith.maximumf %40, %41 : vector<8x128xf32>
    %c0_24 = arith.constant 0 : index
    %c0_25 = arith.constant 0 : index
    %43 = vector.load %arg10[%c0_24, %c0_25] : memref<128x128xf32, #tpu.memory_space<vmem>>, vector<128x128xf32>
    %cst_26 = arith.constant dense<0.000000e+00> : vector<8x128xf32>
    %44 = tpu.matmul %42, %43, %cst_26 {dimension_numbers = #tpu.dot_dimension_numbers<[1], [0], [0], [1], [0, 0, 1, 1], [], []>} : vector<8x128xf32>, vector<128x128xf32>, vector<8x128xf32> -> vector<8x128xf32>
    %c0_27 = arith.constant 0 : index
    %c0_28 = arith.constant 0 : index
    %45 = vector.load %arg11[%c0_27, %c0_28] : memref<1x128xf32, #tpu.memory_space<vmem>>, vector<1x128xf32>
    %46 = vector.broadcast %45 : vector<1x128xf32> to vector<8x128xf32>
    %47 = arith.addf %44, %46 : vector<8x128xf32>
    %c0_29 = arith.constant 0 : index
    %c0_30 = arith.constant 0 : index
    %48 = vector.load %arg12[%c0_29, %c0_30] : memref<8x128xf32, #tpu.memory_space<vmem>>, vector<8x128xf32>
    tpu.vector_store %arg12[%c0_29, %c0_30], %47 {strides = array<i32>} : memref<8x128xf32, #tpu.memory_space<vmem>>, vector<8x128xf32>,
    return
  }
  func.func @transform_0(%arg0: i32) -> (i32, i32) {
    %c0_i32 = arith.constant 0 : i32
    %c0_i32_0 = arith.constant 0 : i32
    return %arg0, %c0_i32 : i32, i32
  }
  func.func @transform_1(%arg0: i32) -> (i32, i32) {
    %c0_i32 = arith.constant 0 : i32
    %c0_i32_0 = arith.constant 0 : i32
    %c0_i32_1 = arith.constant 0 : i32
    return %c0_i32, %c0_i32_0 : i32, i32
  }
  func.func @transform_2(%arg0: i32) -> (i32, i32) {
    %c0_i32 = arith.constant 0 : i32
    %c0_i32_0 = arith.constant 0 : i32
    %c0_i32_1 = arith.constant 0 : i32
    return %c0_i32, %c0_i32_0 : i32, i32
  }
  func.func @transform_3(%arg0: i32) -> (i32, i32) {
    %c0_i32 = arith.constant 0 : i32
    %c0_i32_0 = arith.constant 0 : i32
    %c0_i32_1 = arith.constant 0 : i32
    return %c0_i32, %c0_i32_0 : i32, i32
  }
  func.func @transform_4(%arg0: i32) -> (i32, i32) {
    %c0_i32 = arith.constant 0 : i32
    %c0_i32_0 = arith.constant 0 : i32
    %c0_i32_1 = arith.constant 0 : i32
    return %c0_i32, %c0_i32_0 : i32, i32
  }
  func.func @transform_5(%arg0: i32) -> (i32, i32) {
    %c0_i32 = arith.constant 0 : i32
    %c0_i32_0 = arith.constant 0 : i32
    %c0_i32_1 = arith.constant 0 : i32
    return %c0_i32, %c0_i32_0 : i32, i32
  }
  func.func @transform_6(%arg0: i32) -> (i32, i32) {
    %c0_i32 = arith.constant 0 : i32
    %c0_i32_0 = arith.constant 0 : i32
    %c0_i32_1 = arith.constant 0 : i32
    return %c0_i32, %c0_i32_0 : i32, i32
  }
  func.func @transform_7(%arg0: i32) -> (i32, i32) {
    %c0_i32 = arith.constant 0 : i32
    %c0_i32_0 = arith.constant 0 : i32
    %c0_i32_1 = arith.constant 0 : i32
    return %c0_i32, %c0_i32_0 : i32, i32
  }
  func.func @transform_8(%arg0: i32) -> (i32, i32) {
    %c0_i32 = arith.constant 0 : i32
    %c0_i32_0 = arith.constant 0 : i32
    %c0_i32_1 = arith.constant 0 : i32
    return %c0_i32, %c0_i32_0 : i32, i32
  }
  func.func @transform_9(%arg0: i32) -> (i32, i32) {
    %c0_i32 = arith.constant 0 : i32
    %c0_i32_0 = arith.constant 0 : i32
    %c0_i32_1 = arith.constant 0 : i32
    return %c0_i32, %c0_i32_0 : i32, i32
  }
  func.func @transform_10(%arg0: i32) -> (i32, i32) {
    %c0_i32 = arith.constant 0 : i32
    %c0_i32_0 = arith.constant 0 : i32
    %c0_i32_1 = arith.constant 0 : i32
    return %c0_i32, %c0_i32_0 : i32, i32
  }
  func.func @transform_11(%arg0: i32) -> (i32, i32) {
    %c0_i32 = arith.constant 0 : i32
    %c0_i32_0 = arith.constant 0 : i32
    return %arg0, %c0_i32 : i32, i32
  }
}

</mosaic_0001>

<bundles_post_ra>
// kernel: forward.1
= control target key start
LH: loop header
LB: loop body
LE: loop exit
PB: predicated region body
PF: predicated region fallthrough
CT: control target
= control target key end

     0   :  { %s6501_s0 = inlined_call_operand.vmem [shape: f32[16,512], index: 0, kind: input, shape index: {}]   ;;  %s6502_s1 = inlined_call_operand.hbm [shape: f32[512,2048], index: 1, kind: input, shape index: {}]   ;;  %s6503_s2 = inlined_call_operand.hbm [shape: f32[1,2048], index: 2, kind: input, shape index: {}]   ;;  %s6504_s3 = inlined_call_operand.hbm [shape: f32[512,512], index: 3, kind: input, shape index: {}]   ;;  %s6505_s4 = inlined_call_operand.hbm [shape: f32[1,512], index: 4, kind: input, shape index: {}]   ;;  %s6506_s5 = inlined_call_operand.hbm [shape: f32[128,128], index: 5, kind: input, shape index: {}]   ;;  %s6507_s6 = inlined_call_operand.hbm [shape: f32[1,128], index: 6, kind: input, shape index: {}]   ;;  %s6508_s7 = inlined_call_operand.hbm [shape: f32[128,128], index: 7, kind: input, shape index: {}]   ;;  %s6509_s8 = inlined_call_operand.hbm [shape: f32[1,128], index: 8, kind: input, shape index: {}]   ;;  %s6510_s9 = inlined_call_operand.hbm [shape: f32[128,128], index: 9, kind: input, shape index: {}]   ;;  %s6511_s10 = inlined_call_operand.hbm [shape: f32[1,128], index: 10, kind: input, shape index: {}]   ;;  %s6512_s11 = inlined_call_operand.hbm [shape: f32[16,128], index: 11, kind: output, shape index: {}]  }
   0x1   :  { %6523 = sst [smem:[#allocation32_spill]] %s6502_s1 }
   0x2   :  { %6524 = sst [smem:[#allocation33_spill]] %s6503_s2 }
   0x3   :  { %6525 = sst [smem:[#allocation34_spill]] %s6505_s4 }
   0x4   :  { %6526 = sst [smem:[#allocation35_spill]] %s6507_s6 }
   0x5   :  { %16 = vsyncpa [#allocation3], 0 }
   0x6   :  { %17 = vsyncpa [#allocation6], 0 }
   0x7   :  { %18 = vsyncpa [#allocation9], 0 }
   0x8   :  { %19 = vsyncpa [#allocation12], 0 }
   0x9   :  { %20 = vsyncpa [#allocation15], 0 }
   0xa   :  { %21 = vsyncpa [#allocation18], 0 }
   0xb   :  { %22 = vsyncpa [#allocation4], 0 }
   0xc   :  { %24 = vsyncpa [#allocation4 + $0x1], 0  ;;  %s6007_s17 = smov 0   ;;  %s6009_s18 = smov 0  }
   0xd   :  { %s6011_s19 = smov 0   ;;  %s6013_s20 = smov 0  }
   0xe LB: > { %6527 = sst [smem:[#allocation27_spill]] %s5914_s17  ;;  %s6028_s21 = sadd.s32 4294967295, %s5926_s20   ;;  %s5926_s20 = sphi %s6013_s20, %s6559_s20   ;;  %s5922_s19 = sphi %s6011_s19, %s6561_s19   ;;  %s5918_s18 = sphi %s6009_s18, %s6563_s18   ;;  %s5914_s17 = sphi %s6007_s17, %s6562_s17  }
   0xf   : > { %6528 = sst [smem:[#allocation28_spill]] %s5922_s19  ;;  %s3819_s22 = sadd.s32 4294967294, %s5926_s20  }
  0x10   : > { %s6032_s23 = sadd.s32 1, %s5926_s20   ;;  %s273_s24 = sadd.s32 1, %s5922_s19 }
  0x11   : > { %6529 = sst [smem:[#allocation29_spill]] %s6032_s23  ;;  %s270_s25 = ssub.s32 %s5926_s20, %s6032_s23 }
  0x12   : > { %p283_p0 = scmp.ne.s32.totalorder %s5922_s19, %s5918_s18  ;;  %p271_p1 = scmp.eq.s32.totalorder %s270_s25, 0 }
  0x13   : > { %p284_p2 = scmp.eq.s32.totalorder %s6028_s21, 1  ;;  %p289_p3 = scmp.ne.s32.totalorder %s5918_s18, %s5914_s17 }
  0x14   : > { %p290_p4 = scmp.eq.s32.totalorder %s3819_s22, 1  ;;  %p3820_p7 = scmp.ge.s32.totalorder %s5926_s20, 1 }
  0x15   : > { %s6043_s26 = scalar_select %p271_p1, %s5922_s19, %s273_s24  }
  0x16   : > { %p6045_p5 = por %p284_p2, %p283_p0  ;;  %p6049_p6 = por %p290_p4, %p289_p3 }
  0x17   : > { %6530 = sst [smem:[#allocation30_spill]] %s6043_s26  ;;  %p297_p8 = scmp.lt.s32.totalorder %s5926_s20, 3 }
  0x18   : > { %s6531_s27 = scalar_select %p6045_p5, 1, 0 }
  0x19   : > { %s6532_s28 = scalar_select %p6049_p6, 1, 0 }
  0x1a   : > { %p6516_p9 = scmp.eq.s32.totalorder %s6028_s21, 0  ;;  %p6056_p10 = pnand %p3820_p7, %p297_p8 }
  0x1b   : > { %6533 = sst [smem:[#allocation31_spill]] %s6532_s28  ;;  %s5928_s30 = smov [#allocation5]  }
  0x1c   : > { %s6534_s29 = scalar_select %p6056_p10, 1, 0 }
  0x1d   : > { %s323_s12 = sshll.u32 %s5928_s30, 4  ;;  %p5444_p11 = pneg %p6056_p10  ;;  %s324_s12 = int_to_ptr.vmem [resolvable:$true] %s323_s12 }
  0x1e   : > { %s5929_s13 = smov [#allocation8]   ;;  %s5930_s16 = smov [#allocation11]  }
  0x1f   : > { %s347_s14 = sshll.u32 %s5929_s13, 4  ;;  %p6064_p12 = pnand %p6516_p9, %p5444_p11  ;;  %s6068_s14 = int_to_ptr.vmem [resolvable:$true] %s347_s14 }
  0x20   : > { %s371_s22 = sshll.u32 %s5930_s16, 4  ;;  %s6536_s2 = sld [smem:[#allocation33_spill]]  ;;  %s6070_s22 = int_to_ptr.vmem [resolvable:$true] %s371_s22 }
  0x21   : > { %p6080_p0 = pneg %p6064_p12 }
  0x26   : > { %s5560_s30 = scalar_lea.hbm %s6536_s2, 256 }
  0x27   : > { %p5561_p13 = scmp.ne.s32.totalorder %s6536_s2, %s5560_s30  ;;  %p5567_p3 = scmp.lt.u32.totalorder %s5560_s30, %s6536_s2 }
  0x29   : > { %p5563_p1 = pnand %p6080_p0, %p5561_p13 }
  0x2b   : > { %p5564_p2 = pneg %p5563_p1 }
  0x2d   : > { %p5569_p4 = pnand %p5567_p3, %p5564_p2 }
  0x2f   : > { %5572 = shalt.err (!%p5569_p4)
}
  0x30   : > { %s5573_s24 = scalar_lea.vmem %s324_s12, 256  ;;  %p5581_p9 = scmp.lt.s32.totalorder %s324_s12, %s324_s12 }
  0x31   : > { %p5574_p7 = scmp.ne.s32.totalorder %s324_s12, %s5573_s24  ;;  %p5582_p6 = scmp.lt.s32.totalorder %s5573_s24, %s5573_s24 }
  0x33   : > { %p5576_p8 = pnand %p5574_p7, %p6080_p0  ;;  %p5583_p5 = por %p5582_p6, %p5581_p9 }
  0x35   : > { %p5577_p11 = pneg %p5576_p8 }
  0x37   : > { %p5584_p10 = pnand %p5583_p5, %p5577_p11 }
  0x39   : > { %5587 = shalt.err (!%p5584_p10)
}
  0x3a   : > { %5450 = dma.hbm_to_vmem [thread:$0]  (!%p6064_p12), %s6536_s2, 256, %s324_s12, [#allocation6]  }
  0x3b   : > { %s6538_s4 = sld [smem:[#allocation34_spill]] }
  0x41   : > { %s5588_s30 = scalar_lea.hbm %s6538_s4, 64 }
  0x42   : > { %p5589_p13 = scmp.ne.s32.totalorder %s6538_s4, %s5588_s30  ;;  %p5595_p5 = scmp.lt.u32.totalorder %s5588_s30, %s6538_s4 }
  0x44   : > { %p5591_p1 = pnand %p5589_p13, %p6080_p0 }
  0x46   : > { %p5592_p6 = pneg %p5591_p1 }
  0x48   : > { %p5597_p9 = pnand %p5595_p5, %p5592_p6 }
  0x4a   : > { %5600 = shalt.err (!%p5597_p9)
}
  0x4b   : > { %s5601_s12 = scalar_lea.vmem %s6068_s14, 64  ;;  %p5609_p4 = scmp.lt.s32.totalorder %s6068_s14, %s6068_s14 }
  0x4c   : > { %p5602_p10 = scmp.ne.s32.totalorder %s6068_s14, %s5601_s12  ;;  %p5610_p7 = scmp.lt.s32.totalorder %s5601_s12, %s5601_s12 }
  0x4e   : > { %p5604_p2 = pnand %p5602_p10, %p6080_p0  ;;  %p5611_p8 = por %p5610_p7, %p5609_p4 }
  0x50   : > { %p5605_p3 = pneg %p5604_p2 }
  0x52   : > { %p5612_p11 = pnand %p5611_p8, %p5605_p3 }
  0x54   : > { %5615 = shalt.err (!%p5612_p11)
}
  0x55   : > { %5456 = dma.hbm_to_vmem [thread:$0]  (!%p6064_p12), %s6538_s4, 64, %s6068_s14, [#allocation9]  }
  0x56   : > { %s6539_s6 = sld [smem:[#allocation35_spill]] }
  0x5c   : > { %s5616_s23 = scalar_lea.hbm %s6539_s6, 16 }
  0x5d   : > { %p5617_p13 = scmp.ne.s32.totalorder %s6539_s6, %s5616_s23  ;;  %p5623_p5 = scmp.lt.u32.totalorder %s5616_s23, %s6539_s6 }
  0x5f   : > { %p5619_p1 = pnand %p5617_p13, %p6080_p0 }
  0x61   : > { %p5620_p6 = pneg %p5619_p1 }
  0x63   : > { %p5625_p9 = pnand %p5623_p5, %p5620_p6 }
  0x65   : > { %5628 = shalt.err (!%p5625_p9)
}
  0x66   : > { %s5629_s14 = scalar_lea.vmem %s6070_s22, 16  ;;  %s5636_s12 = scalar_lea.vmem %s6070_s22, 32 }
  0x67   : > { %p5630_p10 = scmp.ne.s32.totalorder %s6070_s22, %s5629_s14  ;;  %p5637_p4 = scmp.lt.s32.totalorder %s6070_s22, %s6070_s22 }
  0x68   : > { %p5638_p7 = scmp.lt.s32.totalorder %s5636_s12, %s5629_s14 }
  0x69   : > { %p5632_p2 = pnand %p5630_p10, %p6080_p0 }
  0x6a   : > { %p5639_p8 = por %p5638_p7, %p5637_p4 }
  0x6b   : > { %p5633_p3 = pneg %p5632_p2 }
  0x6d   : > { %p5640_p11 = pnand %p5639_p8, %p5633_p3 }
  0x6f   : > { %5643 = shalt.err (!%p5640_p11)
}
  0x70   : > { %5462 = dma.hbm_to_vmem [thread:$0]  (!%p6064_p12), %s6539_s6, 16, %s6070_s22, [#allocation12]  }
  0x71   : > { %s5931_s19 = smov [#allocation14]   ;;  %s5932_s23 = smov [#allocation2]  }
  0x72   : > { %s395_s26 = sshll.u32 %s5931_s19, 4  ;;  %s309_s25 = sshll.u32 %s5932_s23, 4  ;;  %s396_s26 = int_to_ptr.vmem [resolvable:$true] %s395_s26  ;;  %s310_s25 = int_to_ptr.vmem [resolvable:$true] %s309_s25 }
  0x73   : > { %s5644_s24 = scalar_lea.hbm %s6509_s8, 16 }
  0x74   : > { %p5645_p13 = scmp.ne.s32.totalorder %s6509_s8, %s5644_s24  ;;  %p5651_p5 = scmp.lt.u32.totalorder %s5644_s24, %s6509_s8 }
  0x76   : > { %p5647_p1 = pnand %p5645_p13, %p6080_p0 }
  0x78   : > { %p5648_p6 = pneg %p5647_p1 }
  0x7a   : > { %p5653_p9 = pnand %p5651_p5, %p5648_p6 }
  0x7c   : > { %5656 = shalt.err (!%p5653_p9)
}
  0x7d   : > { %s5657_s22 = scalar_lea.vmem %s396_s26, 16  ;;  %s5664_s28 = scalar_lea.vmem %s396_s26, 32 }
  0x7e   : > { %p5658_p10 = scmp.ne.s32.totalorder %s396_s26, %s5657_s22  ;;  %p5665_p4 = scmp.lt.s32.totalorder %s396_s26, %s396_s26 }
  0x7f   : > { %p5666_p7 = scmp.lt.s32.totalorder %s5664_s28, %s5657_s22 }
  0x80   : > { %p5660_p2 = pnand %p5658_p10, %p6080_p0 }
  0x81   : > { %p5667_p8 = por %p5666_p7, %p5665_p4 }
  0x82   : > { %p5661_p3 = pneg %p5660_p2 }
  0x84   : > { %p5668_p11 = pnand %p5667_p8, %p5661_p3 }
  0x86   : > { %5671 = shalt.err (!%p5668_p11)
}
  0x87   : > { %5468 = dma.hbm_to_vmem [thread:$0]  (!%p6064_p12), %s6509_s8, 16, %s396_s26, [#allocation15]  }
  0x88   : > { %s6540_s1 = sld [smem:[#allocation32_spill]] }
  0x8e   : > { %s5672_s16 = scalar_lea.hbm %s6540_s1, 131072 }
  0x8f   : > { %p5673_p13 = scmp.ne.s32.totalorder %s6540_s1, %s5672_s16  ;;  %p5679_p5 = scmp.lt.u32.totalorder %s5672_s16, %s6540_s1 }
  0x91   : > { %p5675_p1 = pnand %p5673_p13, %p6080_p0 }
  0x93   : > { %p5676_p6 = pneg %p5675_p1 }
  0x95   : > { %p5681_p9 = pnand %p5679_p5, %p5676_p6 }
  0x97   : > { %5684 = shalt.err (!%p5681_p9)
}
  0x98   : > { %s5685_s22 = scalar_lea.vmem %s310_s25, 131072  ;;  %p5693_p4 = scmp.lt.s32.totalorder %s310_s25, %s310_s25 }
  0x99   : > { %p5686_p10 = scmp.ne.s32.totalorder %s310_s25, %s5685_s22  ;;  %p5694_p7 = scmp.lt.s32.totalorder %s5685_s22, %s5685_s22 }
  0x9b   : > { %p5688_p2 = pnand %p5686_p10, %p6080_p0  ;;  %p5695_p8 = por %p5694_p7, %p5693_p4 }
  0x9d   : > { %p5689_p3 = pneg %p5688_p2 }
  0x9f   : > { %p5696_p11 = pnand %p5695_p8, %p5689_p3 }
  0xa1   : > { %5699 = shalt.err (!%p5696_p11)
}
  0xa2   : > { %s5933_s26 = smov 2048   ;;  %s6521_s28 = smov 128  }
  0xa3   : > { %5447 = dma.hbm_to_vmem [thread:$0]  (!%p6064_p12), %s6540_s1, 131072, %s310_s25, [#allocation3], %s5933_s26, %s5933_s26, %s6521_s28  }
  0xa4   : > { %s5935_s2 = smov [#allocation7]   ;;  %s5700_s14 = scalar_lea.hbm %s6504_s3, 32768 }
  0xa5   : > { %s333_s30 = sshll.u32 %s5935_s2, 4  ;;  %p5701_p13 = scmp.ne.s32.totalorder %s6504_s3, %s5700_s14  ;;  %s334_s30 = int_to_ptr.vmem [resolvable:$true] %s333_s30 }
  0xa6   : > { %p5707_p5 = scmp.lt.u32.totalorder %s5700_s14, %s6504_s3 }
  0xa7   : > { %p5703_p1 = pnand %p5701_p13, %p6080_p0 }
  0xa9   : > { %p5704_p6 = pneg %p5703_p1 }
  0xab   : > { %p5709_p9 = pnand %p5707_p5, %p5704_p6 }
  0xad   : > { %5712 = shalt.err (!%p5709_p9)
}
  0xae   : > { %s5713_s25 = scalar_lea.vmem %s334_s30, 32768  ;;  %p5721_p4 = scmp.lt.s32.totalorder %s334_s30, %s334_s30 }
  0xaf   : > { %p5714_p10 = scmp.ne.s32.totalorder %s334_s30, %s5713_s25  ;;  %p5722_p7 = scmp.lt.s32.totalorder %s5713_s25, %s5713_s25 }
  0xb1   : > { %p5716_p2 = pnand %p5714_p10, %p6080_p0  ;;  %p5723_p8 = por %p5722_p7, %p5721_p4 }
  0xb3   : > { %p5717_p3 = pneg %p5716_p2 }
  0xb5   : > { %p5724_p11 = pnand %p5723_p8, %p5717_p3 }
  0xb7   : > { %5727 = shalt.err (!%p5724_p11)
}
  0xb8   : > { %s5936_s26 = smov 512   ;;  %s5937_s19 = smov 32  }
  0xb9   : > { %5453 = dma.hbm_to_vmem [thread:$0]  (!%p6064_p12), %s6504_s3, 32768, %s334_s30, [#allocation6], %s5936_s26, %s5936_s26, %s5937_s19  }
  0xba   : > { %s5938_s2 = smov [#allocation10]   ;;  %s5939_s24 = smov [#allocation13]  }
  0xbb   : > { %s357_s16 = sshll.u32 %s5938_s2, 4  ;;  %s381_s14 = sshll.u32 %s5939_s24, 4  ;;  %s358_s16 = int_to_ptr.vmem [resolvable:$true] %s357_s16  ;;  %s382_s14 = int_to_ptr.vmem [resolvable:$true] %s381_s14 }
  0xbc   : > { %s5728_s22 = scalar_lea.hbm %s6506_s5, 2048 }
  0xbd   : > { %p5729_p13 = scmp.ne.s32.totalorder %s6506_s5, %s5728_s22  ;;  %p5735_p5 = scmp.lt.u32.totalorder %s5728_s22, %s6506_s5 }
  0xbf   : > { %p5731_p1 = pnand %p5729_p13, %p6080_p0 }
  0xc1   : > { %p5732_p6 = pneg %p5731_p1 }
  0xc3   : > { %p5737_p9 = pnand %p5735_p5, %p5732_p6 }
  0xc5   : > { %5740 = shalt.err (!%p5737_p9)
}
  0xc6   : > { %s5741_s30 = scalar_lea.vmem %s358_s16, 2048  ;;  %p5749_p4 = scmp.lt.s32.totalorder %s358_s16, %s358_s16 }
  0xc7   : > { %p5742_p10 = scmp.ne.s32.totalorder %s358_s16, %s5741_s30  ;;  %p5750_p7 = scmp.lt.s32.totalorder %s5741_s30, %s5741_s30 }
  0xc9   : > { %p5744_p2 = pnand %p5742_p10, %p6080_p0  ;;  %p5751_p8 = por %p5750_p7, %p5749_p4 }
  0xcb   : > { %p5745_p3 = pneg %p5744_p2 }
  0xcd   : > { %p5752_p11 = pnand %p5751_p8, %p5745_p3 }
  0xcf   : > { %5755 = shalt.err (!%p5752_p11)
}
  0xd0   : > { %s5940_s28 = smov 8   ;;  %s6541_s26 = smov 128  }
  0xd1   : > { %5459 = dma.hbm_to_vmem [thread:$0]  (!%p6064_p12), %s6506_s5, 2048, %s358_s16, [#allocation9], %s6541_s26, %s6541_s26, %s5940_s28  }
  0xd2   : > { %s5756_s23 = scalar_lea.hbm %s6508_s7, 2048 }
  0xd3   : > { %p5757_p13 = scmp.ne.s32.totalorder %s6508_s7, %s5756_s23  ;;  %p5763_p5 = scmp.lt.u32.totalorder %s5756_s23, %s6508_s7 }
  0xd5   : > { %p5759_p1 = pnand %p5757_p13, %p6080_p0 }
  0xd7   : > { %p5760_p6 = pneg %p5759_p1 }
  0xd9   : > { %p5765_p9 = pnand %p5763_p5, %p5760_p6 }
  0xdb   : > { %5768 = shalt.err (!%p5765_p9)
}
  0xdc   : > { %s5769_s22 = scalar_lea.vmem %s382_s14, 2048  ;;  %p5777_p4 = scmp.lt.s32.totalorder %s382_s14, %s382_s14 }
  0xdd   : > { %p5770_p10 = scmp.ne.s32.totalorder %s382_s14, %s5769_s22  ;;  %p5778_p7 = scmp.lt.s32.totalorder %s5769_s22, %s5769_s22 }
  0xdf   : > { %p5772_p2 = pnand %p5770_p10, %p6080_p0  ;;  %p5779_p8 = por %p5778_p7, %p5777_p4 }
  0xe1   : > { %p5773_p3 = pneg %p5772_p2 }
  0xe3   : > { %p5780_p11 = pnand %p5779_p8, %p5773_p3 }
  0xe5   : > { %5783 = shalt.err (!%p5780_p11)
}
  0xe6   : > { %5465 = dma.hbm_to_vmem [thread:$0]  (!%p6064_p12), %s6508_s7, 2048, %s382_s14, [#allocation12], %s6541_s26, %s6541_s26, %s5940_s28  }
  0xe7   : > { %s5941_s30 = smov [#allocation16]   ;;  %s5942_s6 = smov [#allocation17]  }
  0xe8   : > { %s405_s1 = sshll.u32 %s5941_s30, 4  ;;  %s419_s19 = sshll.u32 %s5942_s6, 4  ;;  %s406_s1 = int_to_ptr.vmem [resolvable:$true] %s405_s1  ;;  %s420_s19 = int_to_ptr.vmem [resolvable:$true] %s419_s19 }
  0xe9   : > { %s5784_s2 = scalar_lea.hbm %s6510_s9, 2048 }
  0xea   : > { %p5785_p13 = scmp.ne.s32.totalorder %s6510_s9, %s5784_s2  ;;  %p5791_p5 = scmp.lt.u32.totalorder %s5784_s2, %s6510_s9 }
  0xec   : > { %p5787_p1 = pnand %p5785_p13, %p6080_p0 }
  0xee   : > { %p5788_p6 = pneg %p5787_p1 }
  0xf0   : > { %p5793_p9 = pnand %p5791_p5, %p5788_p6 }
  0xf2   : > { %5796 = shalt.err (!%p5793_p9)
}
  0xf3   : > { %s5797_s14 = scalar_lea.vmem %s406_s1, 2048  ;;  %p5805_p4 = scmp.lt.s32.totalorder %s406_s1, %s406_s1 }
  0xf4   : > { %p5798_p10 = scmp.ne.s32.totalorder %s406_s1, %s5797_s14  ;;  %p5806_p7 = scmp.lt.s32.totalorder %s5797_s14, %s5797_s14 }
  0xf6   : > { %p5800_p2 = pnand %p5798_p10, %p6080_p0  ;;  %p5807_p8 = por %p5806_p7, %p5805_p4 }
  0xf8   : > { %p5801_p3 = pneg %p5800_p2 }
  0xfa   : > { %p5808_p11 = pnand %p5807_p8, %p5801_p3 }
  0xfc   : > { %5811 = shalt.err (!%p5808_p11)
}
  0xfd   : > { %5471 = dma.hbm_to_vmem [thread:$0]  (!%p6064_p12), %s6510_s9, 2048, %s406_s1, [#allocation15], %s6541_s26, %s6541_s26, %s5940_s28  }
  0xfe   : > { %s5812_s4 = scalar_lea.hbm %s6511_s10, 16 }
  0xff   : > { %p5813_p13 = scmp.ne.s32.totalorder %s6511_s10, %s5812_s4  ;;  %p5819_p5 = scmp.lt.u32.totalorder %s5812_s4, %s6511_s10 }
 0x101   : > { %p5815_p1 = pnand %p5813_p13, %p6080_p0 }
 0x103   : > { %p5816_p6 = pneg %p5815_p1 }
 0x105   : > { %p5821_p9 = pnand %p5819_p5, %p5816_p6 }
 0x107   : > { %5824 = shalt.err (!%p5821_p9)
}
 0x108   : > { %s5825_s17 = scalar_lea.vmem %s420_s19, 16  ;;  %s5832_s28 = scalar_lea.vmem %s420_s19, 32 }
 0x109   : > { %p5826_p10 = scmp.ne.s32.totalorder %s420_s19, %s5825_s17  ;;  %p5833_p4 = scmp.lt.s32.totalorder %s420_s19, %s420_s19 }
 0x10a   : > { %p5834_p7 = scmp.lt.s32.totalorder %s5832_s28, %s5825_s17 }
 0x10b   : > { %p5828_p2 = pnand %p5826_p10, %p6080_p0 }
 0x10c   : > { %p5835_p8 = por %p5834_p7, %p5833_p4 }
 0x10d   : > { %p5829_p3 = pneg %p5828_p2 }
 0x10f   : > { %p5836_p11 = pnand %p5835_p8, %p5829_p3 }
 0x111   : > { %5839 = shalt.err (!%p5836_p11)
}
 0x112   : > { %5474 = dma.hbm_to_vmem [thread:$0]  (!%p6064_p12), %s6511_s10, 16, %s420_s19, [#allocation18]  }
 0x113   : > { %p6542_p13 = scmp.ne.s32.totalorder %s6534_s29, 0 }
 0x114   : > { %p6543_p1 = scmp.eq.s32.totalorder (!%p6542_p13), %s6028_s21, 0 }
 0x115   : > { %440 = sbr.rel (%p6542_p13) target bundleno = 1984 (0x7c0), region = 64 }
 0x11c   : > { %5885 = dma.done.wait (%p6543_p1), [#allocation3], 131072   ;;  %p6544_p0 = pmov %p6543_p1 }
 0x11e   : > { %5887 = vsyncadd (%p6544_p0), [#allocation3], 4294836224  ;;  %p6545_p6 = pmov %p6544_p0 }
 0x11f   : > { %p6546_p5 = pmov %p6544_p0 }
 0x120   : > { %5889 = dma.done.wait (%p6545_p6), [#allocation6], 33024  }
 0x121   : > { %5891 = vsyncadd (%p6546_p5), [#allocation6], 4294934272  ;;  %p6547_p9 = pmov %p6544_p0 }
 0x122   : > { %p6548_p12 = pmov %p6544_p0 }
 0x123   : > { %5893 = dma.done.wait (%p6547_p9), [#allocation9], 2112  }
 0x124   : > { %5895 = vsyncadd (%p6548_p12), [#allocation9], 4294965184  ;;  %p6549_p10 = pmov %p6544_p0 }
 0x125   : > { %p6550_p2 = pmov %p6544_p0 }
 0x126   : > { %5897 = dma.done.wait (%p6549_p10), [#allocation12], 2064  }
 0x127   : > { %5899 = vsyncadd (%p6550_p2), [#allocation12], 4294965232  ;;  %p6551_p3 = pmov %p6544_p0 }
 0x128   : > { %p6552_p4 = pmov %p6544_p0 }
 0x129   : > { %5901 = dma.done.wait (%p6551_p3), [#allocation15], 2064  }
 0x12a   : > { %5903 = vsyncadd (%p6552_p4), [#allocation15], 4294965232  ;;  %p6553_p7 = pmov %p6544_p0 }
 0x12b   : > { %p6554_p8 = pmov %p6544_p0 }
 0x12c   : > { %5905 = dma.done.wait (%p6553_p7), [#allocation18], 16  }
 0x12d   : > { %5907 = vsyncadd (%p6554_p8), [#allocation18], 4294967280  ;;  %v526_v0 = vld [vmem:[#allocation2 + $0x8] sm:$0xff]  ;;  %v528_v2 = vld [vmem:[#allocation2 + $0x18] sm:$0xff]  ;;  %p516_p11 = scmp.lt.s32.totalorder %s6028_s21, 1  ;;  %vm5944_vm0 = vmmov 0  }
 0x12e   : > { %v542_v1 = vld [vmem:[#allocation2 + $0x88] sm:$0xff]  ;;  %v544_v4 = vld [vmem:[#allocation2 + $0x98] sm:$0xff]  ;;  %v525_v5 = vld [vmem:[#allocation2] sm:$0xff]  ;;  %s513_s14 = sand.u32 1, %s5918_s18   ;;  %s3850_s25 = sshll.u32 %s6028_s21, 7 }
 0x12f   : > { %v4010_v3 = vpack.c.bf16 %v542_v1, %v526_v0  ;;  %v541_v6 = vld [vmem:[#allocation2 + $0x80] sm:$0xff]  ;;  %v4138_v7 = vpack.c.bf16 %v544_v4, %v528_v2  ;;  %v527_v9 = vld [vmem:[#allocation2 + $0x10] sm:$0xff]  ;;  %v558_v11 = vld [vmem:[#allocation2 + $0x108] sm:$0xff]  ;;  %s6309_s29 = scalar_select %p516_p11, %s6028_s21, 1 }
 0x130   : > { %v4012_v8 = vpack.c.bf16 %v541_v6, %v525_v5  ;;  %v543_v10 = vld [vmem:[#allocation2 + $0x90] sm:$0xff]  ;;  %v574_v13 = vld [vmem:[#allocation2 + $0x188] sm:$0xff]  ;;  %v560_v14 = vld [vmem:[#allocation2 + $0x118] sm:$0xff]  ;;  %s3843_s16 = sshll.u32 %s513_s14, 3  ;;  %s6459_s2 = scalar_lea.hbm %s6512_s11, %s3850_s25 }
 0x131   : > { %4011 = vmatprep.subr.bf16.mxu0 %v4010_v3  ;;  %v4140_v12 = vpack.c.bf16 %v543_v10, %v527_v9  ;;  %v576_v15 = vld [vmem:[#allocation2 + $0x198] sm:$0xff]  ;;  %4139 = vmatprep.subr.bf16.mxu1 %v4138_v7  ;;  %v4014_v16 = vpack.c.bf16 %v574_v13, %v558_v11  ;;  %v557_v18 = vld [vmem:[#allocation2 + $0x100] sm:$0xff]  ;;  %v559_v20 = vld [vmem:[#allocation2 + $0x110] sm:$0xff]  ;;  %s3853_s15 = sshll.u32 %s6309_s29, 5  ;;  %s515_s30 = scalar_lea.vmem [#allocation19], %s3843_s16 }
 0x132   : > { %4013 = vmatpush1.bf16.msra.mxu0 %v4012_v8  ;;  %v4142_v17 = vpack.c.bf16 %v576_v15, %v560_v14  ;;  %v573_v19 = vld [vmem:[#allocation2 + $0x180] sm:$0xff]  ;;  %v575_v22 = vld [vmem:[#allocation2 + $0x190] sm:$0xff]  ;;  %v590_v23 = vld [vmem:[#allocation2 + $0x208] sm:$0xff]  ;;  %s6315_s22 = scalar_lea.vmem %s6501_s0, %s3853_s15  ;;  %s3662_s6 = sshll.u32 %s515_s30, 4  ;;  %s6461_s6 = int_to_ptr.vmem [resolvable:$true] %s3662_s6 }
 0x133   : > { %4141 = vmatpush1.bf16.msra.mxu1 %v4140_v12  ;;  %v4016_v21 = vpack.c.bf16 %v573_v19, %v557_v18  ;;  %v606_v24 = vld [vmem:[#allocation2 + $0x288] sm:$0xff]  ;;  %4015 = vmatprep.subr.bf16.mxu0 %v4014_v16  ;;  %v4144_v25 = vpack.c.bf16 %v575_v22, %v559_v20  ;;  %v592_v27 = vld [vmem:[#allocation2 + $0x218] sm:$0xff]  ;;  %v589_v29 = vld [vmem:[#allocation2 + $0x200] sm:$0xff]  ;;  %s3649_s24 = scalar_lea.sflag [#allocation4], %s513_s14  ;;  %s5840_s12 = scalar_lea.vmem %s6461_s6, 128 }
 0x134   : > { %4143 = vmatprep.subr.bf16.mxu1 %v4142_v17  ;;  %v4018_v26 = vpack.c.bf16 %v606_v24, %v590_v23  ;;  %v608_v28 = vld [vmem:[#allocation2 + $0x298] sm:$0xff]  ;;  %v605_v31 = vld [vmem:[#allocation2 + $0x280] sm:$0xff]  ;;  %v591_v32 = vld [vmem:[#allocation2 + $0x210] sm:$0xff]  ;;  %p5841_p13 = scmp.ne.s32.totalorder %s6461_s6, %s5840_s12  ;;  %p6555_p1 = scmp.ne.s32.totalorder %s6531_s27, 0 }
 0x135   : > { %v4146_v30 = vpack.c.bf16 %v608_v28, %v592_v27  ;;  %v607_v33 = vld [vmem:[#allocation2 + $0x290] sm:$0xff]  ;;  %v4020_v34 = vpack.c.bf16 %v605_v31, %v589_v29  ;;  %v622_v35 = vld [vmem:[#allocation2 + $0x308] sm:$0xff]  ;;  %v624_v37 = vld [vmem:[#allocation2 + $0x318] sm:$0xff]  ;;  %s5946_s21 = smov [#allocation19]  }
 0x136   : > { %4017 = vmatpush1.bf16.msra.mxu0 %v4016_v21  ;;  %v638_v36 = vld [vmem:[#allocation2 + $0x388] sm:$0xff]  ;;  %v4148_v38 = vpack.c.bf16 %v607_v33, %v591_v32  ;;  %v640_v40 = vld [vmem:[#allocation2 + $0x398] sm:$0xff]  ;;  %v621_v41 = vld [vmem:[#allocation2 + $0x300] sm:$0xff]  ;;  %p5842_p0 = pnand %p5841_p13, %p6555_p1  ;;  %s5844_s17 = sshll.u32 %s5946_s21, 4  ;;  %s5845_s17 = int_to_ptr.vmem [resolvable:$false] %s5844_s17 }
 0x137   : > { %4145 = vmatpush1.bf16.msra.mxu1 %v4144_v25  ;;  %4019 = vmatprep.subr.bf16.mxu0 %v4018_v26  ;;  %v4022_v39 = vpack.c.bf16 %v638_v36, %v622_v35  ;;  %v637_v42 = vld [vmem:[#allocation2 + $0x380] sm:$0xff]  ;;  %v4150_v43 = vpack.c.bf16 %v640_v40, %v624_v37  ;;  %v623_v44 = vld [vmem:[#allocation2 + $0x310] sm:$0xff]  ;;  %v654_v46 = vld [vmem:[#allocation2 + $0x408] sm:$0xff]  ;;  %s5846_s28 = scalar_lea.vmem %s5845_s17, 256  ;;  %p5847_p5 = scmp.lt.s32.totalorder %s6461_s6, %s5845_s17 }
 0x138   : > { %4147 = vmatprep.subr.bf16.mxu1 %v4146_v30  ;;  %v639_v45 = vld [vmem:[#allocation2 + $0x390] sm:$0xff]  ;;  %v670_v47 = vld [vmem:[#allocation2 + $0x488] sm:$0xff]  ;;  %v656_v48 = vld [vmem:[#allocation2 + $0x418] sm:$0xff]  ;;  %v4024_v50 = vpack.c.bf16 %v637_v42, %v621_v41  ;;  %p5843_p6 = pneg %p5842_p0  ;;  %p5848_p9 = scmp.lt.s32.totalorder %s5846_s28, %s5840_s12 }
 0x139   : > { %v672_v49 = vld [vmem:[#allocation2 + $0x498] sm:$0xff]  ;;  %v4152_v51 = vpack.c.bf16 %v639_v45, %v623_v44  ;;  %v4026_v52 = vpack.c.bf16 %v670_v47, %v654_v46  ;;  %v653_v53 = vld [vmem:[#allocation2 + $0x400] sm:$0xff]  ;;  %v655_v55 = vld [vmem:[#allocation2 + $0x410] sm:$0xff] }
 0x13a   : > { %4021 = vmatpush1.bf16.msra.mxu0 %v4020_v34  ;;  %v669_v54 = vld [vmem:[#allocation2 + $0x480] sm:$0xff]  ;;  %v4154_v56 = vpack.c.bf16 %v672_v49, %v656_v48  ;;  %v671_v57 = vld [vmem:[#allocation2 + $0x490] sm:$0xff]  ;;  %v686_v58 = vld [vmem:[#allocation2 + $0x508] sm:$0xff]  ;;  %p5849_p12 = por %p5848_p9, %p5847_p5 }
 0x13b   : > { %4149 = vmatpush1.bf16.msra.mxu1 %v4148_v38  ;;  %4023 = vmatprep.subr.bf16.mxu0 %v4022_v39  ;;  %v702_v59 = vld [vmem:[#allocation2 + $0x588] sm:$0xff]  ;;  %v688_v60 = vld [vmem:[#allocation2 + $0x518] sm:$0xff]  ;;  %v4028_v62 = vpack.c.bf16 %v669_v54, %v653_v53  ;;  %v4156_v63 = vpack.c.bf16 %v671_v57, %v655_v55  ;;  %v685_v1 = vld [vmem:[#allocation2 + $0x500] sm:$0xff] }
 0x13c   : > { %4151 = vmatprep.subr.bf16.mxu1 %v4150_v43  ;;  %v704_v61 = vld [vmem:[#allocation2 + $0x598] sm:$0xff]  ;;  %v4030_v0 = vpack.c.bf16 %v702_v59, %v686_v58  ;;  %v701_v2 = vld [vmem:[#allocation2 + $0x580] sm:$0xff]  ;;  %v687_v3 = vld [vmem:[#allocation2 + $0x510] sm:$0xff]  ;;  %p5850_p10 = pnand %p5849_p12, %p5843_p6 }
 0x13d   : > { %v4158_v4 = vpack.c.bf16 %v704_v61, %v688_v60  ;;  %v703_v5 = vld [vmem:[#allocation2 + $0x590] sm:$0xff]  ;;  %v718_v6 = vld [vmem:[#allocation2 + $0x608] sm:$0xff]  ;;  %v720_v8 = vld [vmem:[#allocation2 + $0x618] sm:$0xff]  ;;  %v4032_v10 = vpack.c.bf16 %v701_v2, %v685_v1 }
 0x13e   : > { %4025 = vmatpush1.bf16.msra.mxu0 %v4024_v50  ;;  %v734_v7 = vld [vmem:[#allocation2 + $0x688] sm:$0xff]  ;;  %v736_v9 = vld [vmem:[#allocation2 + $0x698] sm:$0xff]  ;;  %v4160_v11 = vpack.c.bf16 %v703_v5, %v687_v3  ;;  %v717_v13 = vld [vmem:[#allocation2 + $0x600] sm:$0xff] }
 0x13f   : > { %4153 = vmatpush1.bf16.msra.mxu1 %v4152_v51  ;;  %4027 = vmatprep.subr.bf16.mxu0 %v4026_v52  ;;  %v4034_v12 = vpack.c.bf16 %v734_v7, %v718_v6  ;;  %v733_v14 = vld [vmem:[#allocation2 + $0x680] sm:$0xff]  ;;  %v719_v15 = vld [vmem:[#allocation2 + $0x610] sm:$0xff]  ;;  %v4162_v16 = vpack.c.bf16 %v736_v9, %v720_v8  ;;  %v750_v18 = vld [vmem:[#allocation2 + $0x708] sm:$0xff] }
 0x140   : > { %4155 = vmatprep.subr.bf16.mxu1 %v4154_v56  ;;  %v735_v17 = vld [vmem:[#allocation2 + $0x690] sm:$0xff]  ;;  %v766_v19 = vld [vmem:[#allocation2 + $0x788] sm:$0xff]  ;;  %v752_v20 = vld [vmem:[#allocation2 + $0x718] sm:$0xff]  ;;  %v4036_v22 = vpack.c.bf16 %v733_v14, %v717_v13 }
 0x141   : > { %v768_v21 = vld [vmem:[#allocation2 + $0x798] sm:$0xff]  ;;  %v4164_v23 = vpack.c.bf16 %v735_v17, %v719_v15  ;;  %v4038_v24 = vpack.c.bf16 %v766_v19, %v750_v18  ;;  %v749_v25 = vld [vmem:[#allocation2 + $0x700] sm:$0xff]  ;;  %v751_v27 = vld [vmem:[#allocation2 + $0x710] sm:$0xff] }
 0x142   : > { %4029 = vmatpush1.bf16.msra.mxu0 %v4028_v62  ;;  %v765_v26 = vld [vmem:[#allocation2 + $0x780] sm:$0xff]  ;;  %v4166_v28 = vpack.c.bf16 %v768_v21, %v752_v20  ;;  %v767_v29 = vld [vmem:[#allocation2 + $0x790] sm:$0xff]  ;;  %v782_v30 = vld [vmem:[#allocation2 + $0x808] sm:$0xff] }
 0x143   : > { %4157 = vmatpush1.bf16.msra.mxu1 %v4156_v63  ;;  %4031 = vmatprep.subr.bf16.mxu0 %v4030_v0  ;;  %v798_v31 = vld [vmem:[#allocation2 + $0x888] sm:$0xff]  ;;  %v784_v32 = vld [vmem:[#allocation2 + $0x818] sm:$0xff]  ;;  %v4040_v34 = vpack.c.bf16 %v765_v26, %v749_v25  ;;  %v4168_v35 = vpack.c.bf16 %v767_v29, %v751_v27  ;;  %v781_v37 = vld [vmem:[#allocation2 + $0x800] sm:$0xff] }
 0x144   : > { %4159 = vmatprep.subr.bf16.mxu1 %v4158_v4  ;;  %v800_v33 = vld [vmem:[#allocation2 + $0x898] sm:$0xff]  ;;  %v4042_v36 = vpack.c.bf16 %v798_v31, %v782_v30  ;;  %v797_v38 = vld [vmem:[#allocation2 + $0x880] sm:$0xff]  ;;  %v783_v39 = vld [vmem:[#allocation2 + $0x810] sm:$0xff] }
 0x145   : > { %v4170_v40 = vpack.c.bf16 %v800_v33, %v784_v32  ;;  %v799_v41 = vld [vmem:[#allocation2 + $0x890] sm:$0xff]  ;;  %v814_v42 = vld [vmem:[#allocation2 + $0x908] sm:$0xff]  ;;  %v816_v44 = vld [vmem:[#allocation2 + $0x918] sm:$0xff]  ;;  %v4044_v46 = vpack.c.bf16 %v797_v38, %v781_v37 }
 0x146   : > { %4033 = vmatpush1.bf16.msra.mxu0 %v4032_v10  ;;  %v830_v43 = vld [vmem:[#allocation2 + $0x988] sm:$0xff]  ;;  %v832_v45 = vld [vmem:[#allocation2 + $0x998] sm:$0xff]  ;;  %v4172_v47 = vpack.c.bf16 %v799_v41, %v783_v39  ;;  %v813_v49 = vld [vmem:[#allocation2 + $0x900] sm:$0xff] }
 0x147   : > { %4161 = vmatpush1.bf16.msra.mxu1 %v4160_v11  ;;  %4035 = vmatprep.subr.bf16.mxu0 %v4034_v12  ;;  %v4046_v48 = vpack.c.bf16 %v830_v43, %v814_v42  ;;  %v829_v50 = vld [vmem:[#allocation2 + $0x980] sm:$0xff]  ;;  %v815_v51 = vld [vmem:[#allocation2 + $0x910] sm:$0xff]  ;;  %v4174_v52 = vpack.c.bf16 %v832_v45, %v816_v44  ;;  %v846_v54 = vld [vmem:[#allocation2 + $0xa08] sm:$0xff] }
 0x148   : > { %4163 = vmatprep.subr.bf16.mxu1 %v4162_v16  ;;  %v831_v53 = vld [vmem:[#allocation2 + $0x990] sm:$0xff]  ;;  %v862_v55 = vld [vmem:[#allocation2 + $0xa88] sm:$0xff]  ;;  %v848_v56 = vld [vmem:[#allocation2 + $0xa18] sm:$0xff]  ;;  %v4048_v58 = vpack.c.bf16 %v829_v50, %v813_v49 }
 0x149   : > { %v864_v57 = vld [vmem:[#allocation2 + $0xa98] sm:$0xff]  ;;  %v4176_v59 = vpack.c.bf16 %v831_v53, %v815_v51  ;;  %v4050_v60 = vpack.c.bf16 %v862_v55, %v846_v54  ;;  %v845_v61 = vld [vmem:[#allocation2 + $0xa00] sm:$0xff]  ;;  %v847_v63 = vld [vmem:[#allocation2 + $0xa10] sm:$0xff] }
 0x14a   : > { %4037 = vmatpush1.bf16.msra.mxu0 %v4036_v22  ;;  %v861_v62 = vld [vmem:[#allocation2 + $0xa80] sm:$0xff]  ;;  %v4178_v0 = vpack.c.bf16 %v864_v57, %v848_v56  ;;  %v863_v1 = vld [vmem:[#allocation2 + $0xa90] sm:$0xff]  ;;  %v878_v2 = vld [vmem:[#allocation2 + $0xb08] sm:$0xff] }
 0x14b   : > { %4165 = vmatpush1.bf16.msra.mxu1 %v4164_v23  ;;  %4039 = vmatprep.subr.bf16.mxu0 %v4038_v24  ;;  %v894_v3 = vld [vmem:[#allocation2 + $0xb88] sm:$0xff]  ;;  %v880_v4 = vld [vmem:[#allocation2 + $0xb18] sm:$0xff]  ;;  %v4052_v6 = vpack.c.bf16 %v861_v62, %v845_v61  ;;  %v877_v7 = vld [vmem:[#allocation2 + $0xb00] sm:$0xff]  ;;  %v4180_v8 = vpack.c.bf16 %v863_v1, %v847_v63 }
 0x14c   : > { %4167 = vmatprep.subr.bf16.mxu1 %v4166_v28  ;;  %v896_v5 = vld [vmem:[#allocation2 + $0xb98] sm:$0xff]  ;;  %v4054_v9 = vpack.c.bf16 %v894_v3, %v878_v2  ;;  %v893_v10 = vld [vmem:[#allocation2 + $0xb80] sm:$0xff]  ;;  %v879_v11 = vld [vmem:[#allocation2 + $0xb10] sm:$0xff] }
 0x14d   : > { %v895_v12 = vld [vmem:[#allocation2 + $0xb90] sm:$0xff]  ;;  %v4182_v13 = vpack.c.bf16 %v896_v5, %v880_v4  ;;  %v910_v14 = vld [vmem:[#allocation2 + $0xc08] sm:$0xff]  ;;  %v912_v17 = vld [vmem:[#allocation2 + $0xc18] sm:$0xff]  ;;  %v4056_v19 = vpack.c.bf16 %v893_v10, %v877_v7 }
 0x14e   : > { %4041 = vmatpush1.bf16.msra.mxu0 %v4040_v34  ;;  %v926_v15 = vld [vmem:[#allocation2 + $0xc88] sm:$0xff]  ;;  %v928_v18 = vld [vmem:[#allocation2 + $0xc98] sm:$0xff]  ;;  %v4184_v20 = vpack.c.bf16 %v895_v12, %v879_v11  ;;  %v909_v22 = vld [vmem:[#allocation2 + $0xc00] sm:$0xff] }
 0x14f   : > { %4169 = vmatpush1.bf16.msra.mxu1 %v4168_v35  ;;  %4043 = vmatprep.subr.bf16.mxu0 %v4042_v36  ;;  %v6318_v16 = vld [vmem:[%s6315_s22 + $0x8] sm:$0xff]  ;;  %v4058_v21 = vpack.c.bf16 %v926_v15, %v910_v14  ;;  %v925_v23 = vld [vmem:[#allocation2 + $0xc80] sm:$0xff]  ;;  %v911_v24 = vld [vmem:[#allocation2 + $0xc10] sm:$0xff]  ;;  %v4186_v25 = vpack.c.bf16 %v928_v18, %v912_v17 }
 0x150   : > { %4171 = vmatprep.subr.bf16.mxu1 %v4170_v40  ;;  %1697 = vmatprep.mubr.f32.mxu0 %v6318_v16  ;;  %v927_v26 = vld [vmem:[#allocation2 + $0xc90] sm:$0xff]  ;;  %v942_v27 = vld [vmem:[#allocation2 + $0xd08] sm:$0xff]  ;;  %v944_v29 = vld [vmem:[#allocation2 + $0xd18] sm:$0xff]  ;;  %v4060_v31 = vpack.c.bf16 %v925_v23, %v909_v22 }
 0x151   : > { %1839 = vmatprep.mubr.f32.mxu1 %v6318_v16  ;;  %v958_v28 = vld [vmem:[#allocation2 + $0xd88] sm:$0xff]  ;;  %v960_v30 = vld [vmem:[#allocation2 + $0xd98] sm:$0xff]  ;;  %v4188_v32 = vpack.c.bf16 %v927_v26, %v911_v24  ;;  %v941_v34 = vld [vmem:[#allocation2 + $0xd00] sm:$0xff] }
 0x152   : > { %4045 = vmatpush1.bf16.msra.mxu0 %v4044_v46  ;;  %v4062_v33 = vpack.c.bf16 %v958_v28, %v942_v27  ;;  %v957_v35 = vld [vmem:[#allocation2 + $0xd80] sm:$0xff]  ;;  %v943_v36 = vld [vmem:[#allocation2 + $0xd10] sm:$0xff]  ;;  %v4190_v37 = vpack.c.bf16 %v960_v30, %v944_v29  ;;  %v974_v39 = vld [vmem:[#allocation2 + $0xe08] sm:$0xff] }
 0x153   : > { %4173 = vmatpush1.bf16.msra.mxu1 %v4172_v47  ;;  %4047 = vmatprep.subr.bf16.mxu0 %v4046_v48  ;;  %v959_v38 = vld [vmem:[#allocation2 + $0xd90] sm:$0xff]  ;;  %v990_v40 = vld [vmem:[#allocation2 + $0xe88] sm:$0xff]  ;;  %v976_v41 = vld [vmem:[#allocation2 + $0xe18] sm:$0xff]  ;;  %v4064_v43 = vpack.c.bf16 %v957_v35, %v941_v34 }
 0x154   : > { %4175 = vmatprep.subr.bf16.mxu1 %v4174_v52  ;;  %v992_v42 = vld [vmem:[#allocation2 + $0xe98] sm:$0xff]  ;;  %v4192_v44 = vpack.c.bf16 %v959_v38, %v943_v36  ;;  %v4066_v45 = vpack.c.bf16 %v990_v40, %v974_v39  ;;  %v973_v46 = vld [vmem:[#allocation2 + $0xe00] sm:$0xff]  ;;  %v975_v48 = vld [vmem:[#allocation2 + $0xe10] sm:$0xff] }
 0x155   : > { %v989_v47 = vld [vmem:[#allocation2 + $0xe80] sm:$0xff]  ;;  %v4194_v49 = vpack.c.bf16 %v992_v42, %v976_v41  ;;  %v991_v50 = vld [vmem:[#allocation2 + $0xe90] sm:$0xff]  ;;  %v1006_v51 = vld [vmem:[#allocation2 + $0xf08] sm:$0xff] }
 0x156   : > { %4049 = vmatpush1.bf16.msra.mxu0 %v4048_v58  ;;  %v1022_v52 = vld [vmem:[#allocation2 + $0xf88] sm:$0xff]  ;;  %v1008_v53 = vld [vmem:[#allocation2 + $0xf18] sm:$0xff]  ;;  %v4068_v55 = vpack.c.bf16 %v989_v47, %v973_v46  ;;  %v4196_v56 = vpack.c.bf16 %v991_v50, %v975_v48  ;;  %v1005_v58 = vld [vmem:[#allocation2 + $0xf00] sm:$0xff] }
 0x157   : > { %4177 = vmatpush1.bf16.msra.mxu1 %v4176_v59  ;;  %4051 = vmatprep.subr.bf16.mxu0 %v4050_v60  ;;  %v1024_v54 = vld [vmem:[#allocation2 + $0xf98] sm:$0xff]  ;;  %v4070_v57 = vpack.c.bf16 %v1022_v52, %v1006_v51  ;;  %v1021_v59 = vld [vmem:[#allocation2 + $0xf80] sm:$0xff]  ;;  %v1007_v60 = vld [vmem:[#allocation2 + $0xf10] sm:$0xff] }
 0x158   : > { %4179 = vmatprep.subr.bf16.mxu1 %v4178_v0  ;;  %v4198_v61 = vpack.c.bf16 %v1024_v54, %v1008_v53  ;;  %v1023_v62 = vld [vmem:[#allocation2 + $0xf90] sm:$0xff]  ;;  %v1038_v63 = vld [vmem:[#allocation2 + $0x1008] sm:$0xff]  ;;  %v1040_v1 = vld [vmem:[#allocation2 + $0x1018] sm:$0xff]  ;;  %v4072_v3 = vpack.c.bf16 %v1021_v59, %v1005_v58 }
 0x159   : > { %v1054_v0 = vld [vmem:[#allocation2 + $0x1088] sm:$0xff]  ;;  %v1056_v2 = vld [vmem:[#allocation2 + $0x1098] sm:$0xff]  ;;  %v4200_v4 = vpack.c.bf16 %v1023_v62, %v1007_v60  ;;  %v1053_v7 = vld [vmem:[#allocation2 + $0x1080] sm:$0xff] }
 0x15a   : > { %4053 = vmatpush1.bf16.msra.mxu0 %v4052_v6  ;;  %v4074_v5 = vpack.c.bf16 %v1054_v0, %v1038_v63  ;;  %v1037_v6 = vld [vmem:[#allocation2 + $0x1000] sm:$0xff]  ;;  %v1055_v10 = vld [vmem:[#allocation2 + $0x1090] sm:$0xff]  ;;  %v1070_v11 = vld [vmem:[#allocation2 + $0x1108] sm:$0xff] }
 0x15b   : > { %4181 = vmatpush1.bf16.msra.mxu1 %v4180_v8  ;;  %4055 = vmatprep.subr.bf16.mxu0 %v4054_v9  ;;  %v1039_v8 = vld [vmem:[#allocation2 + $0x1010] sm:$0xff]  ;;  %v4202_v9 = vpack.c.bf16 %v1056_v2, %v1040_v1  ;;  %v1086_v12 = vld [vmem:[#allocation2 + $0x1188] sm:$0xff]  ;;  %v1088_v14 = vld [vmem:[#allocation2 + $0x1198] sm:$0xff]  ;;  %v4076_v17 = vpack.c.bf16 %v1053_v7, %v1037_v6 }
 0x15c   : > { %4183 = vmatprep.subr.bf16.mxu1 %v4182_v13  ;;  %v1072_v13 = vld [vmem:[#allocation2 + $0x1118] sm:$0xff]  ;;  %v521_v15 = vld [vmem:[%s6315_s22] sm:$0xff]  ;;  %v4204_v18 = vpack.c.bf16 %v1055_v10, %v1039_v8  ;;  %v1071_v22 = vld [vmem:[#allocation2 + $0x1110] sm:$0xff] }
 0x15d   : > { %v4206_v23 = vpack.c.bf16 %v1088_v14, %v1072_v13  ;;  %v1087_v24 = vld [vmem:[#allocation2 + $0x1190] sm:$0xff]  ;;  %v1118_v26 = vld [vmem:[#allocation2 + $0x1288] sm:$0xff]  ;;  %v1104_v27 = vld [vmem:[#allocation2 + $0x1218] sm:$0xff] }
 0x15e   : > { %4057 = vmatpush1.bf16.msra.mxu0 %v4056_v19  ;;  %v4078_v19 = vpack.c.bf16 %v1086_v12, %v1070_v11  ;;  %v1120_v28 = vld [vmem:[#allocation2 + $0x1298] sm:$0xff]  ;;  %v4208_v30 = vpack.c.bf16 %v1087_v24, %v1071_v22  ;;  %v1103_v34 = vld [vmem:[#allocation2 + $0x1210] sm:$0xff]  ;;  %v1150_v38 = vld [vmem:[#allocation2 + $0x1388] sm:$0xff] }
 0x15f   : > { %4185 = vmatpush1.bf16.msra.mxu1 %v4184_v20  ;;  %4059 = vmatprep.subr.bf16.mxu0 %v4058_v21  ;;  %v1069_v20 = vld [vmem:[#allocation2 + $0x1100] sm:$0xff]  ;;  %v4210_v35 = vpack.c.bf16 %v1120_v28, %v1104_v27  ;;  %v1119_v36 = vld [vmem:[#allocation2 + $0x1290] sm:$0xff]  ;;  %v1136_v39 = vld [vmem:[#allocation2 + $0x1318] sm:$0xff] }
 0x160   : > { %4187 = vmatprep.subr.bf16.mxu1 %v4186_v25  ;;  %v1085_v21 = vld [vmem:[#allocation2 + $0x1180] sm:$0xff]  ;;  %v1102_v25 = vld [vmem:[#allocation2 + $0x1208] sm:$0xff]  ;;  %v1152_v40 = vld [vmem:[#allocation2 + $0x1398] sm:$0xff]  ;;  %v4212_v42 = vpack.c.bf16 %v1119_v36, %v1103_v34 }
 0x161   : > { %v4080_v29 = vpack.c.bf16 %v1085_v21, %v1069_v20  ;;  %v1135_v46 = vld [vmem:[#allocation2 + $0x1310] sm:$0xff]  ;;  %v4214_v47 = vpack.c.bf16 %v1152_v40, %v1136_v39  ;;  %v1182_v50 = vld [vmem:[#allocation2 + $0x1488] sm:$0xff]  ;;  %v1168_v51 = vld [vmem:[#allocation2 + $0x1418] sm:$0xff] }
 0x162   : > { %4061 = vmatpush1.bf16.msra.mxu0 %v4060_v31  ;;  %v4082_v31 = vpack.c.bf16 %v1118_v26, %v1102_v25  ;;  %v1151_v48 = vld [vmem:[#allocation2 + $0x1390] sm:$0xff]  ;;  %v1184_v52 = vld [vmem:[#allocation2 + $0x1498] sm:$0xff]  ;;  %v1214_v62 = vld [vmem:[#allocation2 + $0x1588] sm:$0xff] }
 0x163   : > { %4189 = vmatpush1.bf16.msra.mxu1 %v4188_v32  ;;  %4063 = vmatprep.subr.bf16.mxu0 %v4062_v33  ;;  %v1101_v32 = vld [vmem:[#allocation2 + $0x1200] sm:$0xff]  ;;  %v4216_v54 = vpack.c.bf16 %v1151_v48, %v1135_v46  ;;  %v1167_v58 = vld [vmem:[#allocation2 + $0x1410] sm:$0xff]  ;;  %v4218_v59 = vpack.c.bf16 %v1184_v52, %v1168_v51  ;;  %v1200_v63 = vld [vmem:[#allocation2 + $0x1518] sm:$0xff] }
 0x164   : > { %4191 = vmatprep.subr.bf16.mxu1 %v4190_v37  ;;  %v1117_v33 = vld [vmem:[#allocation2 + $0x1280] sm:$0xff]  ;;  %v1134_v37 = vld [vmem:[#allocation2 + $0x1308] sm:$0xff]  ;;  %v1183_v60 = vld [vmem:[#allocation2 + $0x1490] sm:$0xff] }
 0x165   : > { %v4084_v41 = vpack.c.bf16 %v1117_v33, %v1101_v32  ;;  %v1216_v0 = vld [vmem:[#allocation2 + $0x1598] sm:$0xff]  ;;  %v4220_v2 = vpack.c.bf16 %v1183_v60, %v1167_v58  ;;  %v1199_v6 = vld [vmem:[#allocation2 + $0x1510] sm:$0xff]  ;;  %v1246_v10 = vld [vmem:[#allocation2 + $0x1688] sm:$0xff] }
 0x166   : > { %4065 = vmatpush1.bf16.msra.mxu0 %v4064_v43  ;;  %v4086_v43 = vpack.c.bf16 %v1150_v38, %v1134_v37  ;;  %v4222_v7 = vpack.c.bf16 %v1216_v0, %v1200_v63  ;;  %v1215_v8 = vld [vmem:[#allocation2 + $0x1590] sm:$0xff]  ;;  %v1232_v11 = vld [vmem:[#allocation2 + $0x1618] sm:$0xff]  ;;  %v1229_v14 = vld [vmem:[#allocation2 + $0x1600] sm:$0xff] }
 0x167   : > { %4193 = vmatpush1.bf16.msra.mxu1 %v4192_v44  ;;  %4067 = vmatprep.subr.bf16.mxu0 %v4066_v45  ;;  %v1133_v44 = vld [vmem:[#allocation2 + $0x1300] sm:$0xff]  ;;  %v1248_v12 = vld [vmem:[#allocation2 + $0x1698] sm:$0xff]  ;;  %v1247_v20 = vld [vmem:[#allocation2 + $0x1690] sm:$0xff] }
 0x168   : > { %4195 = vmatprep.subr.bf16.mxu1 %v4194_v49  ;;  %v1149_v45 = vld [vmem:[#allocation2 + $0x1380] sm:$0xff]  ;;  %v1166_v49 = vld [vmem:[#allocation2 + $0x1408] sm:$0xff]  ;;  %v4226_v21 = vpack.c.bf16 %v1248_v12, %v1232_v11  ;;  %v6324_v24 = vld [vmem:[%s6315_s22 + $0x18] sm:$0xff] }
 0x169   : > { %v4088_v53 = vpack.c.bf16 %v1149_v45, %v1133_v44  ;;  %v1262_v22 = vld [vmem:[#allocation2 + $0x1708] sm:$0xff]  ;;  %v1264_v25 = vld [vmem:[#allocation2 + $0x1718] sm:$0xff]  ;;  %v1263_v32 = vld [vmem:[#allocation2 + $0x1710] sm:$0xff] }
 0x16a   : > { %4069 = vmatpush1.bf16.msra.mxu0 %v4068_v55  ;;  %v4090_v55 = vpack.c.bf16 %v1182_v50, %v1166_v49  ;;  %v1280_v26 = vld [vmem:[#allocation2 + $0x1798] sm:$0xff]  ;;  %v1279_v34 = vld [vmem:[#allocation2 + $0x1790] sm:$0xff]  ;;  %v1310_v36 = vld [vmem:[#allocation2 + $0x1888] sm:$0xff] }
 0x16b   : > { %4197 = vmatpush1.bf16.msra.mxu1 %v4196_v56  ;;  %4071 = vmatprep.subr.bf16.mxu0 %v4070_v57  ;;  %v1165_v56 = vld [vmem:[#allocation2 + $0x1400] sm:$0xff]  ;;  %v4230_v33 = vpack.c.bf16 %v1280_v26, %v1264_v25  ;;  %v1296_v37 = vld [vmem:[#allocation2 + $0x1818] sm:$0xff]  ;;  %v4232_v40 = vpack.c.bf16 %v1279_v34, %v1263_v32  ;;  %v1295_v44 = vld [vmem:[#allocation2 + $0x1810] sm:$0xff] }
 0x16c   : > { %4199 = vmatprep.subr.bf16.mxu1 %v4198_v61  ;;  %v1181_v57 = vld [vmem:[#allocation2 + $0x1480] sm:$0xff]  ;;  %v1198_v61 = vld [vmem:[#allocation2 + $0x1508] sm:$0xff]  ;;  %v1312_v38 = vld [vmem:[#allocation2 + $0x1898] sm:$0xff] }
 0x16d   : > { %v4092_v1 = vpack.c.bf16 %v1181_v57, %v1165_v56  ;;  %v4234_v45 = vpack.c.bf16 %v1312_v38, %v1296_v37  ;;  %v1311_v46 = vld [vmem:[#allocation2 + $0x1890] sm:$0xff]  ;;  %v1342_v48 = vld [vmem:[#allocation2 + $0x1988] sm:$0xff]  ;;  %v1328_v49 = vld [vmem:[#allocation2 + $0x1918] sm:$0xff] }
 0x16e   : > { %4073 = vmatpush1.bf16.msra.mxu0 %v4072_v3  ;;  %v4094_v3 = vpack.c.bf16 %v1214_v62, %v1198_v61  ;;  %v1344_v50 = vld [vmem:[#allocation2 + $0x1998] sm:$0xff]  ;;  %v4236_v52 = vpack.c.bf16 %v1311_v46, %v1295_v44  ;;  %v1327_v56 = vld [vmem:[#allocation2 + $0x1910] sm:$0xff]  ;;  %v1374_v60 = vld [vmem:[#allocation2 + $0x1a88] sm:$0xff] }
 0x16f   : > { %4201 = vmatpush1.bf16.msra.mxu1 %v4200_v4  ;;  %4075 = vmatprep.subr.bf16.mxu0 %v4074_v5  ;;  %v1197_v4 = vld [vmem:[#allocation2 + $0x1500] sm:$0xff]  ;;  %v4238_v57 = vpack.c.bf16 %v1344_v50, %v1328_v49  ;;  %v1343_v58 = vld [vmem:[#allocation2 + $0x1990] sm:$0xff]  ;;  %v1360_v61 = vld [vmem:[#allocation2 + $0x1a18] sm:$0xff] }
 0x170   : > { %4203 = vmatprep.subr.bf16.mxu1 %v4202_v9  ;;  %v1213_v5 = vld [vmem:[#allocation2 + $0x1580] sm:$0xff]  ;;  %v1230_v9 = vld [vmem:[#allocation2 + $0x1608] sm:$0xff]  ;;  %v1376_v62 = vld [vmem:[#allocation2 + $0x1a98] sm:$0xff]  ;;  %v4240_v0 = vpack.c.bf16 %v1343_v58, %v1327_v56 }
 0x171   : > { %1698 = vmatmul.mubr.f32.vlgmr.msra.gmra.mrb[0].mxu0 %v521_v15  ;;  %v4096_v13 = vpack.c.bf16 %v1213_v5, %v1197_v4  ;;  %v1359_v4 = vld [vmem:[#allocation2 + $0x1a10] sm:$0xff]  ;;  %v4242_v5 = vpack.c.bf16 %v1376_v62, %v1360_v61  ;;  %v1470_v34 = vld [vmem:[#allocation2 + $0x1d88] sm:$0xff] }
 0x172   : > { %4077 = vmatpush1.bf16.msra.mxu0 %v4076_v17  ;;  %1840 = vmatmul.mubr.f32.vlgmr.msra.gmra.mrb[0].mxu1 %v521_v15  ;;  %v4224_v15 = vpack.c.bf16 %v1215_v8, %v1199_v6  ;;  %v4098_v17 = vpack.c.bf16 %v1246_v10, %v1230_v9  ;;  %v1375_v6 = vld [vmem:[#allocation2 + $0x1a90] sm:$0xff]  ;;  %v1406_v8 = vld [vmem:[#allocation2 + $0x1b88] sm:$0xff]  ;;  %v1392_v9 = vld [vmem:[#allocation2 + $0x1b18] sm:$0xff] }
 0x173   : > { %4205 = vmatpush1.bf16.msra.mxu1 %v4204_v18  ;;  %4079 = vmatprep.subr.bf16.mxu0 %v4078_v19  ;;  %v1245_v18 = vld [vmem:[#allocation2 + $0x1680] sm:$0xff]  ;;  %v1231_v19 = vld [vmem:[#allocation2 + $0x1610] sm:$0xff]  ;;  %v1408_v10 = vld [vmem:[#allocation2 + $0x1b98] sm:$0xff]  ;;  %v4244_v12 = vpack.c.bf16 %v1375_v6, %v1359_v4 }
 0x174   : > { %4207 = vmatprep.subr.bf16.mxu1 %v4206_v23  ;;  %v1278_v23 = vld [vmem:[#allocation2 + $0x1788] sm:$0xff]  ;;  %1768 = vmatprep.mubr.f32.mxu0 %v6324_v24  ;;  %v4100_v27 = vpack.c.bf16 %v1245_v18, %v1229_v14  ;;  %v4228_v28 = vpack.c.bf16 %v1247_v20, %v1231_v19  ;;  %v1389_v14 = vld [vmem:[#allocation2 + $0x1b00] sm:$0xff]  ;;  %v4246_v18 = vpack.c.bf16 %v1408_v10, %v1392_v9  ;;  %v1407_v19 = vld [vmem:[#allocation2 + $0x1b90] sm:$0xff] }
 0x175   : > { %1910 = vmatprep.mubr.f32.mxu1 %v6324_v24  ;;  %v1422_v20 = vld [vmem:[#allocation2 + $0x1c08] sm:$0xff]  ;;  %v1439_v32 = vld [vmem:[#allocation2 + $0x1c90] sm:$0xff] }
 0x176   : > { %4081 = vmatpush1.bf16.msra.mxu0 %v4080_v29  ;;  %v4102_v29 = vpack.c.bf16 %v1278_v23, %v1262_v22  ;;  %v1424_v22 = vld [vmem:[#allocation2 + $0x1c18] sm:$0xff]  ;;  %v1471_v44 = vld [vmem:[#allocation2 + $0x1d90] sm:$0xff]  ;;  %v1502_v46 = vld [vmem:[#allocation2 + $0x1e88] sm:$0xff] }
 0x177   : > { %4209 = vmatpush1.bf16.msra.mxu1 %v4208_v30  ;;  %4083 = vmatprep.subr.bf16.mxu0 %v4082_v31  ;;  %v1261_v30 = vld [vmem:[#allocation2 + $0x1700] sm:$0xff]  ;;  %v1440_v23 = vld [vmem:[#allocation2 + $0x1c98] sm:$0xff]  ;;  %v1503_v56 = vld [vmem:[#allocation2 + $0x1e90] sm:$0xff] }
 0x178   : > { %4211 = vmatprep.subr.bf16.mxu1 %v4210_v35  ;;  %v1277_v31 = vld [vmem:[#allocation2 + $0x1780] sm:$0xff]  ;;  %v1294_v35 = vld [vmem:[#allocation2 + $0x1808] sm:$0xff]  ;;  %v1535_v4 = vld [vmem:[#allocation2 + $0x1f90] sm:$0xff] }
 0x179   : > { %v4104_v39 = vpack.c.bf16 %v1277_v31, %v1261_v30  ;;  %v1423_v30 = vld [vmem:[#allocation2 + $0x1c10] sm:$0xff]  ;;  %v4250_v31 = vpack.c.bf16 %v1440_v23, %v1424_v22  ;;  %v1534_v58 = vld [vmem:[#allocation2 + $0x1f88] sm:$0xff] }
 0x17a   : > { %4085 = vmatpush1.bf16.msra.mxu0 %v4084_v41  ;;  %v4106_v41 = vpack.c.bf16 %v1310_v36, %v1294_v35  ;;  %v1456_v35 = vld [vmem:[#allocation2 + $0x1d18] sm:$0xff]  ;;  %v4252_v38 = vpack.c.bf16 %v1439_v32, %v1423_v30  ;;  %v546_v6 = vld [vmem:[#allocation2 + $0xa8] sm:$0xff]  ;;  %v523_v22 = vld [vmem:[%s6315_s22 + $0x10] sm:$0xff] }
 0x17b   : > { %4213 = vmatpush1.bf16.msra.mxu1 %v4212_v42  ;;  %4087 = vmatprep.subr.bf16.mxu0 %v4086_v43  ;;  %v1293_v42 = vld [vmem:[#allocation2 + $0x1800] sm:$0xff]  ;;  %v1472_v36 = vld [vmem:[#allocation2 + $0x1d98] sm:$0xff]  ;;  %v594_v32 = vld [vmem:[#allocation2 + $0x228] sm:$0xff] }
 0x17c   : > { %4215 = vmatprep.subr.bf16.mxu1 %v4214_v47  ;;  %v1309_v43 = vld [vmem:[#allocation2 + $0x1880] sm:$0xff]  ;;  %v1326_v47 = vld [vmem:[#allocation2 + $0x1908] sm:$0xff] }
 0x17d   : > { %v4108_v51 = vpack.c.bf16 %v1309_v43, %v1293_v42  ;;  %v1455_v42 = vld [vmem:[#allocation2 + $0x1d10] sm:$0xff]  ;;  %v4254_v43 = vpack.c.bf16 %v1472_v36, %v1456_v35  ;;  %v612_v35 = vld [vmem:[#allocation2 + $0x2b8] sm:$0xff] }
 0x17e   : > { %4089 = vmatpush1.bf16.msra.mxu0 %v4088_v53  ;;  %v4110_v53 = vpack.c.bf16 %v1342_v48, %v1326_v47  ;;  %v1488_v47 = vld [vmem:[#allocation2 + $0x1e18] sm:$0xff]  ;;  %v4256_v50 = vpack.c.bf16 %v1471_v44, %v1455_v42  ;;  %v626_v44 = vld [vmem:[#allocation2 + $0x328] sm:$0xff] }
 0x17f   : > { %4217 = vmatpush1.bf16.msra.mxu1 %v4216_v54  ;;  %4091 = vmatprep.subr.bf16.mxu0 %v4090_v55  ;;  %v1325_v54 = vld [vmem:[#allocation2 + $0x1900] sm:$0xff]  ;;  %v1504_v48 = vld [vmem:[#allocation2 + $0x1e98] sm:$0xff] }
 0x180   : > { %4219 = vmatprep.subr.bf16.mxu1 %v4218_v59  ;;  %v1341_v55 = vld [vmem:[#allocation2 + $0x1980] sm:$0xff]  ;;  %v1358_v59 = vld [vmem:[#allocation2 + $0x1a08] sm:$0xff] }
 0x181   : > { %v4112_v63 = vpack.c.bf16 %v1341_v55, %v1325_v54  ;;  %v1487_v54 = vld [vmem:[#allocation2 + $0x1e10] sm:$0xff]  ;;  %v4258_v55 = vpack.c.bf16 %v1504_v48, %v1488_v47  ;;  %v644_v47 = vld [vmem:[#allocation2 + $0x3b8] sm:$0xff] }
 0x182   : > { %4093 = vmatpush1.bf16.msra.mxu0 %v4092_v1  ;;  %v4114_v1 = vpack.c.bf16 %v1374_v60, %v1358_v59  ;;  %v1520_v59 = vld [vmem:[#allocation2 + $0x1f18] sm:$0xff]  ;;  %v4260_v62 = vpack.c.bf16 %v1503_v56, %v1487_v54  ;;  %v658_v56 = vld [vmem:[#allocation2 + $0x428] sm:$0xff] }
 0x183   : > { %4221 = vmatpush1.bf16.msra.mxu1 %v4220_v2  ;;  %4095 = vmatprep.subr.bf16.mxu0 %v4094_v3  ;;  %v1357_v2 = vld [vmem:[#allocation2 + $0x1a00] sm:$0xff]  ;;  %v1536_v60 = vld [vmem:[#allocation2 + $0x1f98] sm:$0xff] }
 0x184   : > { %4223 = vmatprep.subr.bf16.mxu1 %v4222_v7  ;;  %v1373_v3 = vld [vmem:[#allocation2 + $0x1a80] sm:$0xff]  ;;  %v1390_v7 = vld [vmem:[#allocation2 + $0x1b08] sm:$0xff] }
 0x185   : > { %v4116_v11 = vpack.c.bf16 %v1373_v3, %v1357_v2  ;;  %v1519_v2 = vld [vmem:[#allocation2 + $0x1f10] sm:$0xff]  ;;  %v4262_v3 = vpack.c.bf16 %v1536_v60, %v1520_v59  ;;  %v676_v59 = vld [vmem:[#allocation2 + $0x4b8] sm:$0xff] }
 0x186   : > { %4097 = vmatpush1.bf16.msra.mxu0 %v4096_v13  ;;  %v4118_v13 = vpack.c.bf16 %v1406_v8, %v1390_v7  ;;  %v532_v7 = vld [vmem:[#allocation2 + $0x38] sm:$0xff]  ;;  %v4264_v10 = vpack.c.bf16 %v1535_v4, %v1519_v2  ;;  %v675_v2 = vld [vmem:[#allocation2 + $0x4b0] sm:$0xff]  ;;  %v706_v4 = vld [vmem:[#allocation2 + $0x5a8] sm:$0xff] }
 0x187   : > { %4225 = vmatpush1.bf16.msra.mxu1 %v4224_v15  ;;  %4099 = vmatprep.subr.bf16.mxu0 %v4098_v17  ;;  %v1405_v15 = vld [vmem:[#allocation2 + $0x1b80] sm:$0xff]  ;;  %v1391_v17 = vld [vmem:[#allocation2 + $0x1b10] sm:$0xff]  ;;  %v548_v8 = vld [vmem:[#allocation2 + $0xb8] sm:$0xff] }
 0x188   : > { %4227 = vmatprep.subr.bf16.mxu1 %v4226_v21  ;;  %v1438_v21 = vld [vmem:[#allocation2 + $0x1c88] sm:$0xff]  ;;  %v4120_v25 = vpack.c.bf16 %v1405_v15, %v1389_v14  ;;  %v4248_v26 = vpack.c.bf16 %v1407_v19, %v1391_v17  ;;  %v531_v14 = vld [vmem:[#allocation2 + $0x30] sm:$0xff]  ;;  %v4394_v15 = vpack.c.bf16 %v548_v8, %v532_v7 }
 0x189   : > { %v547_v17 = vld [vmem:[#allocation2 + $0xb0] sm:$0xff]  ;;  %v578_v19 = vld [vmem:[#allocation2 + $0x1a8] sm:$0xff] }
 0x18a   : > { %4101 = vmatpush1.bf16.msra.mxu0 %v4100_v27  ;;  %v4122_v27 = vpack.c.bf16 %v1438_v21, %v1422_v20  ;;  %v564_v20 = vld [vmem:[#allocation2 + $0x138] sm:$0xff] }
 0x18b   : > { %4229 = vmatpush1.bf16.msra.mxu1 %v4228_v28  ;;  %4103 = vmatprep.subr.bf16.mxu0 %v4102_v29  ;;  %v1421_v28 = vld [vmem:[#allocation2 + $0x1c00] sm:$0xff]  ;;  %v580_v21 = vld [vmem:[#allocation2 + $0x1b8] sm:$0xff] }
 0x18c   : > { %4231 = vmatprep.subr.bf16.mxu1 %v4230_v33  ;;  %v1437_v29 = vld [vmem:[#allocation2 + $0x1c80] sm:$0xff]  ;;  %v1454_v33 = vld [vmem:[#allocation2 + $0x1d08] sm:$0xff]  ;;  %v4398_v30 = vpack.c.bf16 %v580_v21, %v564_v20 }
 0x18d   : > { %v4124_v37 = vpack.c.bf16 %v1437_v29, %v1421_v28  ;;  %v577_v28 = vld [vmem:[#allocation2 + $0x1a0] sm:$0xff]  ;;  %v563_v29 = vld [vmem:[#allocation2 + $0x130] sm:$0xff] }
 0x18e   : > { %4105 = vmatpush1.bf16.msra.mxu0 %v4104_v39  ;;  %v4126_v39 = vpack.c.bf16 %v1470_v34, %v1454_v33  ;;  %v610_v33 = vld [vmem:[#allocation2 + $0x2a8] sm:$0xff]  ;;  %v596_v34 = vld [vmem:[#allocation2 + $0x238] sm:$0xff] }
 0x18f   : > { %4233 = vmatpush1.bf16.msra.mxu1 %v4232_v40  ;;  %4107 = vmatprep.subr.bf16.mxu0 %v4106_v41  ;;  %v1453_v40 = vld [vmem:[#allocation2 + $0x1d00] sm:$0xff]  ;;  %v4402_v42 = vpack.c.bf16 %v612_v35, %v596_v34 }
 0x190   : > { %4235 = vmatprep.subr.bf16.mxu1 %v4234_v45  ;;  %v1469_v41 = vld [vmem:[#allocation2 + $0x1d80] sm:$0xff]  ;;  %v1486_v45 = vld [vmem:[#allocation2 + $0x1e08] sm:$0xff] }
 0x191   : > { %v4128_v49 = vpack.c.bf16 %v1469_v41, %v1453_v40  ;;  %v609_v40 = vld [vmem:[#allocation2 + $0x2a0] sm:$0xff]  ;;  %v595_v41 = vld [vmem:[#allocation2 + $0x230] sm:$0xff] }
 0x192   : > { %4109 = vmatpush1.bf16.msra.mxu0 %v4108_v51  ;;  %v4130_v51 = vpack.c.bf16 %v1502_v46, %v1486_v45  ;;  %v642_v45 = vld [vmem:[#allocation2 + $0x3a8] sm:$0xff]  ;;  %v628_v46 = vld [vmem:[#allocation2 + $0x338] sm:$0xff] }
 0x193   : > { %4237 = vmatpush1.bf16.msra.mxu1 %v4236_v52  ;;  %4111 = vmatprep.subr.bf16.mxu0 %v4110_v53  ;;  %v1485_v52 = vld [vmem:[#allocation2 + $0x1e00] sm:$0xff]  ;;  %v4406_v54 = vpack.c.bf16 %v644_v47, %v628_v46 }
 0x194   : > { %4239 = vmatprep.subr.bf16.mxu1 %v4238_v57  ;;  %v1501_v53 = vld [vmem:[#allocation2 + $0x1e80] sm:$0xff]  ;;  %v1518_v57 = vld [vmem:[#allocation2 + $0x1f08] sm:$0xff] }
 0x195   : > { %v4132_v61 = vpack.c.bf16 %v1501_v53, %v1485_v52  ;;  %v641_v52 = vld [vmem:[#allocation2 + $0x3a0] sm:$0xff]  ;;  %v627_v53 = vld [vmem:[#allocation2 + $0x330] sm:$0xff] }
 0x196   : > { %4113 = vmatpush1.bf16.msra.mxu0 %v4112_v63  ;;  %v4134_v63 = vpack.c.bf16 %v1534_v58, %v1518_v57  ;;  %v674_v57 = vld [vmem:[#allocation2 + $0x4a8] sm:$0xff]  ;;  %v660_v58 = vld [vmem:[#allocation2 + $0x438] sm:$0xff] }
 0x197   : > { %4241 = vmatpush1.bf16.msra.mxu1 %v4240_v0  ;;  %4115 = vmatprep.subr.bf16.mxu0 %v4114_v1  ;;  %v1517_v0 = vld [vmem:[#allocation2 + $0x1f00] sm:$0xff] }
 0x198   : > { %4243 = vmatprep.subr.bf16.mxu1 %v4242_v5  ;;  %v1533_v1 = vld [vmem:[#allocation2 + $0x1f80] sm:$0xff]  ;;  %v530_v5 = vld [vmem:[#allocation2 + $0x28] sm:$0xff] }
 0x199   : > { %v4136_v9 = vpack.c.bf16 %v1533_v1, %v1517_v0  ;;  %v659_v0 = vld [vmem:[#allocation2 + $0x430] sm:$0xff]  ;;  %v4410_v1 = vpack.c.bf16 %v676_v59, %v660_v58 }
 0x19a   : > { %4117 = vmatpush1.bf16.msra.mxu0 %v4116_v11  ;;  %v4266_v11 = vpack.c.bf16 %v546_v6, %v530_v5  ;;  %v692_v5 = vld [vmem:[#allocation2 + $0x538] sm:$0xff]  ;;  %v4412_v8 = vpack.c.bf16 %v675_v2, %v659_v0  ;;  %v850_v0 = vld [vmem:[#allocation2 + $0xa28] sm:$0xff] }
 0x19b   : > { %4245 = vmatpush1.bf16.msra.mxu1 %v4244_v12  ;;  %4119 = vmatprep.subr.bf16.mxu0 %v4118_v13  ;;  %v529_v12 = vld [vmem:[#allocation2 + $0x20] sm:$0xff]  ;;  %v708_v6 = vld [vmem:[#allocation2 + $0x5b8] sm:$0xff] }
 0x19c   : > { %4247 = vmatprep.subr.bf16.mxu1 %v4246_v18  ;;  %v545_v13 = vld [vmem:[#allocation2 + $0xa0] sm:$0xff]  ;;  %v562_v18 = vld [vmem:[#allocation2 + $0x128] sm:$0xff]  ;;  %v852_v2 = vld [vmem:[#allocation2 + $0xa38] sm:$0xff] }
 0x19d   : > { %v4268_v23 = vpack.c.bf16 %v545_v13, %v529_v12  ;;  %v691_v12 = vld [vmem:[#allocation2 + $0x530] sm:$0xff]  ;;  %v4414_v13 = vpack.c.bf16 %v708_v6, %v692_v5 }
 0x19e   : > { %4121 = vmatpush1.bf16.msra.mxu0 %v4120_v25  ;;  %v4396_v25 = vpack.c.bf16 %v547_v17, %v531_v14  ;;  %v707_v14 = vld [vmem:[#allocation2 + $0x5b0] sm:$0xff]  ;;  %v738_v17 = vld [vmem:[#allocation2 + $0x6a8] sm:$0xff] }
 0x19f   : > { %4249 = vmatpush1.bf16.msra.mxu1 %v4248_v26  ;;  %4123 = vmatprep.subr.bf16.mxu0 %v4122_v27  ;;  %v4270_v26 = vpack.c.bf16 %v578_v19, %v562_v18  ;;  %v561_v27 = vld [vmem:[#allocation2 + $0x120] sm:$0xff]  ;;  %v724_v18 = vld [vmem:[#allocation2 + $0x638] sm:$0xff]  ;;  %v4416_v21 = vpack.c.bf16 %v707_v14, %v691_v12  ;;  %v882_v12 = vld [vmem:[#allocation2 + $0xb28] sm:$0xff] }
 0x1a0   : > { %4251 = vmatprep.subr.bf16.mxu1 %v4250_v31  ;;  %v579_v31 = vld [vmem:[#allocation2 + $0x1b0] sm:$0xff]  ;;  %v4272_v36 = vpack.c.bf16 %v577_v28, %v561_v27  ;;  %v740_v19 = vld [vmem:[#allocation2 + $0x6b8] sm:$0xff] }
 0x1a1   : > { %v4418_v27 = vpack.c.bf16 %v740_v19, %v724_v18  ;;  %v739_v28 = vld [vmem:[#allocation2 + $0x6b0] sm:$0xff]  ;;  %v884_v14 = vld [vmem:[#allocation2 + $0xb38] sm:$0xff] }
 0x1a2   : > { %4125 = vmatpush1.bf16.msra.mxu0 %v4124_v37  ;;  %v4400_v37 = vpack.c.bf16 %v579_v31, %v563_v29  ;;  %v754_v29 = vld [vmem:[#allocation2 + $0x728] sm:$0xff]  ;;  %v756_v31 = vld [vmem:[#allocation2 + $0x738] sm:$0xff] }
 0x1a3   : > { %4253 = vmatpush1.bf16.msra.mxu1 %v4252_v38  ;;  %4127 = vmatprep.subr.bf16.mxu0 %v4126_v39  ;;  %v4274_v38 = vpack.c.bf16 %v610_v33, %v594_v32  ;;  %v593_v39 = vld [vmem:[#allocation2 + $0x220] sm:$0xff]  ;;  %v772_v32 = vld [vmem:[#allocation2 + $0x7b8] sm:$0xff] }
 0x1a4   : > { %4255 = vmatprep.subr.bf16.mxu1 %v4254_v43  ;;  %v611_v43 = vld [vmem:[#allocation2 + $0x2b0] sm:$0xff]  ;;  %v4276_v48 = vpack.c.bf16 %v609_v40, %v593_v39  ;;  %v4422_v39 = vpack.c.bf16 %v772_v32, %v756_v31 }
 0x1a5   : > { %v771_v40 = vld [vmem:[#allocation2 + $0x7b0] sm:$0xff] }
 0x1a6   : > { %4129 = vmatpush1.bf16.msra.mxu0 %v4128_v49  ;;  %v4404_v49 = vpack.c.bf16 %v611_v43, %v595_v41  ;;  %v786_v41 = vld [vmem:[#allocation2 + $0x828] sm:$0xff]  ;;  %v788_v43 = vld [vmem:[#allocation2 + $0x838] sm:$0xff] }
 0x1a7   : > { %4257 = vmatpush1.bf16.msra.mxu1 %v4256_v50  ;;  %4131 = vmatprep.subr.bf16.mxu0 %v4130_v51  ;;  %v4278_v50 = vpack.c.bf16 %v642_v45, %v626_v44  ;;  %v625_v51 = vld [vmem:[#allocation2 + $0x320] sm:$0xff]  ;;  %v804_v44 = vld [vmem:[#allocation2 + $0x8b8] sm:$0xff] }
 0x1a8   : > { %4259 = vmatprep.subr.bf16.mxu1 %v4258_v55  ;;  %v643_v55 = vld [vmem:[#allocation2 + $0x3b0] sm:$0xff]  ;;  %v4280_v60 = vpack.c.bf16 %v641_v52, %v625_v51  ;;  %v4426_v51 = vpack.c.bf16 %v804_v44, %v788_v43 }
 0x1a9   : > { %v803_v52 = vld [vmem:[#allocation2 + $0x8b0] sm:$0xff] }
 0x1aa   : > { %4133 = vmatpush1.bf16.msra.mxu0 %v4132_v61  ;;  %v4282_v61 = vpack.c.bf16 %v674_v57, %v658_v56  ;;  %v836_v56 = vld [vmem:[#allocation2 + $0x9b8] sm:$0xff] }
 0x1ab   : > { %4261 = vmatpush1.bf16.msra.mxu1 %v4260_v62  ;;  %4135 = vmatprep.subr.bf16.mxu0 %v4134_v63  ;;  %v657_v62 = vld [vmem:[#allocation2 + $0x420] sm:$0xff] }
 0x1ac   : > { %4263 = vmatprep.subr.bf16.mxu1 %v4262_v3  ;;  %v673_v63 = vld [vmem:[#allocation2 + $0x4a0] sm:$0xff]  ;;  %v690_v3 = vld [vmem:[#allocation2 + $0x528] sm:$0xff] }
 0x1ad   : > { %v4284_v7 = vpack.c.bf16 %v673_v63, %v657_v62  ;;  %v835_v63 = vld [vmem:[#allocation2 + $0x9b0] sm:$0xff] }
 0x1ae   : > { %4137 = vmatpush1.bf16.msra.mxu0 %v4136_v9  ;;  %v4286_v9 = vpack.c.bf16 %v706_v4, %v690_v3  ;;  %v868_v3 = vld [vmem:[#allocation2 + $0xab8] sm:$0xff] }
 0x1af   : > { %4265 = vmatpush1.bf16.msra.mxu1 %v4264_v10  ;;  %4267 = vmatprep.subr.bf16.mxu0 %v4266_v11  ;;  %v689_v10 = vld [vmem:[#allocation2 + $0x520] sm:$0xff] }
 0x1b0   : > { %4395 = vmatprep.subr.bf16.mxu1 %v4394_v15  ;;  %v705_v11 = vld [vmem:[#allocation2 + $0x5a0] sm:$0xff]  ;;  %v722_v15 = vld [vmem:[#allocation2 + $0x628] sm:$0xff] }
 0x1b1   : > { %1769 = vmatmul.mubr.f32.vlgmr.msra.gmra.mrb[0].mxu0 %v523_v22  ;;  %v4288_v20 = vpack.c.bf16 %v705_v11, %v689_v10  ;;  %v4434_v10 = vpack.c.bf16 %v868_v3, %v852_v2  ;;  %v867_v11 = vld [vmem:[#allocation2 + $0xab0] sm:$0xff] }
 0x1b2   : > { %1911 = vmatmul.mubr.f32.vlgmr.msra.gmra.mrb[0].mxu1 %v523_v22  ;;  %4269 = vmatpush1.bf16.msra.mxu0 %v4268_v23  ;;  %v4290_v22 = vpack.c.bf16 %v738_v17, %v722_v15  ;;  %v721_v23 = vld [vmem:[#allocation2 + $0x620] sm:$0xff]  ;;  %v900_v15 = vld [vmem:[#allocation2 + $0xbb8] sm:$0xff] }
 0x1b3   : > { %4397 = vmatpush1.bf16.msra.mxu1 %v4396_v25  ;;  %4271 = vmatprep.subr.bf16.mxu0 %v4270_v26  ;;  %v737_v25 = vld [vmem:[#allocation2 + $0x6a0] sm:$0xff]  ;;  %v723_v26 = vld [vmem:[#allocation2 + $0x630] sm:$0xff] }
 0x1b4   : > { %4399 = vmatprep.subr.bf16.mxu1 %v4398_v30  ;;  %1981 = vmatprep.mubr.f32.mxu0 %v6318_v16  ;;  %v770_v30 = vld [vmem:[#allocation2 + $0x7a8] sm:$0xff]  ;;  %v4292_v33 = vpack.c.bf16 %v737_v25, %v721_v23  ;;  %v4420_v34 = vpack.c.bf16 %v739_v28, %v723_v26  ;;  %v4438_v23 = vpack.c.bf16 %v900_v15, %v884_v14  ;;  %v899_v25 = vld [vmem:[#allocation2 + $0xbb0] sm:$0xff]  ;;  %v916_v28 = vld [vmem:[#allocation2 + $0xc38] sm:$0xff] }
 0x1b5   : > { %2123 = vmatprep.mubr.f32.mxu1 %v6318_v16  ;;  %v4408_v16 = vpack.c.bf16 %v643_v55, %v627_v53  ;;  %v4294_v35 = vpack.c.bf16 %v770_v30, %v754_v29  ;;  %v818_v53 = vld [vmem:[#allocation2 + $0x928] sm:$0xff]  ;;  %v820_v55 = vld [vmem:[#allocation2 + $0x938] sm:$0xff] }
 0x1b6   : > { %4273 = vmatpush1.bf16.msra.mxu0 %v4272_v36  ;;  %v753_v36 = vld [vmem:[#allocation2 + $0x720] sm:$0xff]  ;;  %v4430_v62 = vpack.c.bf16 %v836_v56, %v820_v55  ;;  %v914_v26 = vld [vmem:[#allocation2 + $0xc28] sm:$0xff]  ;;  %v932_v29 = vld [vmem:[#allocation2 + $0xcb8] sm:$0xff] }
 0x1b7   : > { %4401 = vmatpush1.bf16.msra.mxu1 %v4400_v37  ;;  %4275 = vmatprep.subr.bf16.mxu0 %v4274_v38  ;;  %v769_v37 = vld [vmem:[#allocation2 + $0x7a0] sm:$0xff]  ;;  %v755_v38 = vld [vmem:[#allocation2 + $0x730] sm:$0xff] }
 0x1b8   : > { %4403 = vmatprep.subr.bf16.mxu1 %v4402_v42  ;;  %v802_v42 = vld [vmem:[#allocation2 + $0x8a8] sm:$0xff]  ;;  %v4296_v45 = vpack.c.bf16 %v769_v37, %v753_v36  ;;  %v4424_v46 = vpack.c.bf16 %v771_v40, %v755_v38  ;;  %v4442_v36 = vpack.c.bf16 %v932_v29, %v916_v28  ;;  %v931_v37 = vld [vmem:[#allocation2 + $0xcb0] sm:$0xff]  ;;  %v948_v40 = vld [vmem:[#allocation2 + $0xd38] sm:$0xff] }
 0x1b9   : > { %v4298_v47 = vpack.c.bf16 %v802_v42, %v786_v41  ;;  %v946_v38 = vld [vmem:[#allocation2 + $0xd28] sm:$0xff]  ;;  %v964_v41 = vld [vmem:[#allocation2 + $0xdb8] sm:$0xff] }
 0x1ba   : > { %4277 = vmatpush1.bf16.msra.mxu0 %v4276_v48  ;;  %v785_v48 = vld [vmem:[#allocation2 + $0x820] sm:$0xff] }
 0x1bb   : > { %4405 = vmatpush1.bf16.msra.mxu1 %v4404_v49  ;;  %4279 = vmatprep.subr.bf16.mxu0 %v4278_v50  ;;  %v801_v49 = vld [vmem:[#allocation2 + $0x8a0] sm:$0xff]  ;;  %v787_v50 = vld [vmem:[#allocation2 + $0x830] sm:$0xff] }
 0x1bc   : > { %4407 = vmatprep.subr.bf16.mxu1 %v4406_v54  ;;  %v834_v54 = vld [vmem:[#allocation2 + $0x9a8] sm:$0xff]  ;;  %v4300_v57 = vpack.c.bf16 %v801_v49, %v785_v48  ;;  %v4428_v58 = vpack.c.bf16 %v803_v52, %v787_v50  ;;  %v4446_v48 = vpack.c.bf16 %v964_v41, %v948_v40  ;;  %v963_v49 = vld [vmem:[#allocation2 + $0xdb0] sm:$0xff]  ;;  %v980_v52 = vld [vmem:[#allocation2 + $0xe38] sm:$0xff] }
 0x1bd   : > { %v4302_v59 = vpack.c.bf16 %v834_v54, %v818_v53  ;;  %v978_v50 = vld [vmem:[#allocation2 + $0xe28] sm:$0xff]  ;;  %v996_v53 = vld [vmem:[#allocation2 + $0xeb8] sm:$0xff] }
 0x1be   : > { %4281 = vmatpush1.bf16.msra.mxu0 %v4280_v60  ;;  %v817_v60 = vld [vmem:[#allocation2 + $0x920] sm:$0xff] }
 0x1bf   : > { %4409 = vmatpush1.bf16.msra.mxu1 %v4408_v16  ;;  %4283 = vmatprep.subr.bf16.mxu0 %v4282_v61  ;;  %v833_v16 = vld [vmem:[#allocation2 + $0x9a0] sm:$0xff]  ;;  %v819_v61 = vld [vmem:[#allocation2 + $0x930] sm:$0xff] }
 0x1c0   : > { %4411 = vmatprep.subr.bf16.mxu1 %v4410_v1  ;;  %v866_v1 = vld [vmem:[#allocation2 + $0xaa8] sm:$0xff]  ;;  %v4304_v4 = vpack.c.bf16 %v833_v16, %v817_v60  ;;  %v4432_v5 = vpack.c.bf16 %v835_v63, %v819_v61  ;;  %v4450_v60 = vpack.c.bf16 %v996_v53, %v980_v52  ;;  %v995_v16 = vld [vmem:[#allocation2 + $0xeb0] sm:$0xff]  ;;  %v1012_v63 = vld [vmem:[#allocation2 + $0xf38] sm:$0xff] }
 0x1c1   : > { %v4306_v6 = vpack.c.bf16 %v866_v1, %v850_v0  ;;  %v1010_v61 = vld [vmem:[#allocation2 + $0xf28] sm:$0xff]  ;;  %v1028_v0 = vld [vmem:[#allocation2 + $0xfb8] sm:$0xff] }
 0x1c2   : > { %4285 = vmatpush1.bf16.msra.mxu0 %v4284_v7  ;;  %v849_v7 = vld [vmem:[#allocation2 + $0xa20] sm:$0xff] }
 0x1c3   : > { %4413 = vmatpush1.bf16.msra.mxu1 %v4412_v8  ;;  %4287 = vmatprep.subr.bf16.mxu0 %v4286_v9  ;;  %v865_v8 = vld [vmem:[#allocation2 + $0xaa0] sm:$0xff]  ;;  %v851_v9 = vld [vmem:[#allocation2 + $0xa30] sm:$0xff] }
 0x1c4   : > { %4415 = vmatprep.subr.bf16.mxu1 %v4414_v13  ;;  %v898_v13 = vld [vmem:[#allocation2 + $0xba8] sm:$0xff]  ;;  %v4308_v17 = vpack.c.bf16 %v865_v8, %v849_v7  ;;  %v4436_v18 = vpack.c.bf16 %v867_v11, %v851_v9  ;;  %v4454_v7 = vpack.c.bf16 %v1028_v0, %v1012_v63  ;;  %v1027_v8 = vld [vmem:[#allocation2 + $0xfb0] sm:$0xff]  ;;  %v1044_v11 = vld [vmem:[#allocation2 + $0x1038] sm:$0xff] }
 0x1c5   : > { %v4310_v19 = vpack.c.bf16 %v898_v13, %v882_v12  ;;  %v1042_v9 = vld [vmem:[#allocation2 + $0x1028] sm:$0xff]  ;;  %v1060_v12 = vld [vmem:[#allocation2 + $0x10b8] sm:$0xff] }
 0x1c6   : > { %4289 = vmatpush1.bf16.msra.mxu0 %v4288_v20  ;;  %v881_v20 = vld [vmem:[#allocation2 + $0xb20] sm:$0xff] }
 0x1c7   : > { %4417 = vmatpush1.bf16.msra.mxu1 %v4416_v21  ;;  %4291 = vmatprep.subr.bf16.mxu0 %v4290_v22  ;;  %v897_v21 = vld [vmem:[#allocation2 + $0xba0] sm:$0xff]  ;;  %v883_v22 = vld [vmem:[#allocation2 + $0xb30] sm:$0xff] }
 0x1c8   : > { %4419 = vmatprep.subr.bf16.mxu1 %v4418_v27  ;;  %v930_v27 = vld [vmem:[#allocation2 + $0xca8] sm:$0xff]  ;;  %v4312_v30 = vpack.c.bf16 %v897_v21, %v881_v20  ;;  %v4440_v31 = vpack.c.bf16 %v899_v25, %v883_v22  ;;  %v4458_v20 = vpack.c.bf16 %v1060_v12, %v1044_v11  ;;  %v1059_v21 = vld [vmem:[#allocation2 + $0x10b0] sm:$0xff]  ;;  %v1076_v25 = vld [vmem:[#allocation2 + $0x1138] sm:$0xff] }
 0x1c9   : > { %v4314_v32 = vpack.c.bf16 %v930_v27, %v914_v26  ;;  %v1074_v22 = vld [vmem:[#allocation2 + $0x1128] sm:$0xff]  ;;  %v1092_v26 = vld [vmem:[#allocation2 + $0x11b8] sm:$0xff] }
 0x1ca   : > { %4293 = vmatpush1.bf16.msra.mxu0 %v4292_v33  ;;  %v913_v33 = vld [vmem:[#allocation2 + $0xc20] sm:$0xff] }
 0x1cb   : > { %4421 = vmatpush1.bf16.msra.mxu1 %v4420_v34  ;;  %4295 = vmatprep.subr.bf16.mxu0 %v4294_v35  ;;  %v929_v34 = vld [vmem:[#allocation2 + $0xca0] sm:$0xff]  ;;  %v915_v35 = vld [vmem:[#allocation2 + $0xc30] sm:$0xff] }
 0x1cc   : > { %4423 = vmatprep.subr.bf16.mxu1 %v4422_v39  ;;  %v962_v39 = vld [vmem:[#allocation2 + $0xda8] sm:$0xff]  ;;  %v4316_v42 = vpack.c.bf16 %v929_v34, %v913_v33  ;;  %v4444_v43 = vpack.c.bf16 %v931_v37, %v915_v35  ;;  %v4462_v33 = vpack.c.bf16 %v1092_v26, %v1076_v25  ;;  %v1091_v34 = vld [vmem:[#allocation2 + $0x11b0] sm:$0xff]  ;;  %v5550_v37 = vld [vmem:[%s6315_s22] sm:$0xff] }
 0x1cd   : > { %v4318_v44 = vpack.c.bf16 %v962_v39, %v946_v38  ;;  %v1106_v35 = vld [vmem:[#allocation2 + $0x1228] sm:$0xff]  ;;  %v1108_v38 = vld [vmem:[#allocation2 + $0x1238] sm:$0xff] }
 0x1ce   : > { %4297 = vmatpush1.bf16.msra.mxu0 %v4296_v45  ;;  %v945_v45 = vld [vmem:[#allocation2 + $0xd20] sm:$0xff]  ;;  %v1124_v39 = vld [vmem:[#allocation2 + $0x12b8] sm:$0xff] }
 0x1cf   : > { %4425 = vmatpush1.bf16.msra.mxu1 %v4424_v46  ;;  %4299 = vmatprep.subr.bf16.mxu0 %v4298_v47  ;;  %v961_v46 = vld [vmem:[#allocation2 + $0xda0] sm:$0xff]  ;;  %v947_v47 = vld [vmem:[#allocation2 + $0xd30] sm:$0xff] }
 0x1d0   : > { %4427 = vmatprep.subr.bf16.mxu1 %v4426_v51  ;;  %v994_v51 = vld [vmem:[#allocation2 + $0xea8] sm:$0xff]  ;;  %v4320_v54 = vpack.c.bf16 %v961_v46, %v945_v45  ;;  %v4448_v55 = vpack.c.bf16 %v963_v49, %v947_v47  ;;  %v1107_v45 = vld [vmem:[#allocation2 + $0x1230] sm:$0xff]  ;;  %v4466_v46 = vpack.c.bf16 %v1124_v39, %v1108_v38  ;;  %v1265_v39 = vld [vmem:[#allocation2 + $0x1720] sm:$0xff] }
 0x1d1   : > { %v4322_v56 = vpack.c.bf16 %v994_v51, %v978_v50  ;;  %v1123_v47 = vld [vmem:[#allocation2 + $0x12b0] sm:$0xff]  ;;  %v1154_v49 = vld [vmem:[#allocation2 + $0x13a8] sm:$0xff]  ;;  %v1140_v50 = vld [vmem:[#allocation2 + $0x1338] sm:$0xff] }
 0x1d2   : > { %4301 = vmatpush1.bf16.msra.mxu0 %v4300_v57  ;;  %v977_v57 = vld [vmem:[#allocation2 + $0xe20] sm:$0xff]  ;;  %v1156_v51 = vld [vmem:[#allocation2 + $0x13b8] sm:$0xff]  ;;  %v4468_v53 = vpack.c.bf16 %v1123_v47, %v1107_v45  ;;  %v1314_v45 = vld [vmem:[#allocation2 + $0x18a8] sm:$0xff] }
 0x1d3   : > { %4429 = vmatpush1.bf16.msra.mxu1 %v4428_v58  ;;  %4303 = vmatprep.subr.bf16.mxu0 %v4302_v59  ;;  %v993_v58 = vld [vmem:[#allocation2 + $0xea0] sm:$0xff]  ;;  %v979_v59 = vld [vmem:[#allocation2 + $0xe30] sm:$0xff]  ;;  %v1316_v47 = vld [vmem:[#allocation2 + $0x18b8] sm:$0xff] }
 0x1d4   : > { %4431 = vmatprep.subr.bf16.mxu1 %v4430_v62  ;;  %v1026_v62 = vld [vmem:[#allocation2 + $0xfa8] sm:$0xff]  ;;  %v4324_v1 = vpack.c.bf16 %v993_v58, %v977_v57  ;;  %v4452_v2 = vpack.c.bf16 %v995_v16, %v979_v59  ;;  %v1139_v57 = vld [vmem:[#allocation2 + $0x1330] sm:$0xff]  ;;  %v4470_v58 = vpack.c.bf16 %v1156_v51, %v1140_v50  ;;  %v1297_v51 = vld [vmem:[#allocation2 + $0x1820] sm:$0xff] }
 0x1d5   : > { %v4326_v3 = vpack.c.bf16 %v1026_v62, %v1010_v61  ;;  %v1155_v59 = vld [vmem:[#allocation2 + $0x13b0] sm:$0xff]  ;;  %v1186_v16 = vld [vmem:[#allocation2 + $0x14a8] sm:$0xff]  ;;  %v1172_v61 = vld [vmem:[#allocation2 + $0x1438] sm:$0xff] }
 0x1d6   : > { %4305 = vmatpush1.bf16.msra.mxu0 %v4304_v4  ;;  %v1009_v4 = vld [vmem:[#allocation2 + $0xf20] sm:$0xff]  ;;  %v1188_v62 = vld [vmem:[#allocation2 + $0x14b8] sm:$0xff] }
 0x1d7   : > { %4433 = vmatpush1.bf16.msra.mxu1 %v4432_v5  ;;  %4307 = vmatprep.subr.bf16.mxu0 %v4306_v6  ;;  %v1025_v5 = vld [vmem:[#allocation2 + $0xfa0] sm:$0xff]  ;;  %v1011_v6 = vld [vmem:[#allocation2 + $0xf30] sm:$0xff] }
 0x1d8   : > { %4435 = vmatprep.subr.bf16.mxu1 %v4434_v10  ;;  %v1058_v10 = vld [vmem:[#allocation2 + $0x10a8] sm:$0xff]  ;;  %v4328_v13 = vpack.c.bf16 %v1025_v5, %v1009_v4  ;;  %v4456_v14 = vpack.c.bf16 %v1027_v8, %v1011_v6  ;;  %v4474_v4 = vpack.c.bf16 %v1188_v62, %v1172_v61  ;;  %v1187_v5 = vld [vmem:[#allocation2 + $0x14b0] sm:$0xff]  ;;  %v1204_v8 = vld [vmem:[#allocation2 + $0x1538] sm:$0xff] }
 0x1d9   : > { %v4330_v15 = vpack.c.bf16 %v1058_v10, %v1042_v9  ;;  %v1202_v6 = vld [vmem:[#allocation2 + $0x1528] sm:$0xff]  ;;  %v1220_v9 = vld [vmem:[#allocation2 + $0x15b8] sm:$0xff]  ;;  %v1329_v62 = vld [vmem:[#allocation2 + $0x1920] sm:$0xff] }
 0x1da   : > { %4309 = vmatpush1.bf16.msra.mxu0 %v4308_v17  ;;  %v1041_v17 = vld [vmem:[#allocation2 + $0x1020] sm:$0xff] }
 0x1db   : > { %4437 = vmatpush1.bf16.msra.mxu1 %v4436_v18  ;;  %4311 = vmatprep.subr.bf16.mxu0 %v4310_v19  ;;  %v1057_v18 = vld [vmem:[#allocation2 + $0x10a0] sm:$0xff]  ;;  %v1043_v19 = vld [vmem:[#allocation2 + $0x1030] sm:$0xff] }
 0x1dc   : > { %4439 = vmatprep.subr.bf16.mxu1 %v4438_v23  ;;  %v1090_v23 = vld [vmem:[#allocation2 + $0x11a8] sm:$0xff]  ;;  %v4332_v27 = vpack.c.bf16 %v1057_v18, %v1041_v17  ;;  %v4460_v28 = vpack.c.bf16 %v1059_v21, %v1043_v19  ;;  %v4478_v17 = vpack.c.bf16 %v1220_v9, %v1204_v8  ;;  %v1219_v18 = vld [vmem:[#allocation2 + $0x15b0] sm:$0xff]  ;;  %v1236_v21 = vld [vmem:[#allocation2 + $0x1638] sm:$0xff] }
 0x1dd   : > { %v4334_v29 = vpack.c.bf16 %v1090_v23, %v1074_v22  ;;  %v1234_v19 = vld [vmem:[#allocation2 + $0x1628] sm:$0xff]  ;;  %v1252_v22 = vld [vmem:[#allocation2 + $0x16b8] sm:$0xff]  ;;  %v1361_v9 = vld [vmem:[#allocation2 + $0x1a20] sm:$0xff] }
 0x1de   : > { %4313 = vmatpush1.bf16.msra.mxu0 %v4312_v30  ;;  %v1073_v30 = vld [vmem:[#allocation2 + $0x1120] sm:$0xff] }
 0x1df   : > { %4441 = vmatpush1.bf16.msra.mxu1 %v4440_v31  ;;  %4315 = vmatprep.subr.bf16.mxu0 %v4314_v32  ;;  %v1089_v31 = vld [vmem:[#allocation2 + $0x11a0] sm:$0xff]  ;;  %v1075_v32 = vld [vmem:[#allocation2 + $0x1130] sm:$0xff] }
 0x1e0   : > { %4443 = vmatprep.subr.bf16.mxu1 %v4442_v36  ;;  %v1122_v36 = vld [vmem:[#allocation2 + $0x12a8] sm:$0xff]  ;;  %v4336_v40 = vpack.c.bf16 %v1089_v31, %v1073_v30  ;;  %v4464_v41 = vpack.c.bf16 %v1091_v34, %v1075_v32  ;;  %v4482_v30 = vpack.c.bf16 %v1252_v22, %v1236_v21  ;;  %v1251_v31 = vld [vmem:[#allocation2 + $0x16b0] sm:$0xff]  ;;  %v1268_v34 = vld [vmem:[#allocation2 + $0x1738] sm:$0xff] }
 0x1e1   : > { %v1266_v32 = vld [vmem:[#allocation2 + $0x1728] sm:$0xff]  ;;  %v1393_v22 = vld [vmem:[#allocation2 + $0x1b20] sm:$0xff] }
 0x1e2   : > { %4317 = vmatpush1.bf16.msra.mxu0 %v4316_v42  ;;  %v4338_v42 = vpack.c.bf16 %v1122_v36, %v1106_v35  ;;  %v1284_v35 = vld [vmem:[#allocation2 + $0x17b8] sm:$0xff] }
 0x1e3   : > { %4445 = vmatpush1.bf16.msra.mxu1 %v4444_v43  ;;  %4319 = vmatprep.subr.bf16.mxu0 %v4318_v44  ;;  %v1105_v43 = vld [vmem:[#allocation2 + $0x1220] sm:$0xff] }
 0x1e4   : > { %4447 = vmatprep.subr.bf16.mxu1 %v4446_v48  ;;  %v1121_v44 = vld [vmem:[#allocation2 + $0x12a0] sm:$0xff]  ;;  %v1138_v48 = vld [vmem:[#allocation2 + $0x1328] sm:$0xff] }
 0x1e5   : > { %v4340_v52 = vpack.c.bf16 %v1121_v44, %v1105_v43  ;;  %v1283_v43 = vld [vmem:[#allocation2 + $0x17b0] sm:$0xff]  ;;  %v1298_v44 = vld [vmem:[#allocation2 + $0x1828] sm:$0xff] }
 0x1e6   : > { %4321 = vmatpush1.bf16.msra.mxu0 %v4320_v54  ;;  %v4342_v54 = vpack.c.bf16 %v1154_v49, %v1138_v48  ;;  %v4362_v50 = vpack.c.bf16 %v1314_v45, %v1298_v44 }
 0x1e7   : > { %4449 = vmatpush1.bf16.msra.mxu1 %v4448_v55  ;;  %4323 = vmatprep.subr.bf16.mxu0 %v4322_v56  ;;  %v1137_v55 = vld [vmem:[#allocation2 + $0x1320] sm:$0xff] }
 0x1e8   : > { %4451 = vmatprep.subr.bf16.mxu1 %v4450_v60  ;;  %v1153_v56 = vld [vmem:[#allocation2 + $0x13a0] sm:$0xff]  ;;  %v1170_v60 = vld [vmem:[#allocation2 + $0x1428] sm:$0xff] }
 0x1e9   : > { %v4344_v63 = vpack.c.bf16 %v1153_v56, %v1137_v55  ;;  %v4346_v0 = vpack.c.bf16 %v1186_v16, %v1170_v60  ;;  %v1315_v55 = vld [vmem:[#allocation2 + $0x18b0] sm:$0xff]  ;;  %v1330_v56 = vld [vmem:[#allocation2 + $0x1928] sm:$0xff] }
 0x1ea   : > { %4325 = vmatpush1.bf16.msra.mxu0 %v4324_v1  ;;  %v1169_v1 = vld [vmem:[#allocation2 + $0x1420] sm:$0xff] }
 0x1eb   : > { %4453 = vmatpush1.bf16.msra.mxu1 %v4452_v2  ;;  %4327 = vmatprep.subr.bf16.mxu0 %v4326_v3  ;;  %v1185_v2 = vld [vmem:[#allocation2 + $0x14a0] sm:$0xff]  ;;  %v1171_v3 = vld [vmem:[#allocation2 + $0x1430] sm:$0xff] }
 0x1ec   : > { %4455 = vmatprep.subr.bf16.mxu1 %v4454_v7  ;;  %v1218_v7 = vld [vmem:[#allocation2 + $0x15a8] sm:$0xff]  ;;  %v4348_v10 = vpack.c.bf16 %v1185_v2, %v1169_v1  ;;  %v4476_v11 = vpack.c.bf16 %v1187_v5, %v1171_v3  ;;  %v1347_v1 = vld [vmem:[#allocation2 + $0x19b0] sm:$0xff]  ;;  %v1380_v5 = vld [vmem:[#allocation2 + $0x1ab8] sm:$0xff] }
 0x1ed   : > { %v4350_v12 = vpack.c.bf16 %v1218_v7, %v1202_v6  ;;  %v1362_v2 = vld [vmem:[#allocation2 + $0x1a28] sm:$0xff] }
 0x1ee   : > { %4329 = vmatpush1.bf16.msra.mxu0 %v4328_v13  ;;  %v1201_v13 = vld [vmem:[#allocation2 + $0x1520] sm:$0xff]  ;;  %v1378_v3 = vld [vmem:[#allocation2 + $0x1aa8] sm:$0xff] }
 0x1ef   : > { %4457 = vmatpush1.bf16.msra.mxu1 %v4456_v14  ;;  %4331 = vmatprep.subr.bf16.mxu0 %v4330_v15  ;;  %v1217_v14 = vld [vmem:[#allocation2 + $0x15a0] sm:$0xff]  ;;  %v1203_v15 = vld [vmem:[#allocation2 + $0x1530] sm:$0xff]  ;;  %v4370_v8 = vpack.c.bf16 %v1378_v3, %v1362_v2 }
 0x1f0   : > { %4459 = vmatprep.subr.bf16.mxu1 %v4458_v20  ;;  %v1250_v20 = vld [vmem:[#allocation2 + $0x16a8] sm:$0xff]  ;;  %v4352_v23 = vpack.c.bf16 %v1217_v14, %v1201_v13  ;;  %v4480_v25 = vpack.c.bf16 %v1219_v18, %v1203_v15  ;;  %v1379_v13 = vld [vmem:[#allocation2 + $0x1ab0] sm:$0xff]  ;;  %v1412_v18 = vld [vmem:[#allocation2 + $0x1bb8] sm:$0xff] }
 0x1f1   : > { %1982 = vmatmul.mubr.f32.vlgmr.msra.gmra.mrb[2].mxu0 %v5550_v37  ;;  %v4354_v26 = vpack.c.bf16 %v1250_v20, %v1234_v19  ;;  %v1394_v14 = vld [vmem:[#allocation2 + $0x1b28] sm:$0xff] }
 0x1f2   : > { %4333 = vmatpush1.bf16.msra.mxu0 %v4332_v27  ;;  %2124 = vmatmul.mubr.f32.vlgmr.msra.gmra.mrb[2].mxu1 %v5550_v37  ;;  %v1233_v27 = vld [vmem:[#allocation2 + $0x1620] sm:$0xff]  ;;  %v1410_v15 = vld [vmem:[#allocation2 + $0x1ba8] sm:$0xff] }
 0x1f3   : > { %4461 = vmatpush1.bf16.msra.mxu1 %v4460_v28  ;;  %4335 = vmatprep.subr.bf16.mxu0 %v4334_v29  ;;  %v1249_v28 = vld [vmem:[#allocation2 + $0x16a0] sm:$0xff]  ;;  %v1235_v29 = vld [vmem:[#allocation2 + $0x1630] sm:$0xff]  ;;  %v4374_v21 = vpack.c.bf16 %v1410_v15, %v1394_v14 }
 0x1f4   : > { %4463 = vmatprep.subr.bf16.mxu1 %v4462_v33  ;;  %2052 = vmatprep.mubr.f32.mxu0 %v6324_v24  ;;  %v1282_v33 = vld [vmem:[#allocation2 + $0x17a8] sm:$0xff]  ;;  %v4356_v36 = vpack.c.bf16 %v1249_v28, %v1233_v27  ;;  %v4484_v37 = vpack.c.bf16 %v1251_v31, %v1235_v29  ;;  %v1411_v27 = vld [vmem:[#allocation2 + $0x1bb0] sm:$0xff]  ;;  %v1444_v31 = vld [vmem:[#allocation2 + $0x1cb8] sm:$0xff] }
 0x1f5   : > { %2194 = vmatprep.mubr.f32.mxu1 %v6324_v24  ;;  %v4472_v24 = vpack.c.bf16 %v1155_v59, %v1139_v57  ;;  %v4358_v38 = vpack.c.bf16 %v1282_v33, %v1266_v32  ;;  %v1346_v57 = vld [vmem:[#allocation2 + $0x19a8] sm:$0xff]  ;;  %v1348_v59 = vld [vmem:[#allocation2 + $0x19b8] sm:$0xff] }
 0x1f6   : > { %4337 = vmatpush1.bf16.msra.mxu0 %v4336_v40  ;;  %v1281_v40 = vld [vmem:[#allocation2 + $0x17a0] sm:$0xff]  ;;  %v4366_v61 = vpack.c.bf16 %v1346_v57, %v1330_v56  ;;  %v1426_v28 = vld [vmem:[#allocation2 + $0x1c28] sm:$0xff] }
 0x1f7   : > { %4465 = vmatpush1.bf16.msra.mxu1 %v4464_v41  ;;  %4339 = vmatprep.subr.bf16.mxu0 %v4338_v42  ;;  %v1267_v41 = vld [vmem:[#allocation2 + $0x1730] sm:$0xff]  ;;  %v4486_v42 = vpack.c.bf16 %v1284_v35, %v1268_v34  ;;  %v4360_v48 = vpack.c.bf16 %v1281_v40, %v1265_v39  ;;  %v1442_v29 = vld [vmem:[#allocation2 + $0x1ca8] sm:$0xff]  ;;  %v1425_v35 = vld [vmem:[#allocation2 + $0x1c20] sm:$0xff] }
 0x1f8   : > { %4467 = vmatprep.subr.bf16.mxu1 %v4466_v46  ;;  %v1300_v46 = vld [vmem:[#allocation2 + $0x1838] sm:$0xff]  ;;  %v4488_v49 = vpack.c.bf16 %v1283_v43, %v1267_v41  ;;  %v4378_v34 = vpack.c.bf16 %v1442_v29, %v1426_v28  ;;  %v1443_v39 = vld [vmem:[#allocation2 + $0x1cb0] sm:$0xff]  ;;  %v1458_v40 = vld [vmem:[#allocation2 + $0x1d28] sm:$0xff] }
 0x1f9   : > { %v1474_v41 = vld [vmem:[#allocation2 + $0x1da8] sm:$0xff]  ;;  %v1476_v43 = vld [vmem:[#allocation2 + $0x1db8] sm:$0xff] }
 0x1fa   : > { %4341 = vmatpush1.bf16.msra.mxu0 %v4340_v52  ;;  %v1313_v52 = vld [vmem:[#allocation2 + $0x18a0] sm:$0xff] }
 0x1fb   : > { %4469 = vmatpush1.bf16.msra.mxu1 %v4468_v53  ;;  %4343 = vmatprep.subr.bf16.mxu0 %v4342_v54  ;;  %v1299_v53 = vld [vmem:[#allocation2 + $0x1830] sm:$0xff]  ;;  %v4490_v54 = vpack.c.bf16 %v1316_v47, %v1300_v46  ;;  %v4364_v60 = vpack.c.bf16 %v1313_v52, %v1297_v51  ;;  %v4382_v46 = vpack.c.bf16 %v1474_v41, %v1458_v40  ;;  %v1457_v47 = vld [vmem:[#allocation2 + $0x1d20] sm:$0xff]  ;;  %v1490_v52 = vld [vmem:[#allocation2 + $0x1e28] sm:$0xff] }
 0x1fc   : > { %4471 = vmatprep.subr.bf16.mxu1 %v4470_v58  ;;  %v1332_v58 = vld [vmem:[#allocation2 + $0x1938] sm:$0xff]  ;;  %v4492_v16 = vpack.c.bf16 %v1315_v55, %v1299_v53  ;;  %v1475_v51 = vld [vmem:[#allocation2 + $0x1db0] sm:$0xff]  ;;  %v1506_v53 = vld [vmem:[#allocation2 + $0x1ea8] sm:$0xff] }
 0x1fd   : > { %v1508_v55 = vld [vmem:[#allocation2 + $0x1eb8] sm:$0xff] }
 0x1fe   : > { %4345 = vmatpush1.bf16.msra.mxu0 %v4344_v63  ;;  %v1345_v63 = vld [vmem:[#allocation2 + $0x19a0] sm:$0xff]  ;;  %v616_v40 = vld [vmem:[#allocation2 + $0x2d8] sm:$0xff] }
 0x1ff   : > { %4473 = vmatpush1.bf16.msra.mxu1 %v4472_v24  ;;  %4347 = vmatprep.subr.bf16.mxu0 %v4346_v0  ;;  %v1331_v24 = vld [vmem:[#allocation2 + $0x1930] sm:$0xff]  ;;  %v4494_v0 = vpack.c.bf16 %v1348_v59, %v1332_v58  ;;  %v4368_v6 = vpack.c.bf16 %v1345_v63, %v1329_v62  ;;  %v4386_v58 = vpack.c.bf16 %v1506_v53, %v1490_v52  ;;  %v1489_v59 = vld [vmem:[#allocation2 + $0x1e20] sm:$0xff]  ;;  %v1522_v63 = vld [vmem:[#allocation2 + $0x1f28] sm:$0xff] }
 0x200   : > { %4475 = vmatprep.subr.bf16.mxu1 %v4474_v4  ;;  %v1364_v4 = vld [vmem:[#allocation2 + $0x1a38] sm:$0xff]  ;;  %v4496_v7 = vpack.c.bf16 %v1347_v1, %v1331_v24  ;;  %v1507_v62 = vld [vmem:[#allocation2 + $0x1eb0] sm:$0xff]  ;;  %v1538_v24 = vld [vmem:[#allocation2 + $0x1fa8] sm:$0xff] }
 0x201   : > { %v1540_v1 = vld [vmem:[#allocation2 + $0x1fb8] sm:$0xff] }
 0x202   : > { %4349 = vmatpush1.bf16.msra.mxu0 %v4348_v10  ;;  %v1377_v10 = vld [vmem:[#allocation2 + $0x1aa0] sm:$0xff]  ;;  %v632_v52 = vld [vmem:[#allocation2 + $0x358] sm:$0xff] }
 0x203   : > { %4477 = vmatpush1.bf16.msra.mxu1 %v4476_v11  ;;  %4351 = vmatprep.subr.bf16.mxu0 %v4350_v12  ;;  %v1363_v11 = vld [vmem:[#allocation2 + $0x1a30] sm:$0xff]  ;;  %v4498_v12 = vpack.c.bf16 %v1380_v5, %v1364_v4  ;;  %v4372_v19 = vpack.c.bf16 %v1377_v10, %v1361_v9  ;;  %v4390_v4 = vpack.c.bf16 %v1538_v24, %v1522_v63  ;;  %v1521_v5 = vld [vmem:[#allocation2 + $0x1f20] sm:$0xff]  ;;  %v534_v10 = vld [vmem:[#allocation2 + $0x48] sm:$0xff] }
 0x204   : > { %4479 = vmatprep.subr.bf16.mxu1 %v4478_v17  ;;  %v1396_v17 = vld [vmem:[#allocation2 + $0x1b38] sm:$0xff]  ;;  %v4500_v20 = vpack.c.bf16 %v1379_v13, %v1363_v11  ;;  %v1539_v9 = vld [vmem:[#allocation2 + $0x1fb0] sm:$0xff]  ;;  %v550_v11 = vld [vmem:[#allocation2 + $0xc8] sm:$0xff] }
 0x205   : > { %v552_v13 = vld [vmem:[#allocation2 + $0xd8] sm:$0xff] }
 0x206   : > { %4353 = vmatpush1.bf16.msra.mxu0 %v4352_v23  ;;  %v1409_v23 = vld [vmem:[#allocation2 + $0x1ba0] sm:$0xff]  ;;  %v648_v53 = vld [vmem:[#allocation2 + $0x3d8] sm:$0xff] }
 0x207   : > { %4481 = vmatpush1.bf16.msra.mxu1 %v4480_v25  ;;  %4355 = vmatprep.subr.bf16.mxu0 %v4354_v26  ;;  %v1395_v25 = vld [vmem:[#allocation2 + $0x1b30] sm:$0xff]  ;;  %v4502_v26 = vpack.c.bf16 %v1412_v18, %v1396_v17  ;;  %v4376_v32 = vpack.c.bf16 %v1409_v23, %v1393_v22  ;;  %v4522_v17 = vpack.c.bf16 %v550_v11, %v534_v10  ;;  %v533_v18 = vld [vmem:[#allocation2 + $0x40] sm:$0xff]  ;;  %v566_v23 = vld [vmem:[#allocation2 + $0x148] sm:$0xff] }
 0x208   : > { %4483 = vmatprep.subr.bf16.mxu1 %v4482_v30  ;;  %v1428_v30 = vld [vmem:[#allocation2 + $0x1c38] sm:$0xff]  ;;  %v4504_v33 = vpack.c.bf16 %v1411_v27, %v1395_v25  ;;  %v551_v22 = vld [vmem:[#allocation2 + $0xd0] sm:$0xff]  ;;  %v582_v25 = vld [vmem:[#allocation2 + $0x1c8] sm:$0xff] }
 0x209   : > { %v584_v27 = vld [vmem:[#allocation2 + $0x1d8] sm:$0xff] }
 0x20a   : > { %4357 = vmatpush1.bf16.msra.mxu0 %v4356_v36  ;;  %v1441_v36 = vld [vmem:[#allocation2 + $0x1ca0] sm:$0xff]  ;;  %v664_v63 = vld [vmem:[#allocation2 + $0x458] sm:$0xff] }
 0x20b   : > { %4485 = vmatpush1.bf16.msra.mxu1 %v4484_v37  ;;  %4359 = vmatprep.subr.bf16.mxu0 %v4358_v38  ;;  %v1427_v37 = vld [vmem:[#allocation2 + $0x1c30] sm:$0xff]  ;;  %v4506_v38 = vpack.c.bf16 %v1444_v31, %v1428_v30  ;;  %v4380_v44 = vpack.c.bf16 %v1441_v36, %v1425_v35  ;;  %v4526_v30 = vpack.c.bf16 %v582_v25, %v566_v23  ;;  %v565_v31 = vld [vmem:[#allocation2 + $0x140] sm:$0xff]  ;;  %v598_v36 = vld [vmem:[#allocation2 + $0x248] sm:$0xff] }
 0x20c   : > { %4487 = vmatprep.subr.bf16.mxu1 %v4486_v42  ;;  %v1460_v42 = vld [vmem:[#allocation2 + $0x1d38] sm:$0xff]  ;;  %v4508_v45 = vpack.c.bf16 %v1443_v39, %v1427_v37  ;;  %v583_v35 = vld [vmem:[#allocation2 + $0x1d0] sm:$0xff]  ;;  %v614_v37 = vld [vmem:[#allocation2 + $0x2c8] sm:$0xff] }
 0x20d   : > { %v600_v39 = vld [vmem:[#allocation2 + $0x258] sm:$0xff] }
 0x20e   : > { %4361 = vmatpush1.bf16.msra.mxu0 %v4360_v48  ;;  %v1473_v48 = vld [vmem:[#allocation2 + $0x1da0] sm:$0xff]  ;;  %v680_v24 = vld [vmem:[#allocation2 + $0x4d8] sm:$0xff] }
 0x20f   : > { %4489 = vmatpush1.bf16.msra.mxu1 %v4488_v49  ;;  %4363 = vmatprep.subr.bf16.mxu0 %v4362_v50  ;;  %v1459_v49 = vld [vmem:[#allocation2 + $0x1d30] sm:$0xff]  ;;  %v4510_v50 = vpack.c.bf16 %v1476_v43, %v1460_v42  ;;  %v4384_v56 = vpack.c.bf16 %v1473_v48, %v1457_v47  ;;  %v4530_v43 = vpack.c.bf16 %v614_v37, %v598_v36  ;;  %v696_v10 = vld [vmem:[#allocation2 + $0x558] sm:$0xff] }
 0x210   : > { %4491 = vmatprep.subr.bf16.mxu1 %v4490_v54  ;;  %v1492_v54 = vld [vmem:[#allocation2 + $0x1e38] sm:$0xff]  ;;  %v4512_v57 = vpack.c.bf16 %v1475_v51, %v1459_v49  ;;  %v4658_v47 = vpack.c.bf16 %v616_v40, %v600_v39  ;;  %v615_v48 = vld [vmem:[#allocation2 + $0x2d0] sm:$0xff]  ;;  %v630_v49 = vld [vmem:[#allocation2 + $0x348] sm:$0xff] }
 0x211   : > { %v5552_v51 = vld [vmem:[%s6315_s22 + $0x8] sm:$0xff]  ;;  %v712_v11 = vld [vmem:[#allocation2 + $0x5d8] sm:$0xff] }
 0x212   : > { %4365 = vmatpush1.bf16.msra.mxu0 %v4364_v60  ;;  %v1505_v60 = vld [vmem:[#allocation2 + $0x1ea0] sm:$0xff]  ;;  %v728_v23 = vld [vmem:[#allocation2 + $0x658] sm:$0xff] }
 0x213   : > { %4493 = vmatpush1.bf16.msra.mxu1 %v4492_v16  ;;  %4367 = vmatprep.subr.bf16.mxu0 %v4366_v61  ;;  %v1491_v16 = vld [vmem:[#allocation2 + $0x1e30] sm:$0xff]  ;;  %v4514_v61 = vpack.c.bf16 %v1508_v55, %v1492_v54  ;;  %v4388_v2 = vpack.c.bf16 %v1505_v60, %v1489_v59  ;;  %v4662_v60 = vpack.c.bf16 %v648_v53, %v632_v52  ;;  %v744_v25 = vld [vmem:[#allocation2 + $0x6d8] sm:$0xff]  ;;  %v789_v53 = vld [vmem:[#allocation2 + $0x840] sm:$0xff] }
 0x214   : > { %4495 = vmatprep.subr.bf16.mxu1 %v4494_v0  ;;  %v1524_v0 = vld [vmem:[#allocation2 + $0x1f38] sm:$0xff]  ;;  %v4516_v3 = vpack.c.bf16 %v1507_v62, %v1491_v16  ;;  %v631_v59 = vld [vmem:[#allocation2 + $0x350] sm:$0xff]  ;;  %v678_v62 = vld [vmem:[#allocation2 + $0x4c8] sm:$0xff] }
 0x215   : > { %v647_v16 = vld [vmem:[#allocation2 + $0x3d0] sm:$0xff]  ;;  %v760_v36 = vld [vmem:[#allocation2 + $0x758] sm:$0xff] }
 0x216   : > { %4369 = vmatpush1.bf16.msra.mxu0 %v4368_v6  ;;  %v1537_v6 = vld [vmem:[#allocation2 + $0x1fa0] sm:$0xff]  ;;  %v776_v37 = vld [vmem:[#allocation2 + $0x7d8] sm:$0xff] }
 0x217   : > { %4497 = vmatpush1.bf16.msra.mxu1 %v4496_v7  ;;  %4371 = vmatprep.subr.bf16.mxu0 %v4370_v8  ;;  %v1523_v7 = vld [vmem:[#allocation2 + $0x1f30] sm:$0xff]  ;;  %v4518_v8 = vpack.c.bf16 %v1540_v1, %v1524_v0  ;;  %v4392_v14 = vpack.c.bf16 %v1537_v6, %v1521_v5  ;;  %v4664_v1 = vpack.c.bf16 %v647_v16, %v631_v59  ;;  %v838_v59 = vld [vmem:[#allocation2 + $0x9c8] sm:$0xff]  ;;  %v840_v16 = vld [vmem:[#allocation2 + $0x9d8] sm:$0xff] }
 0x218   : > { %4499 = vmatprep.subr.bf16.mxu1 %v4498_v12  ;;  %v536_v12 = vld [vmem:[#allocation2 + $0x58] sm:$0xff]  ;;  %v4520_v15 = vpack.c.bf16 %v1539_v9, %v1523_v7  ;;  %v663_v5 = vld [vmem:[#allocation2 + $0x450] sm:$0xff]  ;;  %v4666_v6 = vpack.c.bf16 %v680_v24, %v664_v63  ;;  %v710_v9 = vld [vmem:[#allocation2 + $0x5c8] sm:$0xff] }
 0x219   : > { %v679_v7 = vld [vmem:[#allocation2 + $0x4d0] sm:$0xff]  ;;  %v821_v24 = vld [vmem:[#allocation2 + $0x940] sm:$0xff] }
 0x21a   : > { %4373 = vmatpush1.bf16.msra.mxu0 %v4372_v19  ;;  %v549_v19 = vld [vmem:[#allocation2 + $0xc0] sm:$0xff] }
 0x21b   : > { %4501 = vmatpush1.bf16.msra.mxu1 %v4500_v20  ;;  %4375 = vmatprep.subr.bf16.mxu0 %v4374_v21  ;;  %v535_v20 = vld [vmem:[#allocation2 + $0x50] sm:$0xff]  ;;  %v4650_v21 = vpack.c.bf16 %v552_v13, %v536_v12  ;;  %v4524_v28 = vpack.c.bf16 %v549_v19, %v533_v18  ;;  %v4668_v13 = vpack.c.bf16 %v679_v7, %v663_v5  ;;  %v870_v5 = vld [vmem:[#allocation2 + $0xac8] sm:$0xff]  ;;  %v872_v7 = vld [vmem:[#allocation2 + $0xad8] sm:$0xff] }
 0x21c   : > { %4503 = vmatprep.subr.bf16.mxu1 %v4502_v26  ;;  %v568_v26 = vld [vmem:[#allocation2 + $0x158] sm:$0xff]  ;;  %v4652_v29 = vpack.c.bf16 %v551_v22, %v535_v20  ;;  %v695_v18 = vld [vmem:[#allocation2 + $0x550] sm:$0xff]  ;;  %v4670_v19 = vpack.c.bf16 %v712_v11, %v696_v10  ;;  %v742_v22 = vld [vmem:[#allocation2 + $0x6c8] sm:$0xff] }
 0x21d   : > { %v711_v20 = vld [vmem:[#allocation2 + $0x5d0] sm:$0xff]  ;;  %v853_v11 = vld [vmem:[#allocation2 + $0xa40] sm:$0xff] }
 0x21e   : > { %4377 = vmatpush1.bf16.msra.mxu0 %v4376_v32  ;;  %v581_v32 = vld [vmem:[#allocation2 + $0x1c0] sm:$0xff] }
 0x21f   : > { %4505 = vmatpush1.bf16.msra.mxu1 %v4504_v33  ;;  %4379 = vmatprep.subr.bf16.mxu0 %v4378_v34  ;;  %v567_v33 = vld [vmem:[#allocation2 + $0x150] sm:$0xff]  ;;  %v4654_v34 = vpack.c.bf16 %v584_v27, %v568_v26  ;;  %v4528_v41 = vpack.c.bf16 %v581_v32, %v565_v31  ;;  %v4672_v27 = vpack.c.bf16 %v711_v20, %v695_v18  ;;  %v902_v18 = vld [vmem:[#allocation2 + $0xbc8] sm:$0xff]  ;;  %v904_v20 = vld [vmem:[#allocation2 + $0xbd8] sm:$0xff] }
 0x220   : > { %4507 = vmatprep.subr.bf16.mxu1 %v4506_v38  ;;  %v5551_v38 = vld [vmem:[%s6315_s22 + $0x10] sm:$0xff]  ;;  %v4656_v42 = vpack.c.bf16 %v583_v35, %v567_v33  ;;  %v4674_v32 = vpack.c.bf16 %v744_v25, %v728_v23  ;;  %v774_v35 = vld [vmem:[#allocation2 + $0x7c8] sm:$0xff]  ;;  %v885_v25 = vld [vmem:[#allocation2 + $0xb40] sm:$0xff] }
 0x221   : > { %v727_v31 = vld [vmem:[#allocation2 + $0x650] sm:$0xff] }
 0x222   : > { %4381 = vmatpush1.bf16.msra.mxu0 %v4380_v44  ;;  %v597_v44 = vld [vmem:[#allocation2 + $0x240] sm:$0xff]  ;;  %v743_v33 = vld [vmem:[#allocation2 + $0x6d0] sm:$0xff] }
 0x223   : > { %4509 = vmatpush1.bf16.msra.mxu1 %v4508_v45  ;;  %4383 = vmatprep.subr.bf16.mxu0 %v4382_v46  ;;  %v613_v45 = vld [vmem:[#allocation2 + $0x2c0] sm:$0xff]  ;;  %v599_v46 = vld [vmem:[#allocation2 + $0x250] sm:$0xff]  ;;  %v4676_v39 = vpack.c.bf16 %v743_v33, %v727_v31  ;;  %v934_v31 = vld [vmem:[#allocation2 + $0xcc8] sm:$0xff] }
 0x224   : > { %4511 = vmatprep.subr.bf16.mxu1 %v4510_v50  ;;  %v646_v50 = vld [vmem:[#allocation2 + $0x3c8] sm:$0xff]  ;;  %v4532_v54 = vpack.c.bf16 %v613_v45, %v597_v44  ;;  %v4660_v55 = vpack.c.bf16 %v615_v48, %v599_v46  ;;  %v4678_v44 = vpack.c.bf16 %v776_v37, %v760_v36  ;;  %v775_v45 = vld [vmem:[#allocation2 + $0x7d0] sm:$0xff]  ;;  %v792_v48 = vld [vmem:[#allocation2 + $0x858] sm:$0xff] }
 0x225   : > { %v790_v46 = vld [vmem:[#allocation2 + $0x848] sm:$0xff]  ;;  %v936_v33 = vld [vmem:[#allocation2 + $0xcd8] sm:$0xff]  ;;  %v917_v37 = vld [vmem:[#allocation2 + $0xc40] sm:$0xff] }
 0x226   : > { %4385 = vmatpush1.bf16.msra.mxu0 %v4384_v56  ;;  %v4534_v56 = vpack.c.bf16 %v646_v50, %v630_v49  ;;  %v808_v49 = vld [vmem:[#allocation2 + $0x8d8] sm:$0xff] }
 0x227   : > { %4513 = vmatpush1.bf16.msra.mxu1 %v4512_v57  ;;  %4387 = vmatprep.subr.bf16.mxu0 %v4386_v58  ;;  %v629_v57 = vld [vmem:[#allocation2 + $0x340] sm:$0xff] }
 0x228   : > { %4515 = vmatprep.subr.bf16.mxu1 %v4514_v61  ;;  %v645_v58 = vld [vmem:[#allocation2 + $0x3c0] sm:$0xff]  ;;  %v662_v61 = vld [vmem:[#allocation2 + $0x448] sm:$0xff] }
 0x229   : > { %v4536_v0 = vpack.c.bf16 %v645_v58, %v629_v57  ;;  %v807_v57 = vld [vmem:[#allocation2 + $0x8d0] sm:$0xff]  ;;  %v822_v58 = vld [vmem:[#allocation2 + $0x948] sm:$0xff] }
 0x22a   : > { %4389 = vmatpush1.bf16.msra.mxu0 %v4388_v2  ;;  %v4538_v2 = vpack.c.bf16 %v678_v62, %v662_v61  ;;  %v4558_v63 = vpack.c.bf16 %v838_v59, %v822_v58 }
 0x22b   : > { %4517 = vmatpush1.bf16.msra.mxu1 %v4516_v3  ;;  %4391 = vmatprep.subr.bf16.mxu0 %v4390_v4  ;;  %v661_v3 = vld [vmem:[#allocation2 + $0x440] sm:$0xff] }
 0x22c   : > { %4519 = vmatprep.subr.bf16.mxu1 %v4518_v8  ;;  %v677_v4 = vld [vmem:[#allocation2 + $0x4c0] sm:$0xff]  ;;  %v694_v8 = vld [vmem:[#allocation2 + $0x548] sm:$0xff] }
 0x22d   : > { %v4540_v12 = vpack.c.bf16 %v677_v4, %v661_v3  ;;  %v839_v3 = vld [vmem:[#allocation2 + $0x9d0] sm:$0xff]  ;;  %v854_v4 = vld [vmem:[#allocation2 + $0xa48] sm:$0xff] }
 0x22e   : > { %4393 = vmatpush1.bf16.msra.mxu0 %v4392_v14  ;;  %v4542_v14 = vpack.c.bf16 %v710_v9, %v694_v8  ;;  %v4562_v10 = vpack.c.bf16 %v870_v5, %v854_v4 }
 0x22f   : > { %4521 = vmatpush1.bf16.msra.mxu1 %v4520_v15  ;;  %4523 = vmatprep.subr.bf16.mxu0 %v4522_v17  ;;  %v693_v15 = vld [vmem:[#allocation2 + $0x540] sm:$0xff] }
 0x230   : > { %4651 = vmatprep.subr.bf16.mxu1 %v4650_v21  ;;  %v709_v17 = vld [vmem:[#allocation2 + $0x5c0] sm:$0xff]  ;;  %v726_v21 = vld [vmem:[#allocation2 + $0x648] sm:$0xff] }
 0x231   : > { %2053 = vmatmul.mubr.f32.vlgmr.msra.gmra.mrb[2].mxu0 %v5551_v38  ;;  %v4544_v26 = vpack.c.bf16 %v709_v17, %v693_v15  ;;  %v871_v15 = vld [vmem:[#allocation2 + $0xad0] sm:$0xff]  ;;  %v886_v17 = vld [vmem:[#allocation2 + $0xb48] sm:$0xff] }
 0x232   : > { %2195 = vmatmul.mubr.f32.vlgmr.msra.gmra.mrb[2].mxu1 %v5551_v38  ;;  %4525 = vmatpush1.bf16.msra.mxu0 %v4524_v28  ;;  %v4546_v28 = vpack.c.bf16 %v742_v22, %v726_v21  ;;  %v4566_v23 = vpack.c.bf16 %v902_v18, %v886_v17 }
 0x233   : > { %4653 = vmatpush1.bf16.msra.mxu1 %v4652_v29  ;;  %4527 = vmatprep.subr.bf16.mxu0 %v4526_v30  ;;  %v725_v29 = vld [vmem:[#allocation2 + $0x640] sm:$0xff] }
 0x234   : > { %4655 = vmatprep.subr.bf16.mxu1 %v4654_v34  ;;  %2265 = vmatprep.mubr.f32.mxu0 %v5552_v51  ;;  %v741_v30 = vld [vmem:[#allocation2 + $0x6c0] sm:$0xff]  ;;  %v758_v34 = vld [vmem:[#allocation2 + $0x748] sm:$0xff] }
 0x235   : > { %2407 = vmatprep.mubr.f32.mxu1 %v5552_v51  ;;  %v4548_v38 = vpack.c.bf16 %v741_v30, %v725_v29  ;;  %v4550_v40 = vpack.c.bf16 %v774_v35, %v758_v34  ;;  %v903_v29 = vld [vmem:[#allocation2 + $0xbd0] sm:$0xff]  ;;  %v918_v30 = vld [vmem:[#allocation2 + $0xc48] sm:$0xff] }
 0x236   : > { %4529 = vmatpush1.bf16.msra.mxu0 %v4528_v41  ;;  %v757_v41 = vld [vmem:[#allocation2 + $0x740] sm:$0xff]  ;;  %v4570_v36 = vpack.c.bf16 %v934_v31, %v918_v30 }
 0x237   : > { %4657 = vmatpush1.bf16.msra.mxu1 %v4656_v42  ;;  %4531 = vmatprep.subr.bf16.mxu0 %v4530_v43  ;;  %v773_v42 = vld [vmem:[#allocation2 + $0x7c0] sm:$0xff]  ;;  %v759_v43 = vld [vmem:[#allocation2 + $0x750] sm:$0xff] }
 0x238   : > { %4659 = vmatprep.subr.bf16.mxu1 %v4658_v47  ;;  %v806_v47 = vld [vmem:[#allocation2 + $0x8c8] sm:$0xff]  ;;  %v4552_v50 = vpack.c.bf16 %v773_v42, %v757_v41  ;;  %v4680_v51 = vpack.c.bf16 %v775_v45, %v759_v43  ;;  %v935_v41 = vld [vmem:[#allocation2 + $0xcd0] sm:$0xff]  ;;  %v968_v45 = vld [vmem:[#allocation2 + $0xdd8] sm:$0xff] }
 0x239   : > { %v4554_v52 = vpack.c.bf16 %v806_v47, %v790_v46  ;;  %v950_v42 = vld [vmem:[#allocation2 + $0xd48] sm:$0xff] }
 0x23a   : > { %4533 = vmatpush1.bf16.msra.mxu0 %v4532_v54  ;;  %v805_v54 = vld [vmem:[#allocation2 + $0x8c0] sm:$0xff]  ;;  %v966_v43 = vld [vmem:[#allocation2 + $0xdc8] sm:$0xff] }
 0x23b   : > { %4661 = vmatpush1.bf16.msra.mxu1 %v4660_v55  ;;  %4535 = vmatprep.subr.bf16.mxu0 %v4534_v56  ;;  %v791_v55 = vld [vmem:[#allocation2 + $0x850] sm:$0xff]  ;;  %v4682_v56 = vpack.c.bf16 %v808_v49, %v792_v48  ;;  %v4556_v61 = vpack.c.bf16 %v805_v54, %v789_v53  ;;  %v4574_v48 = vpack.c.bf16 %v966_v43, %v950_v42  ;;  %v949_v49 = vld [vmem:[#allocation2 + $0xd40] sm:$0xff]  ;;  %v982_v54 = vld [vmem:[#allocation2 + $0xe48] sm:$0xff] }
 0x23c   : > { %4663 = vmatprep.subr.bf16.mxu1 %v4662_v60  ;;  %v824_v60 = vld [vmem:[#allocation2 + $0x958] sm:$0xff]  ;;  %v4684_v62 = vpack.c.bf16 %v807_v57, %v791_v55  ;;  %v967_v53 = vld [vmem:[#allocation2 + $0xdd0] sm:$0xff]  ;;  %v998_v55 = vld [vmem:[#allocation2 + $0xec8] sm:$0xff] }
 0x23d   : > { %v1000_v57 = vld [vmem:[#allocation2 + $0xed8] sm:$0xff] }
 0x23e   : > { %4537 = vmatpush1.bf16.msra.mxu0 %v4536_v0  ;;  %v837_v0 = vld [vmem:[#allocation2 + $0x9c0] sm:$0xff]  ;;  %v1128_v42 = vld [vmem:[#allocation2 + $0x12d8] sm:$0xff] }
 0x23f   : > { %4665 = vmatpush1.bf16.msra.mxu1 %v4664_v1  ;;  %4539 = vmatprep.subr.bf16.mxu0 %v4538_v2  ;;  %v823_v1 = vld [vmem:[#allocation2 + $0x950] sm:$0xff]  ;;  %v4686_v2 = vpack.c.bf16 %v840_v16, %v824_v60  ;;  %v4560_v8 = vpack.c.bf16 %v837_v0, %v821_v24  ;;  %v4578_v60 = vpack.c.bf16 %v998_v55, %v982_v54  ;;  %v981_v16 = vld [vmem:[#allocation2 + $0xe40] sm:$0xff]  ;;  %v1014_v0 = vld [vmem:[#allocation2 + $0xf48] sm:$0xff] }
 0x240   : > { %4667 = vmatprep.subr.bf16.mxu1 %v4666_v6  ;;  %v856_v6 = vld [vmem:[#allocation2 + $0xa58] sm:$0xff]  ;;  %v4688_v9 = vpack.c.bf16 %v839_v3, %v823_v1  ;;  %v999_v24 = vld [vmem:[#allocation2 + $0xed0] sm:$0xff]  ;;  %v1030_v1 = vld [vmem:[#allocation2 + $0xfc8] sm:$0xff] }
 0x241   : > { %v1032_v3 = vld [vmem:[#allocation2 + $0xfd8] sm:$0xff] }
 0x242   : > { %4541 = vmatpush1.bf16.msra.mxu0 %v4540_v12  ;;  %v869_v12 = vld [vmem:[#allocation2 + $0xac0] sm:$0xff]  ;;  %v1144_v54 = vld [vmem:[#allocation2 + $0x1358] sm:$0xff] }
 0x243   : > { %4669 = vmatpush1.bf16.msra.mxu1 %v4668_v13  ;;  %4543 = vmatprep.subr.bf16.mxu0 %v4542_v14  ;;  %v855_v13 = vld [vmem:[#allocation2 + $0xa50] sm:$0xff]  ;;  %v4690_v14 = vpack.c.bf16 %v872_v7, %v856_v6  ;;  %v4564_v21 = vpack.c.bf16 %v869_v12, %v853_v11  ;;  %v4582_v6 = vpack.c.bf16 %v1030_v1, %v1014_v0  ;;  %v1013_v7 = vld [vmem:[#allocation2 + $0xf40] sm:$0xff]  ;;  %v1046_v12 = vld [vmem:[#allocation2 + $0x1048] sm:$0xff] }
 0x244   : > { %4671 = vmatprep.subr.bf16.mxu1 %v4670_v19  ;;  %v888_v19 = vld [vmem:[#allocation2 + $0xb58] sm:$0xff]  ;;  %v4692_v22 = vpack.c.bf16 %v871_v15, %v855_v13  ;;  %v1031_v11 = vld [vmem:[#allocation2 + $0xfd0] sm:$0xff]  ;;  %v1062_v13 = vld [vmem:[#allocation2 + $0x10c8] sm:$0xff] }
 0x245   : > { %v1064_v15 = vld [vmem:[#allocation2 + $0x10d8] sm:$0xff] }
 0x246   : > { %4545 = vmatpush1.bf16.msra.mxu0 %v4544_v26  ;;  %v901_v26 = vld [vmem:[#allocation2 + $0xbc0] sm:$0xff]  ;;  %v1160_v55 = vld [vmem:[#allocation2 + $0x13d8] sm:$0xff] }
 0x247   : > { %4673 = vmatpush1.bf16.msra.mxu1 %v4672_v27  ;;  %4547 = vmatprep.subr.bf16.mxu0 %v4546_v28  ;;  %v887_v27 = vld [vmem:[#allocation2 + $0xb50] sm:$0xff]  ;;  %v4694_v28 = vpack.c.bf16 %v904_v20, %v888_v19  ;;  %v4568_v34 = vpack.c.bf16 %v901_v26, %v885_v25  ;;  %v4586_v19 = vpack.c.bf16 %v1062_v13, %v1046_v12  ;;  %v1045_v20 = vld [vmem:[#allocation2 + $0x1040] sm:$0xff]  ;;  %v1078_v26 = vld [vmem:[#allocation2 + $0x1148] sm:$0xff] }
 0x248   : > { %4675 = vmatprep.subr.bf16.mxu1 %v4674_v32  ;;  %v920_v32 = vld [vmem:[#allocation2 + $0xc58] sm:$0xff]  ;;  %v4696_v35 = vpack.c.bf16 %v903_v29, %v887_v27  ;;  %v1063_v25 = vld [vmem:[#allocation2 + $0x10d0] sm:$0xff]  ;;  %v1094_v27 = vld [vmem:[#allocation2 + $0x11c8] sm:$0xff] }
 0x249   : > { %v1096_v29 = vld [vmem:[#allocation2 + $0x11d8] sm:$0xff] }
 0x24a   : > { %4549 = vmatpush1.bf16.msra.mxu0 %v4548_v38  ;;  %v933_v38 = vld [vmem:[#allocation2 + $0xcc0] sm:$0xff]  ;;  %v1176_v0 = vld [vmem:[#allocation2 + $0x1458] sm:$0xff] }
 0x24b   : > { %4677 = vmatpush1.bf16.msra.mxu1 %v4676_v39  ;;  %4551 = vmatprep.subr.bf16.mxu0 %v4550_v40  ;;  %v919_v39 = vld [vmem:[#allocation2 + $0xc50] sm:$0xff]  ;;  %v4698_v40 = vpack.c.bf16 %v936_v33, %v920_v32  ;;  %v4572_v46 = vpack.c.bf16 %v933_v38, %v917_v37  ;;  %v4590_v32 = vpack.c.bf16 %v1094_v27, %v1078_v26  ;;  %v1077_v33 = vld [vmem:[#allocation2 + $0x1140] sm:$0xff]  ;;  %v1110_v38 = vld [vmem:[#allocation2 + $0x1248] sm:$0xff] }
 0x24c   : > { %4679 = vmatprep.subr.bf16.mxu1 %v4678_v44  ;;  %v952_v44 = vld [vmem:[#allocation2 + $0xd58] sm:$0xff]  ;;  %v4700_v47 = vpack.c.bf16 %v935_v41, %v919_v39  ;;  %v1095_v37 = vld [vmem:[#allocation2 + $0x11d0] sm:$0xff]  ;;  %v1126_v39 = vld [vmem:[#allocation2 + $0x12c8] sm:$0xff] }
 0x24d   : > { %v1112_v41 = vld [vmem:[#allocation2 + $0x1258] sm:$0xff] }
 0x24e   : > { %4553 = vmatpush1.bf16.msra.mxu0 %v4552_v50  ;;  %v965_v50 = vld [vmem:[#allocation2 + $0xdc0] sm:$0xff]  ;;  %v1192_v1 = vld [vmem:[#allocation2 + $0x14d8] sm:$0xff] }
 0x24f   : > { %4681 = vmatpush1.bf16.msra.mxu1 %v4680_v51  ;;  %4555 = vmatprep.subr.bf16.mxu0 %v4554_v52  ;;  %v951_v51 = vld [vmem:[#allocation2 + $0xd50] sm:$0xff]  ;;  %v4702_v52 = vpack.c.bf16 %v968_v45, %v952_v44  ;;  %v4576_v58 = vpack.c.bf16 %v965_v50, %v949_v49  ;;  %v4594_v45 = vpack.c.bf16 %v1126_v39, %v1110_v38  ;;  %v1208_v12 = vld [vmem:[#allocation2 + $0x1558] sm:$0xff]  ;;  %v1286_v38 = vld [vmem:[#allocation2 + $0x17c8] sm:$0xff] }
 0x250   : > { %4683 = vmatprep.subr.bf16.mxu1 %v4682_v56  ;;  %v984_v56 = vld [vmem:[#allocation2 + $0xe58] sm:$0xff]  ;;  %v4704_v59 = vpack.c.bf16 %v967_v53, %v951_v51  ;;  %v4722_v49 = vpack.c.bf16 %v1128_v42, %v1112_v41  ;;  %v1127_v50 = vld [vmem:[#allocation2 + $0x12d0] sm:$0xff]  ;;  %v1142_v51 = vld [vmem:[#allocation2 + $0x1348] sm:$0xff] }
 0x251   : > { %v5554_v53 = vld [vmem:[%s6315_s22 + $0x18] sm:$0xff] }
 0x252   : > { %4557 = vmatpush1.bf16.msra.mxu0 %v4556_v61  ;;  %v997_v61 = vld [vmem:[#allocation2 + $0xec0] sm:$0xff]  ;;  %v1224_v13 = vld [vmem:[#allocation2 + $0x15d8] sm:$0xff] }
 0x253   : > { %4685 = vmatpush1.bf16.msra.mxu1 %v4684_v62  ;;  %4559 = vmatprep.subr.bf16.mxu0 %v4558_v63  ;;  %v983_v62 = vld [vmem:[#allocation2 + $0xe50] sm:$0xff]  ;;  %v4706_v63 = vpack.c.bf16 %v1000_v57, %v984_v56  ;;  %v4580_v4 = vpack.c.bf16 %v997_v61, %v981_v16  ;;  %v4726_v61 = vpack.c.bf16 %v1160_v55, %v1144_v54  ;;  %v1240_v26 = vld [vmem:[#allocation2 + $0x1658] sm:$0xff] }
 0x254   : > { %4687 = vmatprep.subr.bf16.mxu1 %v4686_v2  ;;  %v1016_v2 = vld [vmem:[#allocation2 + $0xf58] sm:$0xff]  ;;  %v4708_v5 = vpack.c.bf16 %v999_v24, %v983_v62  ;;  %v1143_v16 = vld [vmem:[#allocation2 + $0x1350] sm:$0xff]  ;;  %v1190_v24 = vld [vmem:[#allocation2 + $0x14c8] sm:$0xff] }
 0x255   : > { %v1159_v62 = vld [vmem:[#allocation2 + $0x13d0] sm:$0xff]  ;;  %v1256_v27 = vld [vmem:[#allocation2 + $0x16d8] sm:$0xff] }
 0x256   : > { %4561 = vmatpush1.bf16.msra.mxu0 %v4560_v8  ;;  %v1029_v8 = vld [vmem:[#allocation2 + $0xfc0] sm:$0xff]  ;;  %v1272_v41 = vld [vmem:[#allocation2 + $0x1758] sm:$0xff] }
 0x257   : > { %4689 = vmatpush1.bf16.msra.mxu1 %v4688_v9  ;;  %4563 = vmatprep.subr.bf16.mxu0 %v4562_v10  ;;  %v1015_v9 = vld [vmem:[#allocation2 + $0xf50] sm:$0xff]  ;;  %v4710_v10 = vpack.c.bf16 %v1032_v3, %v1016_v2  ;;  %v4584_v17 = vpack.c.bf16 %v1029_v8, %v1013_v7  ;;  %v4728_v3 = vpack.c.bf16 %v1159_v62, %v1143_v16  ;;  %v1288_v42 = vld [vmem:[#allocation2 + $0x17d8] sm:$0xff] }
 0x258   : > { %4691 = vmatprep.subr.bf16.mxu1 %v4690_v14  ;;  %v1048_v14 = vld [vmem:[#allocation2 + $0x1058] sm:$0xff]  ;;  %v4712_v18 = vpack.c.bf16 %v1031_v11, %v1015_v9  ;;  %v1175_v7 = vld [vmem:[#allocation2 + $0x1450] sm:$0xff]  ;;  %v4730_v8 = vpack.c.bf16 %v1192_v1, %v1176_v0  ;;  %v1222_v11 = vld [vmem:[#allocation2 + $0x15c8] sm:$0xff] }
 0x259   : > { %v1191_v9 = vld [vmem:[#allocation2 + $0x14d0] sm:$0xff]  ;;  %v1304_v54 = vld [vmem:[#allocation2 + $0x1858] sm:$0xff] }
 0x25a   : > { %4565 = vmatpush1.bf16.msra.mxu0 %v4564_v21  ;;  %v1061_v21 = vld [vmem:[#allocation2 + $0x10c0] sm:$0xff]  ;;  %v1320_v55 = vld [vmem:[#allocation2 + $0x18d8] sm:$0xff]  ;;  %v1303_v16 = vld [vmem:[#allocation2 + $0x1850] sm:$0xff] }
 0x25b   : > { %4693 = vmatpush1.bf16.msra.mxu1 %v4692_v22  ;;  %4567 = vmatprep.subr.bf16.mxu0 %v4566_v23  ;;  %v1047_v22 = vld [vmem:[#allocation2 + $0x1050] sm:$0xff]  ;;  %v4714_v23 = vpack.c.bf16 %v1064_v15, %v1048_v14  ;;  %v4588_v30 = vpack.c.bf16 %v1061_v21, %v1045_v20  ;;  %v4732_v15 = vpack.c.bf16 %v1191_v9, %v1175_v7  ;;  %v1336_v0 = vld [vmem:[#allocation2 + $0x1958] sm:$0xff] }
 0x25c   : > { %4695 = vmatprep.subr.bf16.mxu1 %v4694_v28  ;;  %v1080_v28 = vld [vmem:[#allocation2 + $0x1158] sm:$0xff]  ;;  %v4716_v31 = vpack.c.bf16 %v1063_v25, %v1047_v22  ;;  %v1207_v20 = vld [vmem:[#allocation2 + $0x1550] sm:$0xff]  ;;  %v4734_v21 = vpack.c.bf16 %v1224_v13, %v1208_v12  ;;  %v1254_v25 = vld [vmem:[#allocation2 + $0x16c8] sm:$0xff] }
 0x25d   : > { %v1223_v22 = vld [vmem:[#allocation2 + $0x15d0] sm:$0xff]  ;;  %v1352_v1 = vld [vmem:[#allocation2 + $0x19d8] sm:$0xff] }
 0x25e   : > { %4569 = vmatpush1.bf16.msra.mxu0 %v4568_v34  ;;  %v1093_v34 = vld [vmem:[#allocation2 + $0x11c0] sm:$0xff]  ;;  %v1319_v62 = vld [vmem:[#allocation2 + $0x18d0] sm:$0xff]  ;;  %v1368_v12 = vld [vmem:[#allocation2 + $0x1a58] sm:$0xff] }
 0x25f   : > { %4697 = vmatpush1.bf16.msra.mxu1 %v4696_v35  ;;  %4571 = vmatprep.subr.bf16.mxu0 %v4570_v36  ;;  %v1079_v35 = vld [vmem:[#allocation2 + $0x1150] sm:$0xff]  ;;  %v4718_v36 = vpack.c.bf16 %v1096_v29, %v1080_v28  ;;  %v4592_v43 = vpack.c.bf16 %v1093_v34, %v1077_v33  ;;  %v4736_v29 = vpack.c.bf16 %v1223_v22, %v1207_v20  ;;  %v1384_v13 = vld [vmem:[#allocation2 + $0x1ad8] sm:$0xff] }
 0x260   : > { %4699 = vmatprep.subr.bf16.mxu1 %v4698_v40  ;;  %v5553_v40 = vld [vmem:[%s6315_s22] sm:$0xff]  ;;  %v4720_v44 = vpack.c.bf16 %v1095_v37, %v1079_v35  ;;  %v1239_v33 = vld [vmem:[#allocation2 + $0x1650] sm:$0xff]  ;;  %v4738_v35 = vpack.c.bf16 %v1256_v27, %v1240_v26  ;;  %v1270_v37 = vld [vmem:[#allocation2 + $0x1748] sm:$0xff] }
 0x261   : > { %v1335_v7 = vld [vmem:[#allocation2 + $0x1950] sm:$0xff]  ;;  %v1400_v26 = vld [vmem:[#allocation2 + $0x1b58] sm:$0xff] }
 0x262   : > { %4573 = vmatpush1.bf16.msra.mxu0 %v4572_v46  ;;  %v1109_v46 = vld [vmem:[#allocation2 + $0x1240] sm:$0xff]  ;;  %v1351_v9 = vld [vmem:[#allocation2 + $0x19d0] sm:$0xff]  ;;  %v1416_v27 = vld [vmem:[#allocation2 + $0x1bd8] sm:$0xff] }
 0x263   : > { %4701 = vmatpush1.bf16.msra.mxu1 %v4700_v47  ;;  %4575 = vmatprep.subr.bf16.mxu0 %v4574_v48  ;;  %v1125_v47 = vld [vmem:[#allocation2 + $0x12c0] sm:$0xff]  ;;  %v1111_v48 = vld [vmem:[#allocation2 + $0x1250] sm:$0xff] }
 0x264   : > { %4703 = vmatprep.subr.bf16.mxu1 %v4702_v52  ;;  %v1158_v52 = vld [vmem:[#allocation2 + $0x13c8] sm:$0xff]  ;;  %v4596_v56 = vpack.c.bf16 %v1125_v47, %v1109_v46  ;;  %v4724_v57 = vpack.c.bf16 %v1127_v50, %v1111_v48  ;;  %v4614_v46 = vpack.c.bf16 %v1286_v38, %v1270_v37  ;;  %v1269_v47 = vld [vmem:[#allocation2 + $0x1740] sm:$0xff]  ;;  %v4742_v50 = vpack.c.bf16 %v1288_v42, %v1272_v41  ;;  %v1367_v20 = vld [vmem:[#allocation2 + $0x1a50] sm:$0xff] }
 0x265   : > { %v1285_v48 = vld [vmem:[#allocation2 + $0x17c0] sm:$0xff]  ;;  %v1383_v22 = vld [vmem:[#allocation2 + $0x1ad0] sm:$0xff]  ;;  %v1430_v37 = vld [vmem:[#allocation2 + $0x1c48] sm:$0xff] }
 0x266   : > { %4577 = vmatpush1.bf16.msra.mxu0 %v4576_v58  ;;  %v4598_v58 = vpack.c.bf16 %v1158_v52, %v1142_v51  ;;  %v1287_v51 = vld [vmem:[#allocation2 + $0x17d0] sm:$0xff]  ;;  %v1302_v52 = vld [vmem:[#allocation2 + $0x1848] sm:$0xff]  ;;  %v1432_v41 = vld [vmem:[#allocation2 + $0x1c58] sm:$0xff] }
 0x267   : > { %4705 = vmatpush1.bf16.msra.mxu1 %v4704_v59  ;;  %4579 = vmatprep.subr.bf16.mxu0 %v4578_v60  ;;  %v1141_v59 = vld [vmem:[#allocation2 + $0x1340] sm:$0xff]  ;;  %v1446_v38 = vld [vmem:[#allocation2 + $0x1cc8] sm:$0xff]  ;;  %v1448_v42 = vld [vmem:[#allocation2 + $0x1cd8] sm:$0xff] }
 0x268   : > { %4707 = vmatprep.subr.bf16.mxu1 %v4706_v63  ;;  %v1157_v60 = vld [vmem:[#allocation2 + $0x13c0] sm:$0xff]  ;;  %v1174_v63 = vld [vmem:[#allocation2 + $0x1448] sm:$0xff] }
 0x269   : > { %v4600_v2 = vpack.c.bf16 %v1157_v60, %v1141_v59  ;;  %v1301_v59 = vld [vmem:[#allocation2 + $0x1840] sm:$0xff] }
 0x26a   : > { %4581 = vmatpush1.bf16.msra.mxu0 %v4580_v4  ;;  %v4602_v4 = vpack.c.bf16 %v1190_v24, %v1174_v63  ;;  %v1317_v60 = vld [vmem:[#allocation2 + $0x18c0] sm:$0xff]  ;;  %v1334_v63 = vld [vmem:[#allocation2 + $0x1948] sm:$0xff] }
 0x26b   : > { %4709 = vmatpush1.bf16.msra.mxu1 %v4708_v5  ;;  %4583 = vmatprep.subr.bf16.mxu0 %v4582_v6  ;;  %v1173_v5 = vld [vmem:[#allocation2 + $0x1440] sm:$0xff]  ;;  %v1350_v24 = vld [vmem:[#allocation2 + $0x19c8] sm:$0xff] }
 0x26c   : > { %4711 = vmatprep.subr.bf16.mxu1 %v4710_v10  ;;  %v1189_v6 = vld [vmem:[#allocation2 + $0x14c0] sm:$0xff]  ;;  %v1206_v10 = vld [vmem:[#allocation2 + $0x1548] sm:$0xff] }
 0x26d   : > { %v4604_v14 = vpack.c.bf16 %v1189_v6, %v1173_v5  ;;  %v1333_v5 = vld [vmem:[#allocation2 + $0x1940] sm:$0xff] }
 0x26e   : > { %4585 = vmatpush1.bf16.msra.mxu0 %v4584_v17  ;;  %v4606_v17 = vpack.c.bf16 %v1222_v11, %v1206_v10  ;;  %v1349_v6 = vld [vmem:[#allocation2 + $0x19c0] sm:$0xff]  ;;  %v1366_v10 = vld [vmem:[#allocation2 + $0x1a48] sm:$0xff] }
 0x26f   : > { %4713 = vmatpush1.bf16.msra.mxu1 %v4712_v18  ;;  %4587 = vmatprep.subr.bf16.mxu0 %v4586_v19  ;;  %v1205_v18 = vld [vmem:[#allocation2 + $0x1540] sm:$0xff]  ;;  %v1382_v11 = vld [vmem:[#allocation2 + $0x1ac8] sm:$0xff] }
 0x270   : > { %4715 = vmatprep.subr.bf16.mxu1 %v4714_v23  ;;  %v1221_v19 = vld [vmem:[#allocation2 + $0x15c0] sm:$0xff]  ;;  %v1238_v23 = vld [vmem:[#allocation2 + $0x1648] sm:$0xff] }
 0x271   : > { %2266 = vmatmul.mubr.f32.vlgmr.msra.gmra.mrb[4].mxu0 %v5553_v40  ;;  %v4608_v28 = vpack.c.bf16 %v1221_v19, %v1205_v18  ;;  %v1365_v18 = vld [vmem:[#allocation2 + $0x1a40] sm:$0xff] }
 0x272   : > { %4589 = vmatpush1.bf16.msra.mxu0 %v4588_v30  ;;  %2408 = vmatmul.mubr.f32.vlgmr.msra.gmra.mrb[4].mxu1 %v5553_v40  ;;  %v4610_v30 = vpack.c.bf16 %v1254_v25, %v1238_v23  ;;  %v1381_v19 = vld [vmem:[#allocation2 + $0x1ac0] sm:$0xff]  ;;  %v1398_v23 = vld [vmem:[#allocation2 + $0x1b48] sm:$0xff] }
 0x273   : > { %4717 = vmatpush1.bf16.msra.mxu1 %v4716_v31  ;;  %4591 = vmatprep.subr.bf16.mxu0 %v4590_v32  ;;  %v1237_v31 = vld [vmem:[#allocation2 + $0x1640] sm:$0xff]  ;;  %v1414_v25 = vld [vmem:[#allocation2 + $0x1bc8] sm:$0xff] }
 0x274   : > { %4719 = vmatprep.subr.bf16.mxu1 %v4718_v36  ;;  %2336 = vmatprep.mubr.f32.mxu0 %v5554_v53  ;;  %v1253_v32 = vld [vmem:[#allocation2 + $0x16c0] sm:$0xff]  ;;  %v1255_v36 = vld [vmem:[#allocation2 + $0x16d0] sm:$0xff] }
 0x275   : > { %2478 = vmatprep.mubr.f32.mxu1 %v5554_v53  ;;  %v1318_v53 = vld [vmem:[#allocation2 + $0x18c8] sm:$0xff] }
 0x276   : > { %4593 = vmatpush1.bf16.msra.mxu0 %v4592_v43 }
 0x277   : > { %4721 = vmatpush1.bf16.msra.mxu1 %v4720_v44  ;;  %4595 = vmatprep.subr.bf16.mxu0 %v4594_v45  ;;  %v4612_v44 = vpack.c.bf16 %v1253_v32, %v1237_v31  ;;  %v4740_v45 = vpack.c.bf16 %v1255_v36, %v1239_v33  ;;  %v1397_v31 = vld [vmem:[#allocation2 + $0x1b40] sm:$0xff]  ;;  %v1399_v33 = vld [vmem:[#allocation2 + $0x1b50] sm:$0xff] }
 0x278   : > { %4723 = vmatprep.subr.bf16.mxu1 %v4722_v49  ;;  %v1271_v49 = vld [vmem:[#allocation2 + $0x1750] sm:$0xff]  ;;  %v1413_v32 = vld [vmem:[#allocation2 + $0x1bc0] sm:$0xff] }
 0x279   : > { %v1415_v36 = vld [vmem:[#allocation2 + $0x1bd0] sm:$0xff] }
 0x27a   : > { %4597 = vmatpush1.bf16.msra.mxu0 %v4596_v56  ;;  %v4616_v56 = vpack.c.bf16 %v1285_v48, %v1269_v47  ;;  %v1429_v47 = vld [vmem:[#allocation2 + $0x1c40] sm:$0xff] }
 0x27b   : > { %4725 = vmatpush1.bf16.msra.mxu1 %v4724_v57  ;;  %4599 = vmatprep.subr.bf16.mxu0 %v4598_v58  ;;  %v4744_v57 = vpack.c.bf16 %v1287_v51, %v1271_v49  ;;  %v4618_v58 = vpack.c.bf16 %v1318_v53, %v1302_v52  ;;  %v1445_v48 = vld [vmem:[#allocation2 + $0x1cc0] sm:$0xff]  ;;  %v1431_v49 = vld [vmem:[#allocation2 + $0x1c50] sm:$0xff]  ;;  %v1462_v52 = vld [vmem:[#allocation2 + $0x1d48] sm:$0xff] }
 0x27c   : > { %4727 = vmatprep.subr.bf16.mxu1 %v4726_v61  ;;  %v4746_v61 = vpack.c.bf16 %v1320_v55, %v1304_v54  ;;  %v1447_v51 = vld [vmem:[#allocation2 + $0x1cd0] sm:$0xff]  ;;  %v1478_v53 = vld [vmem:[#allocation2 + $0x1dc8] sm:$0xff]  ;;  %v1464_v54 = vld [vmem:[#allocation2 + $0x1d58] sm:$0xff] }
 0x27d   : > { %v1480_v55 = vld [vmem:[#allocation2 + $0x1dd8] sm:$0xff] }
 0x27e   : > { %4601 = vmatpush1.bf16.msra.mxu0 %v4600_v2  ;;  %v4620_v2 = vpack.c.bf16 %v1317_v60, %v1301_v59  ;;  %v1461_v59 = vld [vmem:[#allocation2 + $0x1d40] sm:$0xff] }
 0x27f   : > { %4729 = vmatpush1.bf16.msra.mxu1 %v4728_v3  ;;  %4603 = vmatprep.subr.bf16.mxu0 %v4602_v4  ;;  %v4748_v3 = vpack.c.bf16 %v1319_v62, %v1303_v16  ;;  %v4622_v4 = vpack.c.bf16 %v1350_v24, %v1334_v63  ;;  %v1477_v60 = vld [vmem:[#allocation2 + $0x1dc0] sm:$0xff]  ;;  %v1463_v16 = vld [vmem:[#allocation2 + $0x1d50] sm:$0xff]  ;;  %v1494_v63 = vld [vmem:[#allocation2 + $0x1e48] sm:$0xff] }
 0x280   : > { %4731 = vmatprep.subr.bf16.mxu1 %v4730_v8  ;;  %v4750_v8 = vpack.c.bf16 %v1352_v1, %v1336_v0  ;;  %v1479_v62 = vld [vmem:[#allocation2 + $0x1dd0] sm:$0xff]  ;;  %v1510_v24 = vld [vmem:[#allocation2 + $0x1ec8] sm:$0xff]  ;;  %v1496_v0 = vld [vmem:[#allocation2 + $0x1e58] sm:$0xff] }
 0x281   : > { %v1512_v1 = vld [vmem:[#allocation2 + $0x1ed8] sm:$0xff] }
 0x282   : > { %4605 = vmatpush1.bf16.msra.mxu0 %v4604_v14  ;;  %v4624_v14 = vpack.c.bf16 %v1349_v6, %v1333_v5  ;;  %v1493_v5 = vld [vmem:[#allocation2 + $0x1e40] sm:$0xff] }
 0x283   : > { %4733 = vmatpush1.bf16.msra.mxu1 %v4732_v15  ;;  %4607 = vmatprep.subr.bf16.mxu0 %v4606_v17  ;;  %v4752_v15 = vpack.c.bf16 %v1351_v9, %v1335_v7  ;;  %v4626_v17 = vpack.c.bf16 %v1382_v11, %v1366_v10  ;;  %v1509_v6 = vld [vmem:[#allocation2 + $0x1ec0] sm:$0xff]  ;;  %v1495_v7 = vld [vmem:[#allocation2 + $0x1e50] sm:$0xff]  ;;  %v1526_v10 = vld [vmem:[#allocation2 + $0x1f48] sm:$0xff] }
 0x284   : > { %v6338_v34 = vpop.f32.mrb[0].mxu0  ;;  %4735 = vmatprep.subr.bf16.mxu1 %v4734_v21  ;;  %v4754_v21 = vpack.c.bf16 %v1384_v13, %v1368_v12  ;;  %v1511_v9 = vld [vmem:[#allocation2 + $0x1ed0] sm:$0xff]  ;;  %v1542_v11 = vld [vmem:[#allocation2 + $0x1fc8] sm:$0xff]  ;;  %v1528_v12 = vld [vmem:[#allocation2 + $0x1f58] sm:$0xff] }
 0x285   : > { %v6340_v39 = vpop.f32.mrb[0].mxu1  ;;  %v6342_v40 = vpop.f32.mrb[1].mxu0  ;;  %v1544_v13 = vld [vmem:[#allocation2 + $0x1fd8] sm:$0xff] }
 0x286   : > { %v6344_v43 = vpop.f32.mrb[1].mxu1  ;;  %4609 = vmatpush1.bf16.msra.mxu0 %v4608_v28  ;;  %v4628_v28 = vpack.c.bf16 %v1381_v19, %v1365_v18  ;;  %v1525_v18 = vld [vmem:[#allocation2 + $0x1f40] sm:$0xff] }
 0x287   : > { %4737 = vmatpush1.bf16.msra.mxu1 %v4736_v29  ;;  %4611 = vmatprep.subr.bf16.mxu0 %v4610_v30  ;;  %v4756_v29 = vpack.c.bf16 %v1383_v22, %v1367_v20  ;;  %v4630_v30 = vpack.c.bf16 %v1414_v25, %v1398_v23  ;;  %v1541_v19 = vld [vmem:[#allocation2 + $0x1fc0] sm:$0xff]  ;;  %v1527_v20 = vld [vmem:[#allocation2 + $0x1f50] sm:$0xff]  ;;  %v538_v23 = vld [vmem:[#allocation2 + $0x68] sm:$0xff] }
 0x288   : > { %4739 = vmatprep.subr.bf16.mxu1 %v4738_v35  ;;  %v4758_v35 = vpack.c.bf16 %v1416_v27, %v1400_v26  ;;  %v1543_v22 = vld [vmem:[#allocation2 + $0x1fd0] sm:$0xff]  ;;  %v554_v25 = vld [vmem:[#allocation2 + $0xe8] sm:$0xff]  ;;  %v540_v26 = vld [vmem:[#allocation2 + $0x78] sm:$0xff] }
 0x289   : > { %v556_v27 = vld [vmem:[#allocation2 + $0xf8] sm:$0xff] }
 0x28a   : > { %4613 = vmatpush1.bf16.msra.mxu0 %v4612_v44  ;;  %v4632_v44 = vpack.c.bf16 %v1413_v32, %v1397_v31  ;;  %v537_v31 = vld [vmem:[#allocation2 + $0x60] sm:$0xff] }
 0x28b   : > { %4741 = vmatpush1.bf16.msra.mxu1 %v4740_v45  ;;  %4615 = vmatprep.subr.bf16.mxu0 %v4614_v46  ;;  %v4760_v45 = vpack.c.bf16 %v1415_v36, %v1399_v33  ;;  %v4634_v46 = vpack.c.bf16 %v1446_v38, %v1430_v37  ;;  %v553_v32 = vld [vmem:[#allocation2 + $0xe0] sm:$0xff]  ;;  %v539_v33 = vld [vmem:[#allocation2 + $0x70] sm:$0xff]  ;;  %v570_v37 = vld [vmem:[#allocation2 + $0x168] sm:$0xff] }
 0x28c   : > { %4743 = vmatprep.subr.bf16.mxu1 %v4742_v50  ;;  %v4762_v50 = vpack.c.bf16 %v1448_v42, %v1432_v41  ;;  %v555_v36 = vld [vmem:[#allocation2 + $0xf0] sm:$0xff]  ;;  %v586_v38 = vld [vmem:[#allocation2 + $0x1e8] sm:$0xff]  ;;  %v572_v41 = vld [vmem:[#allocation2 + $0x178] sm:$0xff] }
 0x28d   : > { %v588_v42 = vld [vmem:[#allocation2 + $0x1f8] sm:$0xff] }
 0x28e   : > { %4617 = vmatpush1.bf16.msra.mxu0 %v4616_v56  ;;  %v4636_v56 = vpack.c.bf16 %v1445_v48, %v1429_v47  ;;  %v569_v47 = vld [vmem:[#allocation2 + $0x160] sm:$0xff] }
 0x28f   : > { %4745 = vmatpush1.bf16.msra.mxu1 %v4744_v57  ;;  %4619 = vmatprep.subr.bf16.mxu0 %v4618_v58  ;;  %v4764_v57 = vpack.c.bf16 %v1447_v51, %v1431_v49  ;;  %v4638_v58 = vpack.c.bf16 %v1478_v53, %v1462_v52  ;;  %v585_v48 = vld [vmem:[#allocation2 + $0x1e0] sm:$0xff]  ;;  %v571_v49 = vld [vmem:[#allocation2 + $0x170] sm:$0xff]  ;;  %v602_v52 = vld [vmem:[#allocation2 + $0x268] sm:$0xff] }
 0x290   : > { %4747 = vmatprep.subr.bf16.mxu1 %v4746_v61  ;;  %v4766_v61 = vpack.c.bf16 %v1480_v55, %v1464_v54  ;;  %v587_v51 = vld [vmem:[#allocation2 + $0x1f0] sm:$0xff]  ;;  %v618_v53 = vld [vmem:[#allocation2 + $0x2e8] sm:$0xff]  ;;  %v604_v55 = vld [vmem:[#allocation2 + $0x278] sm:$0xff] }
 0x291   : > { %v5555_v54 = vld [vmem:[%s6315_s22 + $0x10] sm:$0xff] }
 0x292   : > { %4621 = vmatpush1.bf16.msra.mxu0 %v4620_v2  ;;  %v4640_v2 = vpack.c.bf16 %v1477_v60, %v1461_v59  ;;  %v4786_v59 = vpack.c.bf16 %v618_v53, %v602_v52  ;;  %v601_v60 = vld [vmem:[#allocation2 + $0x260] sm:$0xff]  ;;  %v747_v53 = vld [vmem:[#allocation2 + $0x6f0] sm:$0xff] }
 0x293   : > { %4749 = vmatpush1.bf16.msra.mxu1 %v4748_v3  ;;  %4623 = vmatprep.subr.bf16.mxu0 %v4622_v4  ;;  %v4768_v3 = vpack.c.bf16 %v1479_v62, %v1463_v16  ;;  %v4642_v4 = vpack.c.bf16 %v1510_v24, %v1494_v63  ;;  %v617_v16 = vld [vmem:[#allocation2 + $0x2e0] sm:$0xff]  ;;  %v619_v63 = vld [vmem:[#allocation2 + $0x2f0] sm:$0xff]  ;;  %v634_v24 = vld [vmem:[#allocation2 + $0x368] sm:$0xff] }
 0x294   : > { %4751 = vmatprep.subr.bf16.mxu1 %v4750_v8  ;;  %v4770_v8 = vpack.c.bf16 %v1512_v1, %v1496_v0  ;;  %v650_v0 = vld [vmem:[#allocation2 + $0x3e8] sm:$0xff] }
 0x295   : > { %v5556_v1 = vld [vmem:[%s6315_s22 + $0x8] sm:$0xff] }
 0x296   : > { %4625 = vmatpush1.bf16.msra.mxu0 %v4624_v14  ;;  %v4644_v14 = vpack.c.bf16 %v1509_v6, %v1493_v5  ;;  %v4790_v6 = vpack.c.bf16 %v650_v0, %v634_v24  ;;  %v779_v24 = vld [vmem:[#allocation2 + $0x7f0] sm:$0xff]  ;;  %v794_v0 = vld [vmem:[#allocation2 + $0x868] sm:$0xff] }
 0x297   : > { %4753 = vmatpush1.bf16.msra.mxu1 %v4752_v15  ;;  %4627 = vmatprep.subr.bf16.mxu0 %v4626_v17  ;;  %v4772_v15 = vpack.c.bf16 %v1511_v9, %v1495_v7  ;;  %v4646_v17 = vpack.c.bf16 %v1542_v11, %v1526_v10  ;;  %v633_v7 = vld [vmem:[#allocation2 + $0x360] sm:$0xff]  ;;  %v635_v9 = vld [vmem:[#allocation2 + $0x370] sm:$0xff] }
 0x298   : > { %4755 = vmatprep.subr.bf16.mxu1 %v4754_v21  ;;  %v4774_v21 = vpack.c.bf16 %v1544_v13, %v1528_v12  ;;  %v651_v11 = vld [vmem:[#allocation2 + $0x3f0] sm:$0xff]  ;;  %v666_v12 = vld [vmem:[#allocation2 + $0x468] sm:$0xff] }
 0x299   : > { %v682_v13 = vld [vmem:[#allocation2 + $0x4e8] sm:$0xff] }
 0x29a   : > { %4629 = vmatpush1.bf16.msra.mxu0 %v4628_v28  ;;  %v4648_v28 = vpack.c.bf16 %v1541_v19, %v1525_v18  ;;  %v4920_v18 = vpack.c.bf16 %v651_v11, %v635_v9  ;;  %v4794_v19 = vpack.c.bf16 %v682_v13, %v666_v12  ;;  %v795_v9 = vld [vmem:[#allocation2 + $0x870] sm:$0xff]  ;;  %v826_v12 = vld [vmem:[#allocation2 + $0x968] sm:$0xff] }
 0x29b   : > { %4757 = vmatpush1.bf16.msra.mxu1 %v4756_v29  ;;  %4631 = vmatprep.subr.bf16.mxu0 %v4630_v30  ;;  %v4776_v29 = vpack.c.bf16 %v1543_v22, %v1527_v20  ;;  %v4778_v30 = vpack.c.bf16 %v554_v25, %v538_v23  ;;  %v665_v20 = vld [vmem:[#allocation2 + $0x460] sm:$0xff]  ;;  %v667_v22 = vld [vmem:[#allocation2 + $0x470] sm:$0xff]  ;;  %v842_v13 = vld [vmem:[#allocation2 + $0x9e8] sm:$0xff] }
 0x29c   : > { %4759 = vmatprep.subr.bf16.mxu1 %v4758_v35  ;;  %v4906_v35 = vpack.c.bf16 %v556_v27, %v540_v26  ;;  %v683_v25 = vld [vmem:[#allocation2 + $0x4f0] sm:$0xff]  ;;  %v698_v26 = vld [vmem:[#allocation2 + $0x568] sm:$0xff] }
 0x29d   : > { %v714_v27 = vld [vmem:[#allocation2 + $0x5e8] sm:$0xff]  ;;  %v811_v11 = vld [vmem:[#allocation2 + $0x8f0] sm:$0xff] }
 0x29e   : > { %4633 = vmatpush1.bf16.msra.mxu0 %v4632_v44  ;;  %v4780_v44 = vpack.c.bf16 %v553_v32, %v537_v31  ;;  %v4924_v31 = vpack.c.bf16 %v683_v25, %v667_v22  ;;  %v4798_v32 = vpack.c.bf16 %v714_v27, %v698_v26  ;;  %v827_v22 = vld [vmem:[#allocation2 + $0x970] sm:$0xff]  ;;  %v858_v26 = vld [vmem:[#allocation2 + $0xa68] sm:$0xff] }
 0x29f   : > { %4761 = vmatpush1.bf16.msra.mxu1 %v4760_v45  ;;  %4635 = vmatprep.subr.bf16.mxu0 %v4634_v46  ;;  %v4908_v45 = vpack.c.bf16 %v555_v36, %v539_v33  ;;  %v4782_v46 = vpack.c.bf16 %v586_v38, %v570_v37  ;;  %v697_v33 = vld [vmem:[#allocation2 + $0x560] sm:$0xff]  ;;  %v699_v36 = vld [vmem:[#allocation2 + $0x570] sm:$0xff]  ;;  %v874_v27 = vld [vmem:[#allocation2 + $0xae8] sm:$0xff] }
 0x2a0   : > { %4763 = vmatprep.subr.bf16.mxu1 %v4762_v50  ;;  %v4910_v50 = vpack.c.bf16 %v588_v42, %v572_v41  ;;  %v715_v38 = vld [vmem:[#allocation2 + $0x5f0] sm:$0xff]  ;;  %v730_v41 = vld [vmem:[#allocation2 + $0x668] sm:$0xff] }
 0x2a1   : > { %v746_v42 = vld [vmem:[#allocation2 + $0x6e8] sm:$0xff]  ;;  %v843_v25 = vld [vmem:[#allocation2 + $0x9f0] sm:$0xff] }
 0x2a2   : > { %4637 = vmatpush1.bf16.msra.mxu0 %v4636_v56  ;;  %v620_v56 = vld [vmem:[#allocation2 + $0x2f8] sm:$0xff] }
 0x2a3   : > { %4765 = vmatpush1.bf16.msra.mxu1 %v4764_v57  ;;  %4639 = vmatprep.subr.bf16.mxu0 %v4638_v58  ;;  %v4784_v57 = vpack.c.bf16 %v585_v48, %v569_v47  ;;  %v4912_v58 = vpack.c.bf16 %v587_v51, %v571_v49  ;;  %v4914_v62 = vpack.c.bf16 %v620_v56, %v604_v55  ;;  %v729_v49 = vld [vmem:[#allocation2 + $0x660] sm:$0xff]  ;;  %v731_v51 = vld [vmem:[#allocation2 + $0x670] sm:$0xff]  ;;  %v778_v55 = vld [vmem:[#allocation2 + $0x7e8] sm:$0xff] }
 0x2a4   : > { %4767 = vmatprep.subr.bf16.mxu1 %v4766_v61  ;;  %v603_v61 = vld [vmem:[#allocation2 + $0x270] sm:$0xff]  ;;  %v4928_v47 = vpack.c.bf16 %v715_v38, %v699_v36  ;;  %v4802_v48 = vpack.c.bf16 %v746_v42, %v730_v41  ;;  %v764_v56 = vld [vmem:[#allocation2 + $0x778] sm:$0xff]  ;;  %v890_v41 = vld [vmem:[#allocation2 + $0xb68] sm:$0xff] }
 0x2a5   : > { %v4916_v5 = vpack.c.bf16 %v619_v63, %v603_v61  ;;  %v777_v61 = vld [vmem:[#allocation2 + $0x7e0] sm:$0xff]  ;;  %v859_v36 = vld [vmem:[#allocation2 + $0xa70] sm:$0xff]  ;;  %v906_v42 = vld [vmem:[#allocation2 + $0xbe8] sm:$0xff] }
 0x2a6   : > { %4641 = vmatpush1.bf16.msra.mxu0 %v4640_v2  ;;  %v636_v2 = vld [vmem:[#allocation2 + $0x378] sm:$0xff]  ;;  %v875_v38 = vld [vmem:[#allocation2 + $0xaf0] sm:$0xff] }
 0x2a7   : > { %4769 = vmatpush1.bf16.msra.mxu1 %v4768_v3  ;;  %4643 = vmatprep.subr.bf16.mxu0 %v4642_v4  ;;  %v652_v3 = vld [vmem:[#allocation2 + $0x3f8] sm:$0xff]  ;;  %v4788_v4 = vpack.c.bf16 %v617_v16, %v601_v60  ;;  %v761_v16 = vld [vmem:[#allocation2 + $0x760] sm:$0xff] }
 0x2a8   : > { %4771 = vmatprep.subr.bf16.mxu1 %v4770_v8  ;;  %v649_v8 = vld [vmem:[#allocation2 + $0x3e0] sm:$0xff]  ;;  %v4918_v10 = vpack.c.bf16 %v652_v3, %v636_v2  ;;  %v796_v2 = vld [vmem:[#allocation2 + $0x878] sm:$0xff] }
 0x2a9   : > { %v812_v3 = vld [vmem:[#allocation2 + $0x8f8] sm:$0xff] }
 0x2aa   : > { %4645 = vmatpush1.bf16.msra.mxu0 %v4644_v14  ;;  %v668_v14 = vld [vmem:[#allocation2 + $0x478] sm:$0xff] }
 0x2ab   : > { %4773 = vmatpush1.bf16.msra.mxu1 %v4772_v15  ;;  %4647 = vmatprep.subr.bf16.mxu0 %v4646_v17  ;;  %v684_v15 = vld [vmem:[#allocation2 + $0x4f8] sm:$0xff]  ;;  %v4792_v17 = vpack.c.bf16 %v649_v8, %v633_v7  ;;  %v793_v7 = vld [vmem:[#allocation2 + $0x860] sm:$0xff] }
 0x2ac   : > { %4775 = vmatprep.subr.bf16.mxu1 %v4774_v21  ;;  %v681_v21 = vld [vmem:[#allocation2 + $0x4e0] sm:$0xff]  ;;  %v4922_v23 = vpack.c.bf16 %v684_v15, %v668_v14  ;;  %v828_v14 = vld [vmem:[#allocation2 + $0x978] sm:$0xff] }
 0x2ad   : > { %v809_v8 = vld [vmem:[#allocation2 + $0x8e0] sm:$0xff]  ;;  %v844_v15 = vld [vmem:[#allocation2 + $0x9f8] sm:$0xff] }
 0x2ae   : > { %4649 = vmatpush1.bf16.msra.mxu0 %v4648_v28  ;;  %v700_v28 = vld [vmem:[#allocation2 + $0x578] sm:$0xff] }
 0x2af   : > { %4777 = vmatpush1.bf16.msra.mxu1 %v4776_v29  ;;  %4779 = vmatprep.subr.bf16.mxu0 %v4778_v30  ;;  %v716_v29 = vld [vmem:[#allocation2 + $0x5f8] sm:$0xff]  ;;  %v4796_v30 = vpack.c.bf16 %v681_v21, %v665_v20  ;;  %v825_v20 = vld [vmem:[#allocation2 + $0x960] sm:$0xff] }
 0x2b0   : > { %4907 = vmatprep.subr.bf16.mxu1 %v4906_v35  ;;  %v713_v35 = vld [vmem:[#allocation2 + $0x5e0] sm:$0xff]  ;;  %v4926_v37 = vpack.c.bf16 %v716_v29, %v700_v28  ;;  %v860_v28 = vld [vmem:[#allocation2 + $0xa78] sm:$0xff] }
 0x2b1   : > { %2337 = vmatmul.mubr.f32.vlgmr.msra.gmra.mrb[4].mxu0 %v5555_v54  ;;  %v841_v21 = vld [vmem:[#allocation2 + $0x9e0] sm:$0xff]  ;;  %v876_v29 = vld [vmem:[#allocation2 + $0xaf8] sm:$0xff] }
 0x2b2   : > { %2479 = vmatmul.mubr.f32.vlgmr.msra.gmra.mrb[4].mxu1 %v5555_v54  ;;  %4781 = vmatpush1.bf16.msra.mxu0 %v4780_v44  ;;  %v732_v44 = vld [vmem:[#allocation2 + $0x678] sm:$0xff]  ;;  %v762_v54 = vld [vmem:[#allocation2 + $0x768] sm:$0xff] }
 0x2b3   : > { %4909 = vmatpush1.bf16.msra.mxu1 %v4908_v45  ;;  %4783 = vmatprep.subr.bf16.mxu0 %v4782_v46  ;;  %v748_v45 = vld [vmem:[#allocation2 + $0x6f8] sm:$0xff]  ;;  %v4800_v46 = vpack.c.bf16 %v713_v35, %v697_v33  ;;  %v4806_v60 = vpack.c.bf16 %v778_v55, %v762_v54  ;;  %v857_v33 = vld [vmem:[#allocation2 + $0xa60] sm:$0xff]  ;;  %v922_v54 = vld [vmem:[#allocation2 + $0xc68] sm:$0xff] }
 0x2b4   : > { %4911 = vmatprep.subr.bf16.mxu1 %v4910_v50  ;;  %2549 = vmatprep.mubr.f32.mxu0 %v5556_v1  ;;  %v745_v50 = vld [vmem:[#allocation2 + $0x6e0] sm:$0xff]  ;;  %v4930_v52 = vpack.c.bf16 %v748_v45, %v732_v44  ;;  %v892_v44 = vld [vmem:[#allocation2 + $0xb78] sm:$0xff]  ;;  %v938_v55 = vld [vmem:[#allocation2 + $0xce8] sm:$0xff] }
 0x2b5   : > { %2691 = vmatprep.mubr.f32.mxu1 %v5556_v1  ;;  %v810_v1 = vld [vmem:[#allocation2 + $0x8e8] sm:$0xff]  ;;  %v873_v35 = vld [vmem:[#allocation2 + $0xae0] sm:$0xff]  ;;  %v908_v45 = vld [vmem:[#allocation2 + $0xbf8] sm:$0xff] }
 0x2b6   : > { %4785 = vmatpush1.bf16.msra.mxu0 %v4784_v57  ;;  %v780_v57 = vld [vmem:[#allocation2 + $0x7f8] sm:$0xff] }
 0x2b7   : > { %4913 = vmatpush1.bf16.msra.mxu1 %v4912_v58  ;;  %4787 = vmatprep.subr.bf16.mxu0 %v4786_v59  ;;  %v4804_v58 = vpack.c.bf16 %v745_v50, %v729_v49  ;;  %v4932_v59 = vpack.c.bf16 %v747_v53, %v731_v51  ;;  %v4934_v63 = vpack.c.bf16 %v780_v57, %v764_v56  ;;  %v889_v49 = vld [vmem:[#allocation2 + $0xb60] sm:$0xff]  ;;  %v891_v51 = vld [vmem:[#allocation2 + $0xb70] sm:$0xff]  ;;  %v924_v56 = vld [vmem:[#allocation2 + $0xc78] sm:$0xff] }
 0x2b8   : > { %4915 = vmatprep.subr.bf16.mxu1 %v4914_v62  ;;  %v763_v62 = vld [vmem:[#allocation2 + $0x770] sm:$0xff]  ;;  %v905_v50 = vld [vmem:[#allocation2 + $0xbe0] sm:$0xff]  ;;  %v940_v57 = vld [vmem:[#allocation2 + $0xcf8] sm:$0xff] }
 0x2b9   : > { %v907_v53 = vld [vmem:[#allocation2 + $0xbf0] sm:$0xff] }
 0x2ba   : > { %4789 = vmatpush1.bf16.msra.mxu0 %v4788_v4  ;;  %v4808_v4 = vpack.c.bf16 %v777_v61, %v761_v16  ;;  %v921_v16 = vld [vmem:[#allocation2 + $0xc60] sm:$0xff] }
 0x2bb   : > { %4917 = vmatpush1.bf16.msra.mxu1 %v4916_v5  ;;  %4791 = vmatprep.subr.bf16.mxu0 %v4790_v6  ;;  %v4936_v5 = vpack.c.bf16 %v779_v24, %v763_v62  ;;  %v4810_v6 = vpack.c.bf16 %v810_v1, %v794_v0  ;;  %v937_v61 = vld [vmem:[#allocation2 + $0xce0] sm:$0xff]  ;;  %v923_v62 = vld [vmem:[#allocation2 + $0xc70] sm:$0xff]  ;;  %v954_v0 = vld [vmem:[#allocation2 + $0xd68] sm:$0xff] }
 0x2bc   : > { %4919 = vmatprep.subr.bf16.mxu1 %v4918_v10  ;;  %v4938_v10 = vpack.c.bf16 %v812_v3, %v796_v2  ;;  %v939_v24 = vld [vmem:[#allocation2 + $0xcf0] sm:$0xff]  ;;  %v970_v1 = vld [vmem:[#allocation2 + $0xde8] sm:$0xff]  ;;  %v956_v2 = vld [vmem:[#allocation2 + $0xd78] sm:$0xff] }
 0x2bd   : > { %v972_v3 = vld [vmem:[#allocation2 + $0xdf8] sm:$0xff] }
 0x2be   : > { %4793 = vmatpush1.bf16.msra.mxu0 %v4792_v17  ;;  %v4812_v17 = vpack.c.bf16 %v809_v8, %v793_v7  ;;  %v953_v7 = vld [vmem:[#allocation2 + $0xd60] sm:$0xff] }
 0x2bf   : > { %4921 = vmatpush1.bf16.msra.mxu1 %v4920_v18  ;;  %4795 = vmatprep.subr.bf16.mxu0 %v4794_v19  ;;  %v4940_v18 = vpack.c.bf16 %v811_v11, %v795_v9  ;;  %v4814_v19 = vpack.c.bf16 %v842_v13, %v826_v12  ;;  %v969_v8 = vld [vmem:[#allocation2 + $0xde0] sm:$0xff]  ;;  %v955_v9 = vld [vmem:[#allocation2 + $0xd70] sm:$0xff]  ;;  %v986_v12 = vld [vmem:[#allocation2 + $0xe68] sm:$0xff] }
 0x2c0   : > { %4923 = vmatprep.subr.bf16.mxu1 %v4922_v23  ;;  %v4942_v23 = vpack.c.bf16 %v844_v15, %v828_v14  ;;  %v971_v11 = vld [vmem:[#allocation2 + $0xdf0] sm:$0xff]  ;;  %v1002_v13 = vld [vmem:[#allocation2 + $0xee8] sm:$0xff]  ;;  %v988_v14 = vld [vmem:[#allocation2 + $0xe78] sm:$0xff] }
 0x2c1   : > { %v1004_v15 = vld [vmem:[#allocation2 + $0xef8] sm:$0xff] }
 0x2c2   : > { %4797 = vmatpush1.bf16.msra.mxu0 %v4796_v30  ;;  %v4816_v30 = vpack.c.bf16 %v841_v21, %v825_v20  ;;  %v985_v20 = vld [vmem:[#allocation2 + $0xe60] sm:$0xff] }
 0x2c3   : > { %4925 = vmatpush1.bf16.msra.mxu1 %v4924_v31  ;;  %4799 = vmatprep.subr.bf16.mxu0 %v4798_v32  ;;  %v4944_v31 = vpack.c.bf16 %v843_v25, %v827_v22  ;;  %v4818_v32 = vpack.c.bf16 %v874_v27, %v858_v26  ;;  %v1001_v21 = vld [vmem:[#allocation2 + $0xee0] sm:$0xff]  ;;  %v987_v22 = vld [vmem:[#allocation2 + $0xe70] sm:$0xff]  ;;  %v1018_v26 = vld [vmem:[#allocation2 + $0xf68] sm:$0xff] }
 0x2c4   : > { %4927 = vmatprep.subr.bf16.mxu1 %v4926_v37  ;;  %v4946_v37 = vpack.c.bf16 %v876_v29, %v860_v28  ;;  %v1003_v25 = vld [vmem:[#allocation2 + $0xef0] sm:$0xff]  ;;  %v1034_v27 = vld [vmem:[#allocation2 + $0xfe8] sm:$0xff]  ;;  %v1020_v28 = vld [vmem:[#allocation2 + $0xf78] sm:$0xff] }
 0x2c5   : > { %v1036_v29 = vld [vmem:[#allocation2 + $0xff8] sm:$0xff] }
 0x2c6   : > { %4801 = vmatpush1.bf16.msra.mxu0 %v4800_v46  ;;  %v4820_v46 = vpack.c.bf16 %v873_v35, %v857_v33  ;;  %v1017_v33 = vld [vmem:[#allocation2 + $0xf60] sm:$0xff] }
 0x2c7   : > { %4929 = vmatpush1.bf16.msra.mxu1 %v4928_v47  ;;  %4803 = vmatprep.subr.bf16.mxu0 %v4802_v48  ;;  %v4948_v47 = vpack.c.bf16 %v875_v38, %v859_v36  ;;  %v4822_v48 = vpack.c.bf16 %v906_v42, %v890_v41  ;;  %v1033_v35 = vld [vmem:[#allocation2 + $0xfe0] sm:$0xff]  ;;  %v1019_v36 = vld [vmem:[#allocation2 + $0xf70] sm:$0xff]  ;;  %v1050_v41 = vld [vmem:[#allocation2 + $0x1068] sm:$0xff] }
 0x2c8   : > { %4931 = vmatprep.subr.bf16.mxu1 %v4930_v52  ;;  %v4950_v52 = vpack.c.bf16 %v908_v45, %v892_v44  ;;  %v1035_v38 = vld [vmem:[#allocation2 + $0xff0] sm:$0xff]  ;;  %v1066_v42 = vld [vmem:[#allocation2 + $0x10e8] sm:$0xff]  ;;  %v1052_v44 = vld [vmem:[#allocation2 + $0x1078] sm:$0xff] }
 0x2c9   : > { %v1068_v45 = vld [vmem:[#allocation2 + $0x10f8] sm:$0xff] }
 0x2ca   : > { %4805 = vmatpush1.bf16.msra.mxu0 %v4804_v58  ;;  %v4824_v58 = vpack.c.bf16 %v905_v50, %v889_v49  ;;  %v1049_v49 = vld [vmem:[#allocation2 + $0x1060] sm:$0xff] }
 0x2cb   : > { %4933 = vmatpush1.bf16.msra.mxu1 %v4932_v59  ;;  %4807 = vmatprep.subr.bf16.mxu0 %v4806_v60  ;;  %v4952_v59 = vpack.c.bf16 %v907_v53, %v891_v51  ;;  %v4826_v60 = vpack.c.bf16 %v938_v55, %v922_v54  ;;  %v1065_v50 = vld [vmem:[#allocation2 + $0x10e0] sm:$0xff]  ;;  %v1051_v51 = vld [vmem:[#allocation2 + $0x1070] sm:$0xff]  ;;  %v1082_v54 = vld [vmem:[#allocation2 + $0x1168] sm:$0xff] }
 0x2cc   : > { %4935 = vmatprep.subr.bf16.mxu1 %v4934_v63  ;;  %v4954_v63 = vpack.c.bf16 %v940_v57, %v924_v56  ;;  %v1067_v53 = vld [vmem:[#allocation2 + $0x10f0] sm:$0xff]  ;;  %v1098_v55 = vld [vmem:[#allocation2 + $0x11e8] sm:$0xff]  ;;  %v1084_v56 = vld [vmem:[#allocation2 + $0x1178] sm:$0xff] }
 0x2cd   : > { %v1100_v57 = vld [vmem:[#allocation2 + $0x11f8] sm:$0xff] }
 0x2ce   : > { %4809 = vmatpush1.bf16.msra.mxu0 %v4808_v4  ;;  %v4828_v4 = vpack.c.bf16 %v937_v61, %v921_v16  ;;  %v1081_v16 = vld [vmem:[#allocation2 + $0x1160] sm:$0xff] }
 0x2cf   : > { %4937 = vmatpush1.bf16.msra.mxu1 %v4936_v5  ;;  %4811 = vmatprep.subr.bf16.mxu0 %v4810_v6  ;;  %v4956_v5 = vpack.c.bf16 %v939_v24, %v923_v62  ;;  %v4830_v6 = vpack.c.bf16 %v970_v1, %v954_v0  ;;  %v1097_v61 = vld [vmem:[#allocation2 + $0x11e0] sm:$0xff]  ;;  %v1083_v62 = vld [vmem:[#allocation2 + $0x1170] sm:$0xff]  ;;  %v1114_v0 = vld [vmem:[#allocation2 + $0x1268] sm:$0xff] }
 0x2d0   : > { %4939 = vmatprep.subr.bf16.mxu1 %v4938_v10  ;;  %v4958_v10 = vpack.c.bf16 %v972_v3, %v956_v2  ;;  %v1099_v24 = vld [vmem:[#allocation2 + $0x11f0] sm:$0xff]  ;;  %v1130_v1 = vld [vmem:[#allocation2 + $0x12e8] sm:$0xff]  ;;  %v1553_v2 = vlaneseq  ;;  %v5557_v3 = vld [vmem:[%s6315_s22] sm:$0xff] }
 0x2d2   : > { %4813 = vmatpush1.bf16.msra.mxu0 %v4812_v17  ;;  %v4832_v17 = vpack.c.bf16 %v969_v8, %v953_v7  ;;  %v4976_v7 = vpack.c.bf16 %v1099_v24, %v1083_v62  ;;  %v4850_v8 = vpack.c.bf16 %v1130_v1, %v1114_v0  ;;  %v1225_v24 = vld [vmem:[#allocation2 + $0x15e0] sm:$0xff]  ;;  %v1211_v0 = vld [vmem:[#allocation2 + $0x1570] sm:$0xff] }
 0x2d3   : > { %4941 = vmatpush1.bf16.msra.mxu1 %v4940_v18  ;;  %4815 = vmatprep.subr.bf16.mxu0 %v4814_v19  ;;  %v4960_v18 = vpack.c.bf16 %v971_v11, %v955_v9  ;;  %v4834_v19 = vpack.c.bf16 %v1002_v13, %v986_v12  ;;  %v1113_v9 = vld [vmem:[#allocation2 + $0x1260] sm:$0xff]  ;;  %v1115_v11 = vld [vmem:[#allocation2 + $0x1270] sm:$0xff] }
 0x2d4   : > { %4943 = vmatprep.subr.bf16.mxu1 %v4942_v23  ;;  %v4962_v23 = vpack.c.bf16 %v1004_v15, %v988_v14  ;;  %v1131_v13 = vld [vmem:[#allocation2 + $0x12f0] sm:$0xff]  ;;  %v1146_v14 = vld [vmem:[#allocation2 + $0x1368] sm:$0xff] }
 0x2d5   : > { %v1162_v15 = vld [vmem:[#allocation2 + $0x13e8] sm:$0xff] }
 0x2d6   : > { %4817 = vmatpush1.bf16.msra.mxu0 %v4816_v30  ;;  %v4836_v30 = vpack.c.bf16 %v1001_v21, %v985_v20  ;;  %v1164_v20 = vld [vmem:[#allocation2 + $0x13f8] sm:$0xff] }
 0x2d7   : > { %4945 = vmatpush1.bf16.msra.mxu1 %v4944_v31  ;;  %4819 = vmatprep.subr.bf16.mxu0 %v4818_v32  ;;  %v4964_v31 = vpack.c.bf16 %v1003_v25, %v987_v22  ;;  %v4838_v32 = vpack.c.bf16 %v1034_v27, %v1018_v26  ;;  %v4980_v22 = vpack.c.bf16 %v1131_v13, %v1115_v11  ;;  %v1145_v25 = vld [vmem:[#allocation2 + $0x1360] sm:$0xff]  ;;  %v1147_v27 = vld [vmem:[#allocation2 + $0x1370] sm:$0xff] }
 0x2d8   : > { %4947 = vmatprep.subr.bf16.mxu1 %v4946_v37  ;;  %v4966_v37 = vpack.c.bf16 %v1036_v29, %v1020_v28  ;;  %v1161_v26 = vld [vmem:[#allocation2 + $0x13e0] sm:$0xff]  ;;  %v1163_v29 = vld [vmem:[#allocation2 + $0x13f0] sm:$0xff] }
 0x2da   : > { %4821 = vmatpush1.bf16.msra.mxu0 %v4820_v46  ;;  %v4840_v46 = vpack.c.bf16 %v1033_v35, %v1017_v33  ;;  %v1180_v33 = vld [vmem:[#allocation2 + $0x1478] sm:$0xff] }
 0x2db   : > { %4949 = vmatpush1.bf16.msra.mxu1 %v4948_v47  ;;  %4823 = vmatprep.subr.bf16.mxu0 %v4822_v48  ;;  %v4968_v47 = vpack.c.bf16 %v1035_v38, %v1019_v36  ;;  %v4842_v48 = vpack.c.bf16 %v1066_v42, %v1050_v41  ;;  %v1196_v35 = vld [vmem:[#allocation2 + $0x14f8] sm:$0xff]  ;;  %v6355_v36 = vld [vmem:[#allocation5] sm:$0xff]  ;;  %v4856_v38 = vpack.c.bf16 %v1161_v26, %v1145_v25  ;;  %v1259_v25 = vld [vmem:[#allocation2 + $0x16f0] sm:$0xff] }
 0x2dc   : > { %4951 = vmatprep.subr.bf16.mxu1 %v4950_v52  ;;  %v4970_v52 = vpack.c.bf16 %v1068_v45, %v1052_v44  ;;  %v4984_v41 = vpack.c.bf16 %v1163_v29, %v1147_v27  ;;  %v1177_v44 = vld [vmem:[#allocation2 + $0x1460] sm:$0xff]  ;;  %v1274_v26 = vld [vmem:[#allocation2 + $0x1768] sm:$0xff] }
 0x2dd   : > { %v1193_v45 = vld [vmem:[#allocation2 + $0x14e0] sm:$0xff]  ;;  %v1290_v27 = vld [vmem:[#allocation2 + $0x17e8] sm:$0xff] }
 0x2de   : > { %4825 = vmatpush1.bf16.msra.mxu0 %v4824_v58  ;;  %v4844_v58 = vpack.c.bf16 %v1065_v50, %v1049_v49  ;;  %v1195_v49 = vld [vmem:[#allocation2 + $0x14f0] sm:$0xff]  ;;  %v1210_v50 = vld [vmem:[#allocation2 + $0x1568] sm:$0xff] }
 0x2df   : > { %4953 = vmatpush1.bf16.msra.mxu1 %v4952_v59  ;;  %4827 = vmatprep.subr.bf16.mxu0 %v4826_v60  ;;  %v4972_v59 = vpack.c.bf16 %v1067_v53, %v1051_v51  ;;  %v4846_v60 = vpack.c.bf16 %v1098_v55, %v1082_v54  ;;  %v1226_v51 = vld [vmem:[#allocation2 + $0x15e8] sm:$0xff]  ;;  %v1212_v55 = vld [vmem:[#allocation2 + $0x1578] sm:$0xff] }
 0x2e0   : > { %4955 = vmatprep.subr.bf16.mxu1 %v4954_v63  ;;  %v4974_v63 = vpack.c.bf16 %v1100_v57, %v1084_v56  ;;  %v1228_v56 = vld [vmem:[#allocation2 + $0x15f8] sm:$0xff]  ;;  %v4862_v62 = vpack.c.bf16 %v1226_v51, %v1210_v50  ;;  %v1273_v50 = vld [vmem:[#allocation2 + $0x1760] sm:$0xff] }
 0x2e1   : > { %v1289_v51 = vld [vmem:[#allocation2 + $0x17e0] sm:$0xff] }
 0x2e2   : > { %4829 = vmatpush1.bf16.msra.mxu0 %v4828_v4  ;;  %v1116_v4 = vld [vmem:[#allocation2 + $0x1278] sm:$0xff] }
 0x2e3   : > { %4957 = vmatpush1.bf16.msra.mxu1 %v4956_v5  ;;  %4831 = vmatprep.subr.bf16.mxu0 %v4830_v6  ;;  %v1132_v5 = vld [vmem:[#allocation2 + $0x12f8] sm:$0xff]  ;;  %v4848_v6 = vpack.c.bf16 %v1097_v61, %v1081_v16 }
 0x2e4   : > { %4959 = vmatprep.subr.bf16.mxu1 %v4958_v10  ;;  %v1129_v10 = vld [vmem:[#allocation2 + $0x12e0] sm:$0xff]  ;;  %v4978_v12 = vpack.c.bf16 %v1132_v5, %v1116_v4  ;;  %v1242_v4 = vld [vmem:[#allocation2 + $0x1668] sm:$0xff] }
 0x2e5   : > { %v4852_v21 = vpack.c.bf16 %v1129_v10, %v1113_v9  ;;  %v1258_v5 = vld [vmem:[#allocation2 + $0x16e8] sm:$0xff]  ;;  %v1244_v9 = vld [vmem:[#allocation2 + $0x1678] sm:$0xff] }
 0x2e6   : > { %4833 = vmatpush1.bf16.msra.mxu0 %v4832_v17  ;;  %v5558_v17 = vld [vmem:[%s6315_s22 + $0x18] sm:$0xff] }
 0x2e7   : > { %4961 = vmatpush1.bf16.msra.mxu1 %v4960_v18  ;;  %4835 = vmatprep.subr.bf16.mxu0 %v4834_v19  ;;  %v6350_v18 = vshrl.u32 %v1553_v2, 7  ;;  %v1148_v19 = vld [vmem:[#allocation2 + $0x1378] sm:$0xff]  ;;  %v4990_v2 = vpack.c.bf16 %v1228_v56, %v1212_v55 }
 0x2e8   : > { %4963 = vmatprep.subr.bf16.mxu1 %v4962_v23  ;;  %v4854_v23 = vpack.c.bf16 %v1162_v15, %v1146_v14  ;;  %v4982_v28 = vpack.c.bf16 %v1164_v20, %v1148_v19  ;;  %v1260_v10 = vld [vmem:[#allocation2 + $0x16f8] sm:$0xff]  ;;  %v1241_v19 = vld [vmem:[#allocation2 + $0x1660] sm:$0xff]  ;;  %v1243_v20 = vld [vmem:[#allocation2 + $0x1670] sm:$0xff] }
 0x2e9   : > { %v6366_v53 = vsub.s32 3, %v6350_v18  ;;  %v1571_v54 = vsub.s32 4, %v6350_v18  ;;  %v1583_v61 = vsub.s32 7, %v6350_v18 }
 0x2ea   : > { %4837 = vmatpush1.bf16.msra.mxu0 %v4836_v30  ;;  %v1178_v30 = vld [vmem:[#allocation2 + $0x1468] sm:$0xff] }
 0x2eb   : > { %4965 = vmatpush1.bf16.msra.mxu1 %v4964_v31  ;;  %4839 = vmatprep.subr.bf16.mxu0 %v4838_v32  ;;  %v1194_v31 = vld [vmem:[#allocation2 + $0x14e8] sm:$0xff]  ;;  %v6353_v32 = vsub.s32 0, %v6350_v18  ;;  %v1584_v14 = vrot.slane %v6355_v36, %v1583_v61 }
 0x2ec   : > { %4967 = vmatprep.subr.bf16.mxu1 %v4966_v37  ;;  %v6358_v37 = vsub.s32 2, %v6350_v18  ;;  %v4858_v42 = vpack.c.bf16 %v1194_v31, %v1178_v30 }
 0x2ee   : > { %4841 = vmatpush1.bf16.msra.mxu0 %v4840_v46  ;;  %v1179_v46 = vld [vmem:[#allocation2 + $0x1470] sm:$0xff]  ;;  %v1564_v57 = vrot.slane %v6355_v36, %v6358_v37 }
 0x2ef   : > { %4969 = vmatpush1.bf16.msra.mxu1 %v4968_v47  ;;  %4843 = vmatprep.subr.bf16.mxu0 %v4842_v48  ;;  %v6361_v47 = vsub.s32 1, %v6350_v18  ;;  %v4986_v48 = vpack.c.bf16 %v1196_v35, %v1180_v33  ;;  %v4988_v16 = vpack.c.bf16 %v1195_v49, %v1179_v46  ;;  %v1276_v35 = vld [vmem:[#allocation2 + $0x1778] sm:$0xff]  ;;  %v4870_v49 = vpack.c.bf16 %v1290_v27, %v1274_v26  ;;  %v1355_v26 = vld [vmem:[#allocation2 + $0x19f0] sm:$0xff]  ;;  %v1370_v27 = vld [vmem:[#allocation2 + $0x1a68] sm:$0xff] }
 0x2f0   : > { %4971 = vmatprep.subr.bf16.mxu1 %v4970_v52  ;;  %v1556_v52 = vrot.slane %v6355_v36, %v6353_v32  ;;  %v5364_v11 = vadd.f32 %v6340_v39, %v1564_v57  ;;  %v1257_v39 = vld [vmem:[#allocation2 + $0x16e0] sm:$0xff] }
 0x2f1   : > { %2550 = vmatmul.mubr.f32.vlgmr.msra.gmra.mrb[6].mxu0 %v5557_v3  ;;  %v1560_v1 = vrot.slane %v6355_v36, %v6361_v47 }
 0x2f2   : > { %4845 = vmatpush1.bf16.msra.mxu0 %v4844_v58  ;;  %2692 = vmatmul.mubr.f32.vlgmr.msra.gmra.mrb[6].mxu1 %v5557_v3  ;;  %v4860_v58 = vpack.c.bf16 %v1193_v45, %v1177_v44  ;;  %v1227_v3 = vld [vmem:[#allocation2 + $0x15f0] sm:$0xff] }
 0x2f3   : > { %4973 = vmatpush1.bf16.msra.mxu1 %v4972_v59  ;;  %4847 = vmatprep.subr.bf16.mxu0 %v4846_v60  ;;  %v1579_v59 = vsub.s32 6, %v6350_v18  ;;  %v1575_v60 = vsub.s32 5, %v6350_v18  ;;  %v4992_v15 = vpack.c.bf16 %v1227_v3, %v1211_v0 }
 0x2f4   : > { %4975 = vmatprep.subr.bf16.mxu1 %v4974_v63  ;;  %2620 = vmatprep.mubr.f32.mxu0 %v5558_v17  ;;  %v1209_v63 = vld [vmem:[#allocation2 + $0x1560] sm:$0xff] }
 0x2f5   : > { %2762 = vmatprep.mubr.f32.mxu1 %v5558_v17  ;;  %v4864_v13 = vpack.c.bf16 %v1225_v24, %v1209_v63  ;;  %v4866_v17 = vpack.c.bf16 %v1258_v5, %v1242_v4  ;;  %v4872_v5 = vpack.c.bf16 %v1289_v51, %v1273_v50 }
 0x2f6   : > { %4849 = vmatpush1.bf16.msra.mxu0 %v4848_v6  ;;  %v5362_v6 = vadd.f32 %v6338_v34, %v1556_v52  ;;  %v1576_v34 = vrot.slane %v6355_v36, %v1575_v60 }
 0x2f7   : > { %4977 = vmatpush1.bf16.msra.mxu1 %v4976_v7  ;;  %4851 = vmatprep.subr.bf16.mxu0 %v4850_v8  ;;  %v1568_v7 = vrot.slane %v6355_v36, %v6366_v53  ;;  %v1572_v8 = vrot.slane %v6355_v36, %v1571_v54 }
 0x2f8   : > { %4979 = vmatprep.subr.bf16.mxu1 %v4978_v12  ;;  %v1580_v12 = vrot.slane %v6355_v36, %v1579_v59  ;;  %v1292_v36 = vld [vmem:[#allocation2 + $0x17f8] sm:$0xff] }
 0x2f9   : > { %v5365_v29 = vadd.f32 %v6344_v43, %v1568_v7  ;;  %v1275_v43 = vld [vmem:[#allocation2 + $0x1770] sm:$0xff]  ;;  %v4998_v57 = vpack.c.bf16 %v1292_v36, %v1276_v35  ;;  %v1369_v36 = vld [vmem:[#allocation2 + $0x1a60] sm:$0xff] }
 0x2fa   : > { %4853 = vmatpush1.bf16.msra.mxu0 %v4852_v21  ;;  %v5363_v21 = vadd.f32 %v6342_v40, %v1560_v1  ;;  %v4868_v40 = vpack.c.bf16 %v1257_v39, %v1241_v19  ;;  %v1308_v1 = vld [vmem:[#allocation2 + $0x1878] sm:$0xff] }
 0x2fb   : > { %4981 = vmatpush1.bf16.msra.mxu1 %v4980_v22  ;;  %4855 = vmatprep.subr.bf16.mxu0 %v4854_v23  ;;  %v4994_v23 = vpack.c.bf16 %v1260_v10, %v1244_v9  ;;  %v2772_v63 = vmax.f32 %v5365_v29, 0.0  ;;  %v1305_v9 = vld [vmem:[#allocation2 + $0x1860] sm:$0xff]  ;;  %v1372_v29 = vld [vmem:[#allocation2 + $0x1a78] sm:$0xff] }
 0x2fc   : > { %4983 = vmatprep.subr.bf16.mxu1 %v4982_v28  ;;  %v2769_v28 = vmax.f32 %v5362_v6, 0.0  ;;  %v2770_v52 = vmax.f32 %v5363_v21, 0.0  ;;  %v1321_v10 = vld [vmem:[#allocation2 + $0x18e0] sm:$0xff] }
 0x2fd   : > { %v4876_v19 = vpack.c.bf16 %v1321_v10, %v1305_v9  ;;  %v1337_v21 = vld [vmem:[#allocation2 + $0x1960] sm:$0xff]  ;;  %v1451_v10 = vld [vmem:[#allocation2 + $0x1cf0] sm:$0xff] }
 0x2fe   : > { %4857 = vmatpush1.bf16.msra.mxu0 %v4856_v38  ;;  %v2771_v38 = vmax.f32 %v5364_v11, 0.0  ;;  %v1307_v11 = vld [vmem:[#allocation2 + $0x1870] sm:$0xff] }
 0x2ff   : > { %4985 = vmatpush1.bf16.msra.mxu1 %v4984_v41  ;;  %4859 = vmatprep.subr.bf16.mxu0 %v4858_v42 }
 0x300   : > { %4987 = vmatprep.subr.bf16.mxu1 %v4986_v48  ;;  %v4996_v48 = vpack.c.bf16 %v1259_v25, %v1243_v20 }
 0x302   : > { %4861 = vmatpush1.bf16.msra.mxu0 %v4860_v58  ;;  %v1291_v58 = vld [vmem:[#allocation2 + $0x17f0] sm:$0xff] }
 0x303   : > { %4989 = vmatpush1.bf16.msra.mxu1 %v4988_v16  ;;  %4863 = vmatprep.subr.bf16.mxu0 %v4862_v62  ;;  %v1306_v16 = vld [vmem:[#allocation2 + $0x1868] sm:$0xff]  ;;  %v5000_v7 = vpack.c.bf16 %v1291_v58, %v1275_v43  ;;  %v1401_v43 = vld [vmem:[#allocation2 + $0x1b60] sm:$0xff] }
 0x304   : > { %v2054_v22 = vpop.f32.mrb[2].mxu0  ;;  %4991 = vmatprep.subr.bf16.mxu1 %v4990_v2  ;;  %v1322_v62 = vld [vmem:[#allocation2 + $0x18e8] sm:$0xff]  ;;  %v1324_v2 = vld [vmem:[#allocation2 + $0x18f8] sm:$0xff] }
 0x305   : > { %v5366_v30 = vadd.f32 %v2054_v22, %v1572_v8  ;;  %v2196_v31 = vpop.f32.mrb[2].mxu1  ;;  %v2056_v33 = vpop.f32.mrb[3].mxu0  ;;  %v4874_v8 = vpack.c.bf16 %v1322_v62, %v1306_v16  ;;  %v1353_v22 = vld [vmem:[#allocation2 + $0x19e0] sm:$0xff]  ;;  %v1434_v58 = vld [vmem:[#allocation2 + $0x1c68] sm:$0xff]  ;;  %v1436_v62 = vld [vmem:[#allocation2 + $0x1c78] sm:$0xff] }
 0x306   : > { %v5368_v41 = vadd.f32 %v2196_v31, %v1580_v12  ;;  %v5367_v42 = vadd.f32 %v2056_v33, %v1576_v34  ;;  %v2198_v44 = vpop.f32.mrb[3].mxu1  ;;  %4865 = vmatpush1.bf16.msra.mxu0 %v4864_v13  ;;  %v5002_v12 = vpack.c.bf16 %v1324_v2, %v1308_v1  ;;  %v1323_v34 = vld [vmem:[#allocation2 + $0x18f0] sm:$0xff]  ;;  %v1338_v13 = vld [vmem:[#allocation2 + $0x1968] sm:$0xff]  ;;  %v4880_v31 = vpack.c.bf16 %v1353_v22, %v1337_v21 }
 0x307   : > { %v2773_v45 = vmax.f32 %v5366_v30, 0.0  ;;  %v5369_v46 = vadd.f32 %v2198_v44, %v1584_v14  ;;  %4993 = vmatpush1.bf16.msra.mxu1 %v4992_v15  ;;  %4867 = vmatprep.subr.bf16.mxu0 %v4866_v17  ;;  %v1354_v14 = vld [vmem:[#allocation2 + $0x19e8] sm:$0xff]  ;;  %v1340_v15 = vld [vmem:[#allocation2 + $0x1978] sm:$0xff]  ;;  %v5004_v39 = vpack.c.bf16 %v1323_v34, %v1307_v11  ;;  %v1387_v44 = vld [vmem:[#allocation2 + $0x1af0] sm:$0xff] }
 0x308   : > { %v2775_v55 = vmax.f32 %v5368_v41, 0.0  ;;  %v2774_v56 = vmax.f32 %v5367_v42, 0.0  ;;  %4995 = vmatprep.subr.bf16.mxu1 %v4994_v23  ;;  %v1356_v17 = vld [vmem:[#allocation2 + $0x19f8] sm:$0xff]  ;;  %v4878_v20 = vpack.c.bf16 %v1354_v14, %v1338_v13  ;;  %v1339_v23 = vld [vmem:[#allocation2 + $0x1970] sm:$0xff]  ;;  %v1450_v16 = vld [vmem:[#allocation2 + $0x1ce8] sm:$0xff] }
 0x309   : > { %v6394_v24 = vmax.f32 %v2769_v28, %v2773_v45  ;;  %v2776_v0 = vmax.f32 %v5369_v46, 0.0  ;;  %v5006_v25 = vpack.c.bf16 %v1356_v17, %v1340_v15  ;;  %v1386_v28 = vld [vmem:[#allocation2 + $0x1ae8] sm:$0xff]  ;;  %v1388_v30 = vld [vmem:[#allocation2 + $0x1af8] sm:$0xff]  ;;  %v5008_v33 = vpack.c.bf16 %v1355_v26, %v1339_v23  ;;  %v1371_v41 = vld [vmem:[#allocation2 + $0x1a70] sm:$0xff] }
 0x30a   : > { %v6396_v3 = vmax.f32 %v2771_v38, %v2775_v55  ;;  %v6398_v4 = vmax.f32 %v2770_v52, %v2774_v56  ;;  %4869 = vmatpush1.bf16.msra.mxu0 %v4868_v40  ;;  %v4882_v35 = vpack.c.bf16 %v1386_v28, %v1370_v27  ;;  %v1385_v38 = vld [vmem:[#allocation2 + $0x1ae0] sm:$0xff]  ;;  %v5010_v42 = vpack.c.bf16 %v1388_v30, %v1372_v29  ;;  %v1402_v40 = vld [vmem:[#allocation2 + $0x1b68] sm:$0xff]  ;;  %v1404_v46 = vld [vmem:[#allocation2 + $0x1b78] sm:$0xff] }
 0x30b   : > { %v6400_v6 = vmax.f32 %v2772_v63, %v2776_v0  ;;  %4997 = vmatpush1.bf16.msra.mxu1 %v4996_v48  ;;  %4871 = vmatprep.subr.bf16.mxu0 %v4870_v49  ;;  %v1418_v45 = vld [vmem:[#allocation2 + $0x1be8] sm:$0xff]  ;;  %v1420_v48 = vld [vmem:[#allocation2 + $0x1bf8] sm:$0xff]  ;;  %v4884_v49 = vpack.c.bf16 %v1385_v38, %v1369_v36  ;;  %v5012_v50 = vpack.c.bf16 %v1387_v44, %v1371_v41  ;;  %v1417_v52 = vld [vmem:[#allocation2 + $0x1be0] sm:$0xff] }
 0x30c   : > { %4999 = vmatprep.subr.bf16.mxu1 %v4998_v57  ;;  %v4886_v51 = vpack.c.bf16 %v1418_v45, %v1402_v40  ;;  %v1403_v55 = vld [vmem:[#allocation2 + $0x1b70] sm:$0xff]  ;;  %v5014_v56 = vpack.c.bf16 %v1420_v48, %v1404_v46  ;;  %v1452_v63 = vld [vmem:[#allocation2 + $0x1cf8] sm:$0xff]  ;;  %v4888_v0 = vpack.c.bf16 %v1417_v52, %v1401_v43  ;;  %v4890_v2 = vpack.c.bf16 %v1450_v16, %v1434_v58  ;;  %v1466_v11 = vld [vmem:[#allocation2 + $0x1d68] sm:$0xff] }
 0x30d   : > { %v1419_v57 = vld [vmem:[#allocation2 + $0x1bf0] sm:$0xff]  ;;  %v5018_v9 = vpack.c.bf16 %v1452_v63, %v1436_v62  ;;  %v1468_v34 = vld [vmem:[#allocation2 + $0x1d78] sm:$0xff]  ;;  %v1498_v23 = vld [vmem:[#allocation2 + $0x1e68] sm:$0xff] }
 0x30e   : > { %4873 = vmatpush1.bf16.msra.mxu0 %v4872_v5  ;;  %v5016_v1 = vpack.c.bf16 %v1419_v57, %v1403_v55  ;;  %v1433_v5 = vld [vmem:[#allocation2 + $0x1c60] sm:$0xff]  ;;  %v1484_v13 = vld [vmem:[#allocation2 + $0x1df8] sm:$0xff]  ;;  %v1483_v22 = vld [vmem:[#allocation2 + $0x1df0] sm:$0xff] }
 0x30f   : > { %5001 = vmatpush1.bf16.msra.mxu1 %v5000_v7  ;;  %4875 = vmatprep.subr.bf16.mxu0 %v4874_v8  ;;  %v1449_v7 = vld [vmem:[#allocation2 + $0x1ce0] sm:$0xff]  ;;  %v1435_v8 = vld [vmem:[#allocation2 + $0x1c70] sm:$0xff]  ;;  %v5022_v21 = vpack.c.bf16 %v1484_v13, %v1468_v34  ;;  %v1500_v26 = vld [vmem:[#allocation2 + $0x1e78] sm:$0xff] }
 0x310   : > { %5003 = vmatprep.subr.bf16.mxu1 %v5002_v12  ;;  %v1482_v12 = vld [vmem:[#allocation2 + $0x1de8] sm:$0xff]  ;;  %v4892_v14 = vpack.c.bf16 %v1449_v7, %v1433_v5  ;;  %v5020_v15 = vpack.c.bf16 %v1451_v10, %v1435_v8  ;;  %v1516_v27 = vld [vmem:[#allocation2 + $0x1ef8] sm:$0xff]  ;;  %v1515_v38 = vld [vmem:[#allocation2 + $0x1ef0] sm:$0xff] }
 0x311   : > { %v4894_v17 = vpack.c.bf16 %v1482_v12, %v1466_v11  ;;  %v5026_v36 = vpack.c.bf16 %v1516_v27, %v1500_v26  ;;  %v1530_v41 = vld [vmem:[#allocation2 + $0x1f68] sm:$0xff]  ;;  %v1532_v44 = vld [vmem:[#allocation2 + $0x1f78] sm:$0xff]  ;;  %v1547_v52 = vld [vmem:[#allocation2 + $0x1ff0] sm:$0xff] }
 0x312   : > { %4877 = vmatpush1.bf16.msra.mxu0 %v4876_v19  ;;  %v1465_v19 = vld [vmem:[#allocation2 + $0x1d60] sm:$0xff]  ;;  %v1548_v40 = vld [vmem:[#allocation2 + $0x1ff8] sm:$0xff]  ;;  %v2800_v57 = vld [vmem:[#allocation7 + $0x18] sm:$0xff] }
 0x313   : > { %5005 = vmatpush1.bf16.msra.mxu1 %v5004_v39  ;;  %4879 = vmatprep.subr.bf16.mxu0 %v4878_v20  ;;  %v1481_v39 = vld [vmem:[#allocation2 + $0x1de0] sm:$0xff]  ;;  %v1467_v20 = vld [vmem:[#allocation2 + $0x1d70] sm:$0xff]  ;;  %v5030_v43 = vpack.c.bf16 %v1548_v40, %v1532_v44  ;;  %v2798_v55 = vld [vmem:[#allocation7 + $0x8] sm:$0xff] }
 0x314   : > { %5007 = vmatprep.subr.bf16.mxu1 %v5006_v25  ;;  %v1514_v25 = vld [vmem:[#allocation2 + $0x1ee8] sm:$0xff]  ;;  %v4896_v28 = vpack.c.bf16 %v1481_v39, %v1465_v19  ;;  %v5024_v29 = vpack.c.bf16 %v1483_v22, %v1467_v20  ;;  %v2803_v7 = vld [vmem:[#allocation7 + $0x30] sm:$0xff]  ;;  %v2806_v8 = vld [vmem:[#allocation7 + $0x48] sm:$0xff] }
 0x315   : > { %v4898_v30 = vpack.c.bf16 %v1514_v25, %v1498_v23  ;;  %v2804_v58 = vld [vmem:[#allocation7 + $0x38] sm:$0xff]  ;;  %v2811_v39 = vld [vmem:[#allocation7 + $0x70] sm:$0xff]  ;;  %v2814_v20 = vld [vmem:[#allocation7 + $0x88] sm:$0xff] }
 0x316   : > { %4881 = vmatpush1.bf16.msra.mxu0 %v4880_v31  ;;  %v1497_v31 = vld [vmem:[#allocation2 + $0x1e60] sm:$0xff]  ;;  %v5162_v5 = vpack.c.bf16 %v2804_v58, %v2800_v57  ;;  %v2808_v10 = vld [vmem:[#allocation7 + $0x58] sm:$0xff]  ;;  %v5559_v22 = vld [vmem:[%s6315_s22 + $0x10] sm:$0xff] }
 0x317   : > { %5009 = vmatpush1.bf16.msra.mxu1 %v5008_v33  ;;  %4883 = vmatprep.subr.bf16.mxu0 %v4882_v35  ;;  %v1513_v33 = vld [vmem:[#allocation2 + $0x1ee0] sm:$0xff]  ;;  %v1499_v35 = vld [vmem:[#allocation2 + $0x1e70] sm:$0xff]  ;;  %v2812_v11 = vld [vmem:[#allocation7 + $0x78] sm:$0xff] }
 0x318   : > { %5011 = vmatprep.subr.bf16.mxu1 %v5010_v42  ;;  %v1546_v42 = vld [vmem:[#allocation2 + $0x1fe8] sm:$0xff]  ;;  %v4900_v45 = vpack.c.bf16 %v1513_v33, %v1497_v31  ;;  %v5028_v46 = vpack.c.bf16 %v1515_v38, %v1499_v35  ;;  %v5166_v19 = vpack.c.bf16 %v2812_v11, %v2808_v10  ;;  %v2815_v31 = vld [vmem:[#allocation7 + $0x90] sm:$0xff]  ;;  %v2826_v38 = vld [vmem:[#allocation7 + $0xe8] sm:$0xff] }
 0x319   : > { %v4902_v48 = vpack.c.bf16 %v1546_v42, %v1530_v41  ;;  %v2816_v23 = vld [vmem:[#allocation7 + $0x98] sm:$0xff]  ;;  %v2819_v35 = vld [vmem:[#allocation7 + $0xb0] sm:$0xff] }
 0x31a   : > { %4885 = vmatpush1.bf16.msra.mxu0 %v4884_v49  ;;  %v1529_v49 = vld [vmem:[#allocation2 + $0x1f60] sm:$0xff]  ;;  %v2820_v25 = vld [vmem:[#allocation7 + $0xb8] sm:$0xff]  ;;  %v5172_v40 = vpack.c.bf16 %v2819_v35, %v2815_v31  ;;  %v2854_v31 = vld [vmem:[#allocation7 + $0x1c8] sm:$0xff] }
 0x31b   : > { %5013 = vmatpush1.bf16.msra.mxu1 %v5012_v50  ;;  %4887 = vmatprep.subr.bf16.mxu0 %v4886_v51  ;;  %v1545_v50 = vld [vmem:[#allocation2 + $0x1fe0] sm:$0xff]  ;;  %v1531_v51 = vld [vmem:[#allocation2 + $0x1f70] sm:$0xff]  ;;  %v5170_v33 = vpack.c.bf16 %v2820_v25, %v2816_v23  ;;  %v2824_v41 = vld [vmem:[#allocation7 + $0xd8] sm:$0xff] }
 0x31c   : > { %5015 = vmatprep.subr.bf16.mxu1 %v5014_v56  ;;  %v2802_v56 = vld [vmem:[#allocation7 + $0x28] sm:$0xff]  ;;  %v4904_v16 = vpack.c.bf16 %v1545_v50, %v1529_v49  ;;  %v5032_v62 = vpack.c.bf16 %v1547_v52, %v1531_v51  ;;  %v2828_v42 = vld [vmem:[#allocation7 + $0xf8] sm:$0xff]  ;;  %v2823_v49 = vld [vmem:[#allocation7 + $0xd0] sm:$0xff] }
 0x31d   : > { %v5034_v63 = vpack.c.bf16 %v2802_v56, %v2798_v55  ;;  %v5174_v50 = vpack.c.bf16 %v2828_v42, %v2824_v41  ;;  %v2827_v51 = vld [vmem:[#allocation7 + $0xf0] sm:$0xff]  ;;  %v2834_v52 = vld [vmem:[#allocation7 + $0x128] sm:$0xff]  ;;  %v2832_v55 = vld [vmem:[#allocation7 + $0x118] sm:$0xff] }
 0x31e   : > { %4889 = vmatpush1.bf16.msra.mxu0 %v4888_v0  ;;  %v2797_v0 = vld [vmem:[#allocation7] sm:$0xff]  ;;  %v2836_v56 = vld [vmem:[#allocation7 + $0x138] sm:$0xff]  ;;  %v5176_v58 = vpack.c.bf16 %v2827_v51, %v2823_v49  ;;  %v2862_v49 = vld [vmem:[#allocation7 + $0x208] sm:$0xff] }
 0x31f   : > { %5017 = vmatpush1.bf16.msra.mxu1 %v5016_v1  ;;  %4891 = vmatprep.subr.bf16.mxu0 %v4890_v2  ;;  %v2801_v1 = vld [vmem:[#allocation7 + $0x20] sm:$0xff]  ;;  %v2799_v2 = vld [vmem:[#allocation7 + $0x10] sm:$0xff]  ;;  %v2856_v35 = vld [vmem:[#allocation7 + $0x1d8] sm:$0xff] }
 0x320   : > { %5019 = vmatprep.subr.bf16.mxu1 %v5018_v9  ;;  %v2810_v9 = vld [vmem:[#allocation7 + $0x68] sm:$0xff]  ;;  %v5036_v12 = vpack.c.bf16 %v2801_v1, %v2797_v0  ;;  %v5164_v34 = vpack.c.bf16 %v2803_v7, %v2799_v2  ;;  %v2831_v0 = vld [vmem:[#allocation7 + $0x110] sm:$0xff]  ;;  %v5178_v1 = vpack.c.bf16 %v2836_v56, %v2832_v55  ;;  %v2864_v51 = vld [vmem:[#allocation7 + $0x218] sm:$0xff] }
 0x321   : > { %v5038_v13 = vpack.c.bf16 %v2810_v9, %v2806_v8  ;;  %v2835_v2 = vld [vmem:[#allocation7 + $0x130] sm:$0xff]  ;;  %v2842_v7 = vld [vmem:[#allocation7 + $0x168] sm:$0xff]  ;;  %v2840_v8 = vld [vmem:[#allocation7 + $0x158] sm:$0xff] }
 0x322   : > { %4893 = vmatpush1.bf16.msra.mxu0 %v4892_v14  ;;  %v2805_v14 = vld [vmem:[#allocation7 + $0x40] sm:$0xff]  ;;  %v2844_v9 = vld [vmem:[#allocation7 + $0x178] sm:$0xff]  ;;  %v5180_v11 = vpack.c.bf16 %v2835_v2, %v2831_v0  ;;  %v2870_v0 = vld [vmem:[#allocation7 + $0x248] sm:$0xff] }
 0x323   : > { %5021 = vmatpush1.bf16.msra.mxu1 %v5020_v15  ;;  %4895 = vmatprep.subr.bf16.mxu0 %v4894_v17  ;;  %v2809_v15 = vld [vmem:[#allocation7 + $0x60] sm:$0xff]  ;;  %v2807_v17 = vld [vmem:[#allocation7 + $0x50] sm:$0xff]  ;;  %v2872_v2 = vld [vmem:[#allocation7 + $0x258] sm:$0xff] }
 0x324   : > { %5023 = vmatprep.subr.bf16.mxu1 %v5022_v21  ;;  %v2818_v21 = vld [vmem:[#allocation7 + $0xa8] sm:$0xff]  ;;  %v5040_v26 = vpack.c.bf16 %v2809_v15, %v2805_v14  ;;  %v5168_v27 = vpack.c.bf16 %v2811_v39, %v2807_v17  ;;  %v2839_v14 = vld [vmem:[#allocation7 + $0x150] sm:$0xff]  ;;  %v5182_v15 = vpack.c.bf16 %v2844_v9, %v2840_v8 }
 0x325   : > { %v2843_v17 = vld [vmem:[#allocation7 + $0x170] sm:$0xff]  ;;  %v2850_v39 = vld [vmem:[#allocation7 + $0x1a8] sm:$0xff] }
 0x326   : > { %4897 = vmatpush1.bf16.msra.mxu0 %v4896_v28  ;;  %v5042_v28 = vpack.c.bf16 %v2818_v21, %v2814_v20  ;;  %v2848_v20 = vld [vmem:[#allocation7 + $0x198] sm:$0xff]  ;;  %v5184_v23 = vpack.c.bf16 %v2843_v17, %v2839_v14  ;;  %v2878_v14 = vld [vmem:[#allocation7 + $0x288] sm:$0xff] }
 0x327   : > { %5025 = vmatpush1.bf16.msra.mxu1 %v5024_v29  ;;  %4899 = vmatprep.subr.bf16.mxu0 %v4898_v30  ;;  %v2813_v29 = vld [vmem:[#allocation7 + $0x80] sm:$0xff]  ;;  %v2852_v21 = vld [vmem:[#allocation7 + $0x1b8] sm:$0xff] }
 0x328   : > { %5027 = vmatprep.subr.bf16.mxu1 %v5026_v36  ;;  %v2817_v30 = vld [vmem:[#allocation7 + $0xa0] sm:$0xff]  ;;  %v2822_v36 = vld [vmem:[#allocation7 + $0xc8] sm:$0xff]  ;;  %v2880_v17 = vld [vmem:[#allocation7 + $0x298] sm:$0xff] }
 0x329   : > { %v5044_v44 = vpack.c.bf16 %v2817_v30, %v2813_v29  ;;  %v5186_v29 = vpack.c.bf16 %v2852_v21, %v2848_v20  ;;  %v2851_v30 = vld [vmem:[#allocation7 + $0x1b0] sm:$0xff] }
 0x32a   : > { %4901 = vmatpush1.bf16.msra.mxu0 %v4900_v45  ;;  %v5046_v45 = vpack.c.bf16 %v2826_v38, %v2822_v36  ;;  %v2860_v36 = vld [vmem:[#allocation7 + $0x1f8] sm:$0xff] }
 0x32b   : > { %5029 = vmatpush1.bf16.msra.mxu1 %v5028_v46  ;;  %4903 = vmatprep.subr.bf16.mxu0 %v4902_v48  ;;  %v2821_v46 = vld [vmem:[#allocation7 + $0xc0] sm:$0xff] }
 0x32c   : > { %5031 = vmatprep.subr.bf16.mxu1 %v5030_v43  ;;  %v2825_v48 = vld [vmem:[#allocation7 + $0xe0] sm:$0xff]  ;;  %v2830_v43 = vld [vmem:[#allocation7 + $0x108] sm:$0xff] }
 0x32d   : > { %v5048_v57 = vpack.c.bf16 %v2825_v48, %v2821_v46  ;;  %v5190_v46 = vpack.c.bf16 %v2860_v36, %v2856_v35  ;;  %v2859_v48 = vld [vmem:[#allocation7 + $0x1f0] sm:$0xff] }
 0x32e   : > { %4905 = vmatpush1.bf16.msra.mxu0 %v4904_v16  ;;  %v5050_v16 = vpack.c.bf16 %v2834_v52, %v2830_v43  ;;  %v2868_v43 = vld [vmem:[#allocation7 + $0x238] sm:$0xff] }
 0x32f   : > { %5033 = vmatpush1.bf16.msra.mxu1 %v5032_v62  ;;  %5035 = vmatprep.subr.bf16.mxu0 %v5034_v63  ;;  %v2829_v62 = vld [vmem:[#allocation7 + $0x100] sm:$0xff] }
 0x330   : > { %5163 = vmatprep.subr.bf16.mxu1 %v5162_v5  ;;  %v2833_v63 = vld [vmem:[#allocation7 + $0x120] sm:$0xff]  ;;  %v2838_v5 = vld [vmem:[#allocation7 + $0x148] sm:$0xff] }
 0x331   : > { %2621 = vmatmul.mubr.f32.vlgmr.msra.gmra.mrb[6].mxu0 %v5559_v22  ;;  %v5052_v10 = vpack.c.bf16 %v2833_v63, %v2829_v62  ;;  %v5194_v62 = vpack.c.bf16 %v2868_v43, %v2864_v51  ;;  %v2867_v63 = vld [vmem:[#allocation7 + $0x230] sm:$0xff] }
 0x332   : > { %2763 = vmatmul.mubr.f32.vlgmr.msra.gmra.mrb[6].mxu1 %v5559_v22  ;;  %5037 = vmatpush1.bf16.msra.mxu0 %v5036_v12  ;;  %v5054_v12 = vpack.c.bf16 %v2842_v7, %v2838_v5  ;;  %v2876_v5 = vld [vmem:[#allocation7 + $0x278] sm:$0xff] }
 0x333   : > { %5165 = vmatpush1.bf16.msra.mxu1 %v5164_v34  ;;  %5039 = vmatprep.subr.bf16.mxu0 %v5038_v13  ;;  %v2837_v34 = vld [vmem:[#allocation7 + $0x140] sm:$0xff] }
 0x334   : > { %5167 = vmatprep.subr.bf16.mxu1 %v5166_v19  ;;  %v2841_v13 = vld [vmem:[#allocation7 + $0x160] sm:$0xff]  ;;  %v2846_v19 = vld [vmem:[#allocation7 + $0x188] sm:$0xff] }
 0x335   : > { %v5056_v22 = vpack.c.bf16 %v2841_v13, %v2837_v34  ;;  %v5058_v25 = vpack.c.bf16 %v2850_v39, %v2846_v19  ;;  %v5198_v34 = vpack.c.bf16 %v2876_v5, %v2872_v2  ;;  %v2875_v13 = vld [vmem:[#allocation7 + $0x270] sm:$0xff]  ;;  %v2884_v19 = vld [vmem:[#allocation7 + $0x2b8] sm:$0xff] }
 0x336   : > { %5041 = vmatpush1.bf16.msra.mxu0 %v5040_v26  ;;  %v2845_v26 = vld [vmem:[#allocation7 + $0x180] sm:$0xff] }
 0x337   : > { %5169 = vmatpush1.bf16.msra.mxu1 %v5168_v27  ;;  %5043 = vmatprep.subr.bf16.mxu0 %v5042_v28  ;;  %v2849_v27 = vld [vmem:[#allocation7 + $0x1a0] sm:$0xff]  ;;  %v2847_v28 = vld [vmem:[#allocation7 + $0x190] sm:$0xff] }
 0x338   : > { %5171 = vmatprep.subr.bf16.mxu1 %v5170_v33  ;;  %v2858_v33 = vld [vmem:[#allocation7 + $0x1e8] sm:$0xff]  ;;  %v5060_v38 = vpack.c.bf16 %v2849_v27, %v2845_v26  ;;  %v5188_v41 = vpack.c.bf16 %v2851_v30, %v2847_v28  ;;  %v5202_v26 = vpack.c.bf16 %v2884_v19, %v2880_v17  ;;  %v2883_v27 = vld [vmem:[#allocation7 + $0x2b0] sm:$0xff]  ;;  %v2888_v30 = vld [vmem:[#allocation7 + $0x2d8] sm:$0xff] }
 0x339   : > { %v5062_v42 = vpack.c.bf16 %v2858_v33, %v2854_v31  ;;  %v2886_v28 = vld [vmem:[#allocation7 + $0x2c8] sm:$0xff]  ;;  %v2892_v31 = vld [vmem:[#allocation7 + $0x2f8] sm:$0xff] }
 0x33a   : > { %5045 = vmatpush1.bf16.msra.mxu0 %v5044_v44  ;;  %v2853_v44 = vld [vmem:[#allocation7 + $0x1c0] sm:$0xff]  ;;  %v2912_v17 = vld [vmem:[#allocation7 + $0x398] sm:$0xff] }
 0x33b   : > { %5173 = vmatpush1.bf16.msra.mxu1 %v5172_v40  ;;  %5047 = vmatprep.subr.bf16.mxu0 %v5046_v45  ;;  %v2857_v40 = vld [vmem:[#allocation7 + $0x1e0] sm:$0xff]  ;;  %v2855_v45 = vld [vmem:[#allocation7 + $0x1d0] sm:$0xff] }
 0x33c   : > { %5175 = vmatprep.subr.bf16.mxu1 %v5174_v50  ;;  %v2866_v50 = vld [vmem:[#allocation7 + $0x228] sm:$0xff]  ;;  %v5064_v52 = vpack.c.bf16 %v2857_v40, %v2853_v44  ;;  %v5192_v55 = vpack.c.bf16 %v2859_v48, %v2855_v45  ;;  %v5206_v44 = vpack.c.bf16 %v2892_v31, %v2888_v30  ;;  %v2891_v40 = vld [vmem:[#allocation7 + $0x2f0] sm:$0xff]  ;;  %v2896_v48 = vld [vmem:[#allocation7 + $0x318] sm:$0xff] }
 0x33d   : > { %v5066_v56 = vpack.c.bf16 %v2866_v50, %v2862_v49  ;;  %v2894_v45 = vld [vmem:[#allocation7 + $0x308] sm:$0xff]  ;;  %v2900_v49 = vld [vmem:[#allocation7 + $0x338] sm:$0xff] }
 0x33e   : > { %5049 = vmatpush1.bf16.msra.mxu0 %v5048_v57  ;;  %v2861_v57 = vld [vmem:[#allocation7 + $0x200] sm:$0xff]  ;;  %v2918_v31 = vld [vmem:[#allocation7 + $0x3c8] sm:$0xff] }
 0x33f   : > { %5177 = vmatpush1.bf16.msra.mxu1 %v5176_v58  ;;  %5051 = vmatprep.subr.bf16.mxu0 %v5050_v16  ;;  %v2865_v58 = vld [vmem:[#allocation7 + $0x220] sm:$0xff]  ;;  %v2863_v16 = vld [vmem:[#allocation7 + $0x210] sm:$0xff] }
 0x340   : > { %5179 = vmatprep.subr.bf16.mxu1 %v5178_v1  ;;  %v2874_v1 = vld [vmem:[#allocation7 + $0x268] sm:$0xff]  ;;  %v5068_v7 = vpack.c.bf16 %v2865_v58, %v2861_v57  ;;  %v5196_v8 = vpack.c.bf16 %v2867_v63, %v2863_v16  ;;  %v5210_v57 = vpack.c.bf16 %v2900_v49, %v2896_v48  ;;  %v2899_v58 = vld [vmem:[#allocation7 + $0x330] sm:$0xff]  ;;  %v2904_v63 = vld [vmem:[#allocation7 + $0x358] sm:$0xff] }
 0x341   : > { %v5070_v9 = vpack.c.bf16 %v2874_v1, %v2870_v0  ;;  %v2902_v16 = vld [vmem:[#allocation7 + $0x348] sm:$0xff]  ;;  %v2908_v0 = vld [vmem:[#allocation7 + $0x378] sm:$0xff] }
 0x342   : > { %5053 = vmatpush1.bf16.msra.mxu0 %v5052_v10  ;;  %v2869_v10 = vld [vmem:[#allocation7 + $0x240] sm:$0xff]  ;;  %v2926_v49 = vld [vmem:[#allocation7 + $0x408] sm:$0xff] }
 0x343   : > { %5181 = vmatpush1.bf16.msra.mxu1 %v5180_v11  ;;  %5055 = vmatprep.subr.bf16.mxu0 %v5054_v12  ;;  %v2873_v11 = vld [vmem:[#allocation7 + $0x260] sm:$0xff]  ;;  %v2871_v12 = vld [vmem:[#allocation7 + $0x250] sm:$0xff] }
 0x344   : > { %5183 = vmatprep.subr.bf16.mxu1 %v5182_v15  ;;  %v2882_v15 = vld [vmem:[#allocation7 + $0x2a8] sm:$0xff]  ;;  %v5072_v39 = vpack.c.bf16 %v2873_v11, %v2869_v10  ;;  %v5200_v20 = vpack.c.bf16 %v2875_v13, %v2871_v12  ;;  %v2903_v10 = vld [vmem:[#allocation7 + $0x350] sm:$0xff] }
 0x345   : > { %v5074_v21 = vpack.c.bf16 %v2882_v15, %v2878_v14  ;;  %v2907_v11 = vld [vmem:[#allocation7 + $0x370] sm:$0xff]  ;;  %v2910_v14 = vld [vmem:[#allocation7 + $0x388] sm:$0xff] }
 0x346   : > { %5057 = vmatpush1.bf16.msra.mxu0 %v5056_v22  ;;  %v2877_v22 = vld [vmem:[#allocation7 + $0x280] sm:$0xff]  ;;  %v2914_v15 = vld [vmem:[#allocation7 + $0x3a8] sm:$0xff] }
 0x347   : > { %5185 = vmatpush1.bf16.msra.mxu1 %v5184_v23  ;;  %5059 = vmatprep.subr.bf16.mxu0 %v5058_v25  ;;  %v2881_v23 = vld [vmem:[#allocation7 + $0x2a0] sm:$0xff]  ;;  %v2879_v25 = vld [vmem:[#allocation7 + $0x290] sm:$0xff] }
 0x348   : > { %5187 = vmatprep.subr.bf16.mxu1 %v5186_v29  ;;  %v2890_v29 = vld [vmem:[#allocation7 + $0x2e8] sm:$0xff]  ;;  %v5076_v33 = vpack.c.bf16 %v2881_v23, %v2877_v22  ;;  %v5204_v35 = vpack.c.bf16 %v2883_v27, %v2879_v25  ;;  %v2909_v22 = vld [vmem:[#allocation7 + $0x380] sm:$0xff] }
 0x349   : > { %v5078_v36 = vpack.c.bf16 %v2890_v29, %v2886_v28  ;;  %v2913_v23 = vld [vmem:[#allocation7 + $0x3a0] sm:$0xff]  ;;  %v2911_v28 = vld [vmem:[#allocation7 + $0x390] sm:$0xff] }
 0x34a   : > { %5061 = vmatpush1.bf16.msra.mxu0 %v5060_v38  ;;  %v2885_v38 = vld [vmem:[#allocation7 + $0x2c0] sm:$0xff]  ;;  %v5092_v27 = vpack.c.bf16 %v2913_v23, %v2909_v22  ;;  %v2915_v29 = vld [vmem:[#allocation7 + $0x3b0] sm:$0xff] }
 0x34b   : > { %5189 = vmatpush1.bf16.msra.mxu1 %v5188_v41  ;;  %5063 = vmatprep.subr.bf16.mxu0 %v5062_v42  ;;  %v2889_v41 = vld [vmem:[#allocation7 + $0x2e0] sm:$0xff]  ;;  %v2887_v42 = vld [vmem:[#allocation7 + $0x2d0] sm:$0xff]  ;;  %v5220_v30 = vpack.c.bf16 %v2915_v29, %v2911_v28  ;;  %v2934_v29 = vld [vmem:[#allocation7 + $0x448] sm:$0xff] }
 0x34c   : > { %5191 = vmatprep.subr.bf16.mxu1 %v5190_v46  ;;  %v2898_v46 = vld [vmem:[#allocation7 + $0x328] sm:$0xff]  ;;  %v5080_v50 = vpack.c.bf16 %v2889_v41, %v2885_v38  ;;  %v5208_v51 = vpack.c.bf16 %v2891_v40, %v2887_v42  ;;  %v2924_v38 = vld [vmem:[#allocation7 + $0x3f8] sm:$0xff]  ;;  %v2917_v41 = vld [vmem:[#allocation7 + $0x3c0] sm:$0xff] }
 0x34d   : > { %v5082_v43 = vpack.c.bf16 %v2898_v46, %v2894_v45  ;;  %v2921_v42 = vld [vmem:[#allocation7 + $0x3e0] sm:$0xff]  ;;  %v2919_v45 = vld [vmem:[#allocation7 + $0x3d0] sm:$0xff] }
 0x34e   : > { %5065 = vmatpush1.bf16.msra.mxu0 %v5064_v52  ;;  %v2893_v52 = vld [vmem:[#allocation7 + $0x300] sm:$0xff]  ;;  %v5096_v40 = vpack.c.bf16 %v2921_v42, %v2917_v41  ;;  %v2923_v46 = vld [vmem:[#allocation7 + $0x3f0] sm:$0xff] }
 0x34f   : > { %5193 = vmatpush1.bf16.msra.mxu1 %v5192_v55  ;;  %5067 = vmatprep.subr.bf16.mxu0 %v5066_v56  ;;  %v2897_v55 = vld [vmem:[#allocation7 + $0x320] sm:$0xff]  ;;  %v2895_v56 = vld [vmem:[#allocation7 + $0x310] sm:$0xff]  ;;  %v5224_v48 = vpack.c.bf16 %v2923_v46, %v2919_v45 }
 0x350   : > { %5195 = vmatprep.subr.bf16.mxu1 %v5194_v62  ;;  %v2906_v62 = vld [vmem:[#allocation7 + $0x368] sm:$0xff]  ;;  %v5084_v1 = vpack.c.bf16 %v2897_v55, %v2893_v52  ;;  %v5212_v2 = vpack.c.bf16 %v2899_v58, %v2895_v56  ;;  %v2932_v52 = vld [vmem:[#allocation7 + $0x438] sm:$0xff]  ;;  %v2925_v23 = vld [vmem:[#allocation7 + $0x400] sm:$0xff] }
 0x351   : > { %v5086_v5 = vpack.c.bf16 %v2906_v62, %v2902_v16  ;;  %v1550_v56 = vld [vmem:[#allocation5 + $0x8] sm:$0xff]  ;;  %v2937_v45 = vld [vmem:[#allocation7 + $0x460] sm:$0xff] }
 0x352   : > { %5069 = vmatpush1.bf16.msra.mxu0 %v5068_v7  ;;  %v2901_v7 = vld [vmem:[#allocation7 + $0x340] sm:$0xff]  ;;  %v1596_v58 = vrot.slane %v1550_v56, %v6358_v37  ;;  %v1592_v16 = vrot.slane %v1550_v56, %v6361_v47  ;;  %v1600_v62 = vrot.slane %v1550_v56, %v6366_v53 }
 0x353   : > { %5197 = vmatpush1.bf16.msra.mxu1 %v5196_v8  ;;  %5071 = vmatprep.subr.bf16.mxu0 %v5070_v9  ;;  %v2905_v8 = vld [vmem:[#allocation7 + $0x360] sm:$0xff]  ;;  %v5214_v9 = vpack.c.bf16 %v2908_v0, %v2904_v63  ;;  %v1604_v63 = vrot.slane %v1550_v56, %v1571_v54  ;;  %v1612_v0 = vrot.slane %v1550_v56, %v1579_v59 }
 0x354   : > { %5199 = vmatprep.subr.bf16.mxu1 %v5198_v34  ;;  %v5088_v12 = vpack.c.bf16 %v2905_v8, %v2901_v7  ;;  %v5216_v34 = vpack.c.bf16 %v2907_v11, %v2903_v10 }
 0x356   : > { %5073 = vmatpush1.bf16.msra.mxu0 %v5072_v39 }
 0x357   : > { %5201 = vmatpush1.bf16.msra.mxu1 %v5200_v20  ;;  %5075 = vmatprep.subr.bf16.mxu0 %v5074_v21  ;;  %v5090_v20 = vpack.c.bf16 %v2914_v15, %v2910_v14  ;;  %v2916_v21 = vld [vmem:[#allocation7 + $0x3b8] sm:$0xff] }
 0x358   : > { %5203 = vmatprep.subr.bf16.mxu1 %v5202_v26  ;;  %v5218_v26 = vpack.c.bf16 %v2916_v21, %v2912_v17 }
 0x35a   : > { %5077 = vmatpush1.bf16.msra.mxu0 %v5076_v33  ;;  %v2922_v33 = vld [vmem:[#allocation7 + $0x3e8] sm:$0xff] }
 0x35b   : > { %5205 = vmatpush1.bf16.msra.mxu1 %v5204_v35  ;;  %5079 = vmatprep.subr.bf16.mxu0 %v5078_v36  ;;  %v2920_v35 = vld [vmem:[#allocation7 + $0x3d8] sm:$0xff]  ;;  %v5094_v36 = vpack.c.bf16 %v2922_v33, %v2918_v31  ;;  %v2938_v33 = vld [vmem:[#allocation7 + $0x468] sm:$0xff] }
 0x35c   : > { %5207 = vmatprep.subr.bf16.mxu1 %v5206_v44  ;;  %v5222_v44 = vpack.c.bf16 %v2924_v38, %v2920_v35  ;;  %v2936_v35 = vld [vmem:[#allocation7 + $0x458] sm:$0xff] }
 0x35e   : > { %5081 = vmatpush1.bf16.msra.mxu0 %v5080_v50  ;;  %v2930_v50 = vld [vmem:[#allocation7 + $0x428] sm:$0xff] }
 0x35f   : > { %5209 = vmatpush1.bf16.msra.mxu1 %v5208_v51  ;;  %5083 = vmatprep.subr.bf16.mxu0 %v5082_v43  ;;  %v2928_v51 = vld [vmem:[#allocation7 + $0x418] sm:$0xff]  ;;  %v5098_v43 = vpack.c.bf16 %v2930_v50, %v2926_v49  ;;  %v2939_v49 = vld [vmem:[#allocation7 + $0x470] sm:$0xff]  ;;  %v2942_v50 = vld [vmem:[#allocation7 + $0x488] sm:$0xff] }
 0x360   : > { %5211 = vmatprep.subr.bf16.mxu1 %v5210_v57  ;;  %v5226_v55 = vpack.c.bf16 %v2932_v52, %v2928_v51  ;;  %v1588_v57 = vrot.slane %v1550_v56, %v6353_v32  ;;  %v2944_v52 = vld [vmem:[#allocation7 + $0x498] sm:$0xff] }
 0x362   : > { %5085 = vmatpush1.bf16.msra.mxu0 %v5084_v1  ;;  %v1608_v1 = vrot.slane %v1550_v56, %v1575_v60 }
 0x363   : > { %5213 = vmatpush1.bf16.msra.mxu1 %v5212_v2  ;;  %5087 = vmatprep.subr.bf16.mxu0 %v5086_v5  ;;  %v1616_v5 = vrot.slane %v1550_v56, %v1583_v61  ;;  %v2941_v56 = vld [vmem:[#allocation7 + $0x480] sm:$0xff] }
 0x364   : > { %5215 = vmatprep.subr.bf16.mxu1 %v5214_v9 }
 0x366   : > { %5089 = vmatpush1.bf16.msra.mxu0 %v5088_v12 }
 0x367   : > { %5217 = vmatpush1.bf16.msra.mxu1 %v5216_v34  ;;  %5091 = vmatprep.subr.bf16.mxu0 %v5090_v20 }
 0x368   : > { %5219 = vmatprep.subr.bf16.mxu1 %v5218_v26  ;;  %v2927_v26 = vld [vmem:[#allocation7 + $0x410] sm:$0xff] }
 0x36a   : > { %5093 = vmatpush1.bf16.msra.mxu0 %v5092_v27 }
 0x36b   : > { %5221 = vmatpush1.bf16.msra.mxu1 %v5220_v30  ;;  %5095 = vmatprep.subr.bf16.mxu0 %v5094_v36  ;;  %v2940_v36 = vld [vmem:[#allocation7 + $0x478] sm:$0xff] }
 0x36c   : > { %5223 = vmatprep.subr.bf16.mxu1 %v5222_v44  ;;  %v5230_v51 = vpack.c.bf16 %v2940_v36, %v2936_v35  ;;  %v2971_v35 = vld [vmem:[#allocation7 + $0x570] sm:$0xff]  ;;  %v2974_v36 = vld [vmem:[#allocation7 + $0x588] sm:$0xff] }
 0x36e   : > { %5097 = vmatpush1.bf16.msra.mxu0 %v5096_v40  ;;  %v2933_v40 = vld [vmem:[#allocation7 + $0x440] sm:$0xff] }
 0x36f   : > { %5225 = vmatpush1.bf16.msra.mxu1 %v5224_v48  ;;  %5099 = vmatprep.subr.bf16.mxu0 %v5098_v43  ;;  %v2935_v48 = vld [vmem:[#allocation7 + $0x450] sm:$0xff]  ;;  %v2946_v43 = vld [vmem:[#allocation7 + $0x4a8] sm:$0xff] }
 0x370   : > { %5227 = vmatprep.subr.bf16.mxu1 %v5226_v55  ;;  %v2948_v55 = vld [vmem:[#allocation7 + $0x4b8] sm:$0xff] }
 0x384   : > { %v2338_v13 = vpop.f32.mrb[4].mxu0 }
 0x385   : > { %v2480_v19 = vpop.f32.mrb[4].mxu1  ;;  %v2340_v39 = vpop.f32.mrb[5].mxu0  ;;  %v5370_v2 = vadd.f32 %v2338_v13, %v1588_v57  ;;  %v2945_v57 = vld [vmem:[#allocation7 + $0x4a0] sm:$0xff] }
 0x386   : > { %v2482_v25 = vpop.f32.mrb[5].mxu1  ;;  %v5372_v7 = vadd.f32 %v2480_v19, %v1596_v58  ;;  %v5371_v8 = vadd.f32 %v2340_v39, %v1592_v16  ;;  %v2929_v39 = vld [vmem:[#allocation7 + $0x420] sm:$0xff]  ;;  %v5234_v58 = vpack.c.bf16 %v2948_v55, %v2944_v52  ;;  %v2943_v16 = vld [vmem:[#allocation7 + $0x490] sm:$0xff]  ;;  %v2986_v52 = vld [vmem:[#allocation7 + $0x5e8] sm:$0xff] }
 0x387   : > { %v5373_v10 = vadd.f32 %v2482_v25, %v1600_v62  ;;  %v2777_v17 = vmax.f32 %v5370_v2, 0.0  ;;  %v2931_v25 = vld [vmem:[#allocation7 + $0x430] sm:$0xff]  ;;  %v5100_v42 = vpack.c.bf16 %v2929_v39, %v2925_v23  ;;  %v2956_v2 = vld [vmem:[#allocation7 + $0x4f8] sm:$0xff] }
 0x388   : > { %v2779_v21 = vmax.f32 %v5372_v7, 0.0  ;;  %v2778_v22 = vmax.f32 %v5371_v8, 0.0  ;;  %v5228_v44 = vpack.c.bf16 %v2931_v25, %v2927_v26  ;;  %v2947_v62 = vld [vmem:[#allocation7 + $0x4b0] sm:$0xff]  ;;  %v2949_v8 = vld [vmem:[#allocation7 + $0x4c0] sm:$0xff]  ;;  %v2968_v39 = vld [vmem:[#allocation7 + $0x558] sm:$0xff] }
 0x389   : > { %v2780_v18 = vmax.f32 %v5373_v10, 0.0  ;;  %v5236_v7 = vpack.c.bf16 %v2947_v62, %v2943_v16  ;;  %v2959_v23 = vld [vmem:[#allocation7 + $0x510] sm:$0xff]  ;;  %v2972_v26 = vld [vmem:[#allocation7 + $0x578] sm:$0xff] }
 0x38a   : > { %v2984_v55 = vld [vmem:[#allocation7 + $0x5d8] sm:$0xff]  ;;  %v2983_v62 = vld [vmem:[#allocation7 + $0x5d0] sm:$0xff] }
 0x404   : > { %v2622_v9 = vpop.f32.mrb[6].mxu0 }
 0x405   : > { %v5374_v11 = vadd.f32 %v2622_v9, %v1604_v63  ;;  %v2764_v12 = vpop.f32.mrb[6].mxu1  ;;  %v2624_v34 = vpop.f32.mrb[7].mxu0  ;;  %v2950_v63 = vld [vmem:[#allocation7 + $0x4c8] sm:$0xff]  ;;  %v2953_v9 = vld [vmem:[#allocation7 + $0x4e0] sm:$0xff] }
 0x406   : > { %v5376_v14 = vadd.f32 %v2764_v12, %v1612_v0  ;;  %v5375_v15 = vadd.f32 %v2624_v34, %v1608_v1  ;;  %v2766_v54 = vpop.f32.mrb[7].mxu1  ;;  %v2954_v0 = vld [vmem:[#allocation7 + $0x4e8] sm:$0xff]  ;;  %v2952_v1 = vld [vmem:[#allocation7 + $0x4d8] sm:$0xff]  ;;  %v2951_v12 = vld [vmem:[#allocation7 + $0x4d0] sm:$0xff] }
 0x407   : > { %v2781_v20 = vmax.f32 %v5374_v11, 0.0  ;;  %v5377_v59 = vadd.f32 %v2766_v54, %v1616_v5  ;;  %v5108_v5 = vpack.c.bf16 %v2945_v57, %v2941_v56  ;;  %v5110_v10 = vpack.c.bf16 %v2954_v0, %v2950_v63  ;;  %v2955_v34 = vld [vmem:[#allocation7 + $0x4f0] sm:$0xff]  ;;  %v2960_v54 = vld [vmem:[#allocation7 + $0x518] sm:$0xff]  ;;  %v2981_v57 = vld [vmem:[#allocation7 + $0x5c0] sm:$0xff] }
 0x408   : > { %v2783_v60 = vmax.f32 %v5376_v14, 0.0  ;;  %v2782_v13 = vmax.f32 %v5375_v15, 0.0  ;;  %v5238_v11 = vpack.c.bf16 %v2956_v2, %v2952_v1  ;;  %v2958_v14 = vld [vmem:[#allocation7 + $0x508] sm:$0xff]  ;;  %v2987_v63 = vld [vmem:[#allocation7 + $0x5f0] sm:$0xff]  ;;  %v2992_v2 = vld [vmem:[#allocation7 + $0x618] sm:$0xff] }
 0x409   : > { %v2789_v61 = vmax.f32 %v2777_v17, %v2781_v20  ;;  %v2784_v19 = vmax.f32 %v5377_v59, 0.0  ;;  %v2962_v15 = vld [vmem:[#allocation7 + $0x528] sm:$0xff]  ;;  %v2964_v17 = vld [vmem:[#allocation7 + $0x538] sm:$0xff]  ;;  %v5112_v20 = vpack.c.bf16 %v2953_v9, %v2949_v8  ;;  %v5240_v59 = vpack.c.bf16 %v2955_v34, %v2951_v12  ;;  %v2989_v9 = vld [vmem:[#allocation7 + $0x600] sm:$0xff] }
 0x40a   : > { %v2791_v27 = vmax.f32 %v2779_v21, %v2783_v60  ;;  %v2790_v28 = vmax.f32 %v2778_v22, %v2782_v13  ;;  %v2957_v21 = vld [vmem:[#allocation7 + $0x500] sm:$0xff]  ;;  %v5114_v60 = vpack.c.bf16 %v2962_v15, %v2958_v14  ;;  %v5242_v13 = vpack.c.bf16 %v2964_v17, %v2960_v54  ;;  %v2990_v0 = vld [vmem:[#allocation7 + $0x608] sm:$0xff]  ;;  %v2991_v34 = vld [vmem:[#allocation7 + $0x610] sm:$0xff] }
 0x40b   : > { %v2793_v30 = vmax.f32 %v6394_v24, %v2789_v61  ;;  %v2792_v31 = vmax.f32 %v2780_v18, %v2784_v19  ;;  %v5102_v24 = vpack.c.bf16 %v2938_v33, %v2934_v29  ;;  %v2961_v22 = vld [vmem:[#allocation7 + $0x520] sm:$0xff]  ;;  %v2963_v18 = vld [vmem:[#allocation7 + $0x530] sm:$0xff]  ;;  %v2966_v61 = vld [vmem:[#allocation7 + $0x548] sm:$0xff]  ;;  %v5256_v8 = vpack.c.bf16 %v2987_v63, %v2983_v62 }
 0x40c   : > { %v6417_v38 = vmax.f32 %v6396_v3, %v2791_v27  ;;  %v2794_v41 = vmax.f32 %v6398_v4, %v2790_v28  ;;  %v5104_v3 = vpack.c.bf16 %v2937_v45, %v2933_v40  ;;  %v5232_v4 = vpack.c.bf16 %v2939_v49, %v2935_v48  ;;  %v2970_v19 = vld [vmem:[#allocation7 + $0x568] sm:$0xff]  ;;  %v2965_v28 = vld [vmem:[#allocation7 + $0x540] sm:$0xff]  ;;  %v2967_v33 = vld [vmem:[#allocation7 + $0x550] sm:$0xff] }
 0x40d   : > { %v2796_v46 = vmax.f32 %v6400_v6, %v2792_v31  ;;  %v5106_v6 = vpack.c.bf16 %v2946_v43, %v2942_v50  ;;  %v5116_v25 = vpack.c.bf16 %v2961_v22, %v2957_v21  ;;  %v5244_v27 = vpack.c.bf16 %v2963_v18, %v2959_v23  ;;  %v2969_v29 = vld [vmem:[#allocation7 + $0x560] sm:$0xff]  ;;  %v2982_v43 = vld [vmem:[#allocation7 + $0x5c8] sm:$0xff]  ;;  %v2995_v14 = vld [vmem:[#allocation7 + $0x630] sm:$0xff] }
 0x40e   : > { %3139 = vmatprep.mubr.f32.mxu0 %v2794_v41  ;;  %3281 = vmatprep.mubr.f32.mxu1 %v2794_v41  ;;  %v5246_v31 = vpack.c.bf16 %v2972_v26, %v2968_v39  ;;  %v2978_v41 = vld [vmem:[#allocation7 + $0x5a8] sm:$0xff]  ;;  %v5120_v40 = vpack.c.bf16 %v2969_v29, %v2965_v28  ;;  %v5248_v45 = vpack.c.bf16 %v2971_v35, %v2967_v33  ;;  %v2977_v48 = vld [vmem:[#allocation7 + $0x5a0] sm:$0xff]  ;;  %v3000_v17 = vld [vmem:[#allocation7 + $0x658] sm:$0xff] }
 0x40f   : > { %3140 = vmatmul.mubr.f32.vlgmr.msra.gmra.mrb[8].mxu0 %v2793_v30  ;;  %3282 = vmatmul.mubr.f32.vlgmr.msra.gmra.mrb[8].mxu1 %v2793_v30  ;;  %v5118_v30 = vpack.c.bf16 %v2970_v19, %v2966_v61  ;;  %v5122_v49 = vpack.c.bf16 %v2978_v41, %v2974_v36  ;;  %v2994_v1 = vld [vmem:[#allocation7 + $0x628] sm:$0xff]  ;;  %v5260_v21 = vpack.c.bf16 %v2995_v14, %v2991_v34  ;;  %v2997_v22 = vld [vmem:[#allocation7 + $0x640] sm:$0xff]  ;;  %v2999_v18 = vld [vmem:[#allocation7 + $0x650] sm:$0xff] }
 0x410   : > { %5101 = vmatpush1.bf16.msra.mxu0 %v5100_v42  ;;  %5229 = vmatpush1.bf16.msra.mxu1 %v5228_v44  ;;  %v2976_v42 = vld [vmem:[#allocation7 + $0x598] sm:$0xff]  ;;  %v2998_v15 = vld [vmem:[#allocation7 + $0x648] sm:$0xff]  ;;  %v3003_v61 = vld [vmem:[#allocation7 + $0x670] sm:$0xff] }
 0x411   : > { %3210 = vmatprep.mubr.f32.mxu0 %v2796_v46  ;;  %3352 = vmatprep.mubr.f32.mxu1 %v2796_v46  ;;  %v2980_v44 = vld [vmem:[#allocation7 + $0x5b8] sm:$0xff]  ;;  %v2973_v46 = vld [vmem:[#allocation7 + $0x580] sm:$0xff]  ;;  %v3002_v54 = vld [vmem:[#allocation7 + $0x668] sm:$0xff]  ;;  %v5264_v28 = vpack.c.bf16 %v3003_v61, %v2999_v18 }
 0x412   : > { %5103 = vmatprep.subr.bf16.mxu0 %v5102_v24  ;;  %5231 = vmatprep.subr.bf16.mxu1 %v5230_v51  ;;  %v5250_v50 = vpack.c.bf16 %v2980_v44, %v2976_v42  ;;  %v2975_v24 = vld [vmem:[#allocation7 + $0x590] sm:$0xff]  ;;  %v3006_v19 = vld [vmem:[#allocation7 + $0x688] sm:$0xff]  ;;  %v3008_v26 = vld [vmem:[#allocation7 + $0x698] sm:$0xff] }
 0x413   : > { %v2979_v51 = vld [vmem:[#allocation7 + $0x5b0] sm:$0xff]  ;;  %v3010_v39 = vld [vmem:[#allocation7 + $0x6a8] sm:$0xff]  ;;  %v3005_v29 = vld [vmem:[#allocation7 + $0x680] sm:$0xff] }
 0x414   : > { %5105 = vmatpush1.bf16.msra.mxu0 %v5104_v3  ;;  %5233 = vmatpush1.bf16.msra.mxu1 %v5232_v4  ;;  %v2988_v3 = vld [vmem:[#allocation7 + $0x5f8] sm:$0xff]  ;;  %v5124_v4 = vpack.c.bf16 %v2977_v48, %v2973_v46  ;;  %v5252_v56 = vpack.c.bf16 %v2979_v51, %v2975_v24  ;;  %v3007_v35 = vld [vmem:[#allocation7 + $0x690] sm:$0xff]  ;;  %v3014_v41 = vld [vmem:[#allocation7 + $0x6c8] sm:$0xff] }
 0x415   : > { %5107 = vmatprep.subr.bf16.mxu0 %v5106_v6  ;;  %5235 = vmatprep.subr.bf16.mxu1 %v5234_v58  ;;  %v2985_v6 = vld [vmem:[#allocation7 + $0x5e0] sm:$0xff]  ;;  %v5126_v58 = vpack.c.bf16 %v2986_v52, %v2982_v43  ;;  %v5254_v16 = vpack.c.bf16 %v2988_v3, %v2984_v55  ;;  %v3011_v36 = vld [vmem:[#allocation7 + $0x6b0] sm:$0xff]  ;;  %v3018_v42 = vld [vmem:[#allocation7 + $0x6e8] sm:$0xff] }
 0x416   : > { %v3016_v44 = vld [vmem:[#allocation7 + $0x6d8] sm:$0xff]  ;;  %v5268_v46 = vpack.c.bf16 %v3011_v36, %v3007_v35  ;;  %v3013_v48 = vld [vmem:[#allocation7 + $0x6c0] sm:$0xff]  ;;  %v3015_v51 = vld [vmem:[#allocation7 + $0x6d0] sm:$0xff] }
 0x417   : > { %v3019_v43 = vld [vmem:[#allocation7 + $0x6f0] sm:$0xff]  ;;  %v3022_v52 = vld [vmem:[#allocation7 + $0x708] sm:$0xff]  ;;  %v3024_v3 = vld [vmem:[#allocation7 + $0x718] sm:$0xff] }
 0x418   : > { %5109 = vmatpush1.bf16.msra.mxu0 %v5108_v5  ;;  %5237 = vmatpush1.bf16.msra.mxu1 %v5236_v7  ;;  %v2996_v5 = vld [vmem:[#allocation7 + $0x638] sm:$0xff]  ;;  %v5128_v7 = vpack.c.bf16 %v2985_v6, %v2981_v57  ;;  %v3026_v55 = vld [vmem:[#allocation7 + $0x728] sm:$0xff]  ;;  %v5272_v57 = vpack.c.bf16 %v3019_v43, %v3015_v51  ;;  %v3021_v6 = vld [vmem:[#allocation7 + $0x700] sm:$0xff] }
 0x419   : > { %5111 = vmatprep.subr.bf16.mxu0 %v5110_v10  ;;  %5239 = vmatprep.subr.bf16.mxu1 %v5238_v11  ;;  %v2993_v10 = vld [vmem:[#allocation7 + $0x620] sm:$0xff]  ;;  %v5130_v11 = vpack.c.bf16 %v2994_v1, %v2990_v0  ;;  %v5258_v12 = vpack.c.bf16 %v2996_v5, %v2992_v2  ;;  %v3023_v63 = vld [vmem:[#allocation7 + $0x710] sm:$0xff]  ;;  %v3030_v1 = vld [vmem:[#allocation7 + $0x748] sm:$0xff] }
 0x41a   : > { %v3027_v0 = vld [vmem:[#allocation7 + $0x730] sm:$0xff]  ;;  %v3034_v2 = vld [vmem:[#allocation7 + $0x768] sm:$0xff]  ;;  %v3032_v5 = vld [vmem:[#allocation7 + $0x758] sm:$0xff] }
 0x41b   : > { %v3031_v14 = vld [vmem:[#allocation7 + $0x750] sm:$0xff]  ;;  %v3049_v35 = vld [vmem:[#allocation7 + $0x7e0] sm:$0xff] }
 0x41c   : > { %5113 = vmatpush1.bf16.msra.mxu0 %v5112_v20  ;;  %5241 = vmatpush1.bf16.msra.mxu1 %v5240_v59  ;;  %v3004_v20 = vld [vmem:[#allocation7 + $0x678] sm:$0xff]  ;;  %v5132_v59 = vpack.c.bf16 %v2993_v10, %v2989_v9  ;;  %v5276_v9 = vpack.c.bf16 %v3027_v0, %v3023_v63  ;;  %v3029_v10 = vld [vmem:[#allocation7 + $0x740] sm:$0xff]  ;;  %v3039_v61 = vld [vmem:[#allocation7 + $0x790] sm:$0xff] }
 0x41d   : > { %5115 = vmatprep.subr.bf16.mxu0 %v5114_v60  ;;  %5243 = vmatprep.subr.bf16.mxu1 %v5242_v13  ;;  %v3001_v60 = vld [vmem:[#allocation7 + $0x660] sm:$0xff]  ;;  %v5134_v13 = vpack.c.bf16 %v3002_v54, %v2998_v15  ;;  %v5262_v23 = vpack.c.bf16 %v3004_v20, %v3000_v17  ;;  %v3035_v15 = vld [vmem:[#allocation7 + $0x770] sm:$0xff]  ;;  %v3038_v54 = vld [vmem:[#allocation7 + $0x788] sm:$0xff] }
 0x41e   : > { %v3042_v17 = vld [vmem:[#allocation7 + $0x7a8] sm:$0xff]  ;;  %v3040_v20 = vld [vmem:[#allocation7 + $0x798] sm:$0xff]  ;;  %v3047_v36 = vld [vmem:[#allocation7 + $0x7d0] sm:$0xff] }
 0x41f   : > { %v3370_v51 = vld [vmem:[#allocation10 + $0x20] sm:$0xff]  ;;  %v3371_v43 = vld [vmem:[#allocation10 + $0x28] sm:$0xff] }
 0x420   : > { %5117 = vmatpush1.bf16.msra.mxu0 %v5116_v25  ;;  %5245 = vmatpush1.bf16.msra.mxu1 %v5244_v27  ;;  %v3012_v25 = vld [vmem:[#allocation7 + $0x6b8] sm:$0xff]  ;;  %v5136_v27 = vpack.c.bf16 %v3001_v60, %v2997_v22  ;;  %v5280_v22 = vpack.c.bf16 %v3035_v15, %v3031_v14  ;;  %v3037_v60 = vld [vmem:[#allocation7 + $0x780] sm:$0xff]  ;;  %v3379_v63 = vld [vmem:[#allocation10 + $0x68] sm:$0xff] }
 0x421   : > { %5119 = vmatprep.subr.bf16.mxu0 %v5118_v30  ;;  %5247 = vmatprep.subr.bf16.mxu1 %v5246_v31  ;;  %v3009_v30 = vld [vmem:[#allocation7 + $0x6a0] sm:$0xff]  ;;  %v5138_v31 = vpack.c.bf16 %v3010_v39, %v3006_v19  ;;  %v5266_v33 = vpack.c.bf16 %v3012_v25, %v3008_v26  ;;  %v3043_v19 = vld [vmem:[#allocation7 + $0x7b0] sm:$0xff]  ;;  %v3046_v39 = vld [vmem:[#allocation7 + $0x7c8] sm:$0xff] }
 0x422   : > { %v3050_v26 = vld [vmem:[#allocation7 + $0x7e8] sm:$0xff]  ;;  %v3048_v25 = vld [vmem:[#allocation7 + $0x7d8] sm:$0xff] }
 0x423   : > { %v3464_v14 = vld [vmem:[#allocation13 + $0x20] sm:$0xff]  ;;  %v3465_v15 = vld [vmem:[#allocation13 + $0x28] sm:$0xff] }
 0x424   : > { %5121 = vmatpush1.bf16.msra.mxu0 %v5120_v40  ;;  %5249 = vmatpush1.bf16.msra.mxu1 %v5248_v45  ;;  %v3020_v40 = vld [vmem:[#allocation7 + $0x6f8] sm:$0xff]  ;;  %v5140_v45 = vpack.c.bf16 %v3009_v30, %v3005_v29  ;;  %v5284_v29 = vpack.c.bf16 %v3043_v19, %v3039_v61  ;;  %v3045_v30 = vld [vmem:[#allocation7 + $0x7c0] sm:$0xff]  ;;  %v3473_v19 = vld [vmem:[#allocation13 + $0x68] sm:$0xff] }
 0x425   : > { %5123 = vmatprep.subr.bf16.mxu0 %v5122_v49  ;;  %5251 = vmatprep.subr.bf16.mxu1 %v5250_v50  ;;  %v3017_v49 = vld [vmem:[#allocation7 + $0x6e0] sm:$0xff]  ;;  %v5142_v50 = vpack.c.bf16 %v3018_v42, %v3014_v41  ;;  %v5270_v24 = vpack.c.bf16 %v3020_v40, %v3016_v44  ;;  %v3051_v41 = vld [vmem:[#allocation7 + $0x7f0] sm:$0xff]  ;;  %v5160_v42 = vpack.c.bf16 %v3049_v35, %v3045_v30 }
 0x426   : > { %v5288_v44 = vpack.c.bf16 %v3051_v41, %v3047_v36  ;;  %v3366_v40 = vld [vmem:[#allocation10] sm:$0xff] }
 0x427   : > { %v3472_v61 = vld [vmem:[#allocation13 + $0x60] sm:$0xff] }
 0x428   : > { %5125 = vmatpush1.bf16.msra.mxu0 %v5124_v4  ;;  %5253 = vmatpush1.bf16.msra.mxu1 %v5252_v56  ;;  %v3028_v4 = vld [vmem:[#allocation7 + $0x738] sm:$0xff]  ;;  %v5144_v56 = vpack.c.bf16 %v3017_v49, %v3013_v48  ;;  %v5943_v48 = vmov 0.0|0.0  }
 0x429   : > { %5127 = vmatprep.subr.bf16.mxu0 %v5126_v58  ;;  %5255 = vmatprep.subr.bf16.mxu1 %v5254_v16  ;;  %v3025_v58 = vld [vmem:[#allocation7 + $0x720] sm:$0xff]  ;;  %v5146_v16 = vpack.c.bf16 %v3026_v55, %v3022_v52  ;;  %v5274_v62 = vpack.c.bf16 %v3028_v4, %v3024_v3  ;;  %v3368_v49 = vld [vmem:[#allocation10 + $0x10] sm:$0xff]  ;;  %v5297_v52 = vpack.c.bf16 %v3371_v43, %v3370_v51  ;;  %v3554_v51 = vld [vmem:[#allocation16] sm:$0xff] }
 0x42a   : > { %v3372_v55 = vld [vmem:[#allocation10 + $0x30] sm:$0xff]  ;;  %v3373_v3 = vld [vmem:[#allocation10 + $0x38] sm:$0xff] }
 0x42b   : > { %v5300_v4 = vpack.c.bf16 %v3373_v3, %v3372_v55  ;;  %v3555_v43 = vld [vmem:[#allocation16 + $0x8] sm:$0xff]  ;;  %v3557_v3 = vld [vmem:[#allocation16 + $0x18] sm:$0xff] }
 0x42c   : > { %5129 = vmatpush1.bf16.msra.mxu0 %v5128_v7  ;;  %5257 = vmatpush1.bf16.msra.mxu1 %v5256_v8  ;;  %v3036_v7 = vld [vmem:[#allocation7 + $0x778] sm:$0xff]  ;;  %v5148_v8 = vpack.c.bf16 %v3025_v58, %v3021_v6  ;;  %v5339_v55 = vpack.c.bf16 %v3555_v43, %v3554_v51 }
 0x42d   : > { %5131 = vmatprep.subr.bf16.mxu0 %v5130_v11  ;;  %5259 = vmatprep.subr.bf16.mxu1 %v5258_v12  ;;  %v3033_v11 = vld [vmem:[#allocation7 + $0x760] sm:$0xff]  ;;  %v5150_v12 = vpack.c.bf16 %v3034_v2, %v3030_v1  ;;  %v5278_v34 = vpack.c.bf16 %v3036_v7, %v3032_v5  ;;  %v3376_v6 = vld [vmem:[#allocation10 + $0x50] sm:$0xff]  ;;  %v5945_v7 = vmov 0.0  }
 0x42e   : > { %v3377_v58 = vld [vmem:[#allocation10 + $0x58] sm:$0xff]  ;;  %v3380_v1 = vld [vmem:[#allocation10 + $0x70] sm:$0xff] }
 0x42f   : > { %v3381_v2 = vld [vmem:[#allocation10 + $0x78] sm:$0xff] }
 0x430   : > { %5133 = vmatpush1.bf16.msra.mxu0 %v5132_v59  ;;  %5261 = vmatpush1.bf16.msra.mxu1 %v5260_v21  ;;  %v3044_v59 = vld [vmem:[#allocation7 + $0x7b8] sm:$0xff]  ;;  %v5152_v21 = vpack.c.bf16 %v3033_v11, %v3029_v10  ;;  %v5312_v5 = vpack.c.bf16 %v3381_v2, %v3380_v1  ;;  %v3565_v2 = vld [vmem:[#allocation16 + $0x58] sm:$0xff] }
 0x431   : > { %5135 = vmatprep.subr.bf16.mxu0 %v5134_v13  ;;  %5263 = vmatprep.subr.bf16.mxu1 %v5262_v23  ;;  %v3041_v13 = vld [vmem:[#allocation7 + $0x7a0] sm:$0xff]  ;;  %v5154_v23 = vpack.c.bf16 %v3042_v17, %v3038_v54  ;;  %v5282_v18 = vpack.c.bf16 %v3044_v59, %v3040_v20  ;;  %v3462_v10 = vld [vmem:[#allocation13 + $0x10] sm:$0xff]  ;;  %v5321_v54 = vpack.c.bf16 %v3465_v15, %v3464_v14 }
 0x432   : > { %v3466_v17 = vld [vmem:[#allocation13 + $0x30] sm:$0xff]  ;;  %v3467_v20 = vld [vmem:[#allocation13 + $0x38] sm:$0xff] }
 0x433   : > { %v5324_v59 = vpack.c.bf16 %v3467_v20, %v3466_v17  ;;  %v3564_v1 = vld [vmem:[#allocation16 + $0x50] sm:$0xff]  ;;  %v3847_v20 = vld [vmem:[#allocation14] ss:$0 sm:$0xff] }
 0x434   : > { %5137 = vmatpush1.bf16.msra.mxu0 %v5136_v27  ;;  %5265 = vmatpush1.bf16.msra.mxu1 %v5264_v28  ;;  %v3052_v27 = vld [vmem:[#allocation7 + $0x7f8] sm:$0xff]  ;;  %v5156_v28 = vpack.c.bf16 %v3041_v13, %v3037_v60 }
 0x435   : > { %5139 = vmatprep.subr.bf16.mxu0 %v5138_v31  ;;  %5267 = vmatprep.subr.bf16.mxu1 %v5266_v33  ;;  %v5158_v31 = vpack.c.bf16 %v3050_v26, %v3046_v39  ;;  %v5286_v33 = vpack.c.bf16 %v3052_v27, %v3048_v25  ;;  %v3470_v13 = vld [vmem:[#allocation13 + $0x50] sm:$0xff]  ;;  %v5333_v39 = vpack.c.bf16 %v3473_v19, %v3472_v61  ;;  %v3053_v26 = vld [vmem:[#allocation8] sm:$0xf] }
 0x436   : > { %v3058_v25 = vrot.slane %v3053_v26, %v6353_v32  ;;  %v3066_v27 = vrot.slane %v3053_v26, %v6358_v37  ;;  %v3474_v37 = vld [vmem:[#allocation13 + $0x70] sm:$0xff] }
 0x437   : > { %v3568_v15 = vld [vmem:[#allocation16 + $0x70] sm:$0xff] }
 0x438   : > { %5141 = vmatpush1.bf16.msra.mxu0 %v5140_v45  ;;  %5269 = vmatpush1.bf16.msra.mxu1 %v5268_v46  ;;  %v3367_v45 = vld [vmem:[#allocation10 + $0x8] sm:$0xff] }
 0x439   : > { %5143 = vmatprep.subr.bf16.mxu0 %v5142_v50  ;;  %5271 = vmatprep.subr.bf16.mxu1 %v5270_v24  ;;  %v5291_v46 = vpack.c.bf16 %v3367_v45, %v3366_v40  ;;  %v3369_v50 = vld [vmem:[#allocation10 + $0x18] sm:$0xff] }
 0x43a   : > { %v5294_v24 = vpack.c.bf16 %v3369_v50, %v3368_v49 }
 0x43c   : > { %5145 = vmatpush1.bf16.msra.mxu0 %v5144_v56  ;;  %5273 = vmatpush1.bf16.msra.mxu1 %v5272_v57  ;;  %v3374_v56 = vld [vmem:[#allocation10 + $0x40] sm:$0xff]  ;;  %v3375_v57 = vld [vmem:[#allocation10 + $0x48] sm:$0xff] }
 0x43d   : > { %5147 = vmatprep.subr.bf16.mxu0 %v5146_v16  ;;  %5275 = vmatprep.subr.bf16.mxu1 %v5274_v62  ;;  %v5306_v16 = vpack.c.bf16 %v3377_v58, %v3376_v6  ;;  %v3378_v62 = vld [vmem:[#allocation10 + $0x60] sm:$0xff]  ;;  %v3560_v6 = vld [vmem:[#allocation16 + $0x30] sm:$0xff] }
 0x43e   : > { %v5309_v0 = vpack.c.bf16 %v3379_v63, %v3378_v62  ;;  %v3561_v58 = vld [vmem:[#allocation16 + $0x38] sm:$0xff]  ;;  %v3562_v62 = vld [vmem:[#allocation16 + $0x40] sm:$0xff]  ;;  %v3563_v63 = vld [vmem:[#allocation16 + $0x48] sm:$0xff] }
 0x440   : > { %5149 = vmatpush1.bf16.msra.mxu0 %v5148_v8  ;;  %5277 = vmatpush1.bf16.msra.mxu1 %v5276_v9  ;;  %v3460_v8 = vld [vmem:[#allocation13] sm:$0xff]  ;;  %v3461_v9 = vld [vmem:[#allocation13 + $0x8] sm:$0xff] }
 0x441   : > { %5151 = vmatprep.subr.bf16.mxu0 %v5150_v12  ;;  %5279 = vmatprep.subr.bf16.mxu1 %v5278_v34  ;;  %v5315_v11 = vpack.c.bf16 %v3461_v9, %v3460_v8  ;;  %v3463_v12 = vld [vmem:[#allocation13 + $0x18] sm:$0xff]  ;;  %v3567_v8 = vld [vmem:[#allocation16 + $0x68] sm:$0xff] }
 0x442   : > { %v5318_v34 = vpack.c.bf16 %v3463_v12, %v3462_v10  ;;  %v3846_v10 = vld [vmem:[#allocation11] ss:$0 sm:$0xff] }
 0x444   : > { %5153 = vmatpush1.bf16.msra.mxu0 %v5152_v21  ;;  %5281 = vmatpush1.bf16.msra.mxu1 %v5280_v22  ;;  %v3468_v21 = vld [vmem:[#allocation13 + $0x40] sm:$0xff]  ;;  %v3469_v22 = vld [vmem:[#allocation13 + $0x48] sm:$0xff] }
 0x445   : > { %5155 = vmatprep.subr.bf16.mxu0 %v5154_v23  ;;  %5283 = vmatprep.subr.bf16.mxu1 %v5282_v18  ;;  %v5327_v60 = vpack.c.bf16 %v3469_v22, %v3468_v21  ;;  %v3471_v23 = vld [vmem:[#allocation13 + $0x58] sm:$0xff] }
 0x446   : > { %v5330_v18 = vpack.c.bf16 %v3471_v23, %v3470_v13 }
 0x448   : > { %5157 = vmatpush1.bf16.msra.mxu0 %v5156_v28  ;;  %5285 = vmatpush1.bf16.msra.mxu1 %v5284_v29  ;;  %v3062_v28 = vrot.slane %v3053_v26, %v6361_v47  ;;  %v3070_v29 = vrot.slane %v3053_v26, %v6366_v53  ;;  %v3475_v47 = vld [vmem:[#allocation13 + $0x78] sm:$0xff] }
 0x449   : > { %5159 = vmatprep.subr.bf16.mxu0 %v5158_v31  ;;  %5287 = vmatprep.subr.bf16.mxu1 %v5286_v33  ;;  %v5336_v53 = vpack.c.bf16 %v3475_v47, %v3474_v37 }
 0x44c   : > { %5161 = vmatpush1.bf16.msra.mxu0 %v5160_v42  ;;  %5289 = vmatpush1.bf16.msra.mxu1 %v5288_v44 }
 0x44d   : > { %5290 = vmatprep.subr.bf16.mxu0 %v5943_v48  ;;  %5314 = vmatprep.subr.bf16.mxu1 %v5943_v48 }
 0x44f   : > { %3211 = vmatmul.mubr.f32.vlgmr.msra.gmra.mrb[8].mxu0 %v6417_v38  ;;  %3353 = vmatmul.mubr.f32.vlgmr.msra.gmra.mrb[8].mxu1 %v6417_v38  ;;  %v5303_v38 = vpack.c.bf16 %v3375_v57, %v3374_v56  ;;  %v3558_v56 = vld [vmem:[#allocation16 + $0x20] sm:$0xff]  ;;  %v3559_v57 = vld [vmem:[#allocation16 + $0x28] sm:$0xff] }
 0x450   : > { %5292 = vmatpush3.bf16.msra.mxu0 %v5291_v46  ;;  %3937 = vmatprep.mubr.msk.f32.mxu0 %vm5944_vm0, %v5945_v7 }
 0x451   : > { %5293 = vmatprep.subr.bf16.mxu0 %v5943_v48  ;;  %3972 = vmatprep.mubr.msk.f32.mxu1 %vm5944_vm0, %v5945_v7 }
 0x452   : > { %5316 = vmatpush3.bf16.msra.mxu1 %v5315_v11 }
 0x453   : > { %5317 = vmatprep.subr.bf16.mxu1 %v5943_v48 }
 0x454   : > { %5295 = vmatpush3.bf16.msra.mxu0 %v5294_v24 }
 0x455   : > { %5296 = vmatprep.subr.bf16.mxu0 %v5943_v48 }
 0x456   : > { %5319 = vmatpush3.bf16.msra.mxu1 %v5318_v34 }
 0x457   : > { %5320 = vmatprep.subr.bf16.mxu1 %v5943_v48 }
 0x458   : > { %5298 = vmatpush3.bf16.msra.mxu0 %v5297_v52  ;;  %v3556_v52 = vld [vmem:[#allocation16 + $0x10] sm:$0xff] }
 0x459   : > { %5299 = vmatprep.subr.bf16.mxu0 %v5943_v48 }
 0x45a   : > { %5322 = vmatpush3.bf16.msra.mxu1 %v5321_v54  ;;  %v3569_v54 = vld [vmem:[#allocation16 + $0x78] sm:$0xff] }
 0x45b   : > { %5323 = vmatprep.subr.bf16.mxu1 %v5943_v48  ;;  %v5360_v17 = vpack.c.bf16 %v3569_v54, %v3568_v15 }
 0x45c   : > { %5301 = vmatpush3.bf16.msra.mxu0 %v5300_v4  ;;  %v5342_v4 = vpack.c.bf16 %v3557_v3, %v3556_v52 }
 0x45d   : > { %5302 = vmatprep.subr.bf16.mxu0 %v5943_v48 }
 0x45e   : > { %5325 = vmatpush3.bf16.msra.mxu1 %v5324_v59 }
 0x45f   : > { %5326 = vmatprep.subr.bf16.mxu1 %v5943_v48 }
 0x460   : > { %5304 = vmatpush3.bf16.msra.mxu0 %v5303_v38  ;;  %v5345_v38 = vpack.c.bf16 %v3559_v57, %v3558_v56 }
 0x461   : > { %5305 = vmatprep.subr.bf16.mxu0 %v5943_v48 }
 0x462   : > { %5328 = vmatpush3.bf16.msra.mxu1 %v5327_v60 }
 0x463   : > { %5329 = vmatprep.subr.bf16.mxu1 %v5943_v48 }
 0x464   : > { %5307 = vmatpush3.bf16.msra.mxu0 %v5306_v16  ;;  %v5348_v16 = vpack.c.bf16 %v3561_v58, %v3560_v6 }
 0x465   : > { %5308 = vmatprep.subr.bf16.mxu0 %v5943_v48 }
 0x466   : > { %5331 = vmatpush3.bf16.msra.mxu1 %v5330_v18 }
 0x467   : > { %5332 = vmatprep.subr.bf16.mxu1 %v5943_v48 }
 0x468   : > { %5310 = vmatpush3.bf16.msra.mxu0 %v5309_v0  ;;  %v5351_v0 = vpack.c.bf16 %v3563_v63, %v3562_v62 }
 0x469   : > { %5311 = vmatprep.subr.bf16.mxu0 %v5943_v48 }
 0x46a   : > { %5334 = vmatpush3.bf16.msra.mxu1 %v5333_v39 }
 0x46b   : > { %5335 = vmatprep.subr.bf16.mxu1 %v5943_v48 }
 0x46c   : > { %5313 = vmatpush3.bf16.msra.mxu0 %v5312_v5  ;;  %v5354_v5 = vpack.c.bf16 %v3565_v2, %v3564_v1 }
 0x46d   : > { %5338 = vmatprep.subr.bf16.mxu0 %v5943_v48 }
 0x46e   : > { %5337 = vmatpush3.bf16.msra.mxu1 %v5336_v53 }
 0x522   : > { %v3212_v30 = vpop.f32.mrb[8].mxu0  ;;  %v3354_v31 = vpop.f32.mrb[8].mxu1 }
 0x523   : > { %v5378_v33 = vadd.f32 %v3212_v30, %v3058_v25  ;;  %v5380_v35 = vadd.f32 %v3354_v31, %v3066_v27  ;;  %v3214_v36 = vpop.f32.mrb[9].mxu0  ;;  %v3356_v41 = vpop.f32.mrb[9].mxu1 }
 0x524   : > { %v5379_v42 = vadd.f32 %v3214_v36, %v3062_v28  ;;  %v5381_v44 = vadd.f32 %v3356_v41, %v3070_v29 }
 0x525   : > { %v3359_v40 = vmax.f32 %v5378_v33, 0.0  ;;  %v3361_v45 = vmax.f32 %v5380_v35, 0.0 }
 0x526   : > { %v3360_v46 = vmax.f32 %v5379_v42, 0.0  ;;  %v3362_v49 = vmax.f32 %v5381_v44, 0.0 }
 0x528   : > { %v3363_v50 = vmax.f32 %v3359_v40, %v3360_v46  ;;  %v3364_v32 = vmax.f32 %v3361_v45, %v3362_v49 }
 0x52a   : > { %v3365_v24 = vmax.f32 %v3363_v50, %v3364_v32 }
 0x52c   : > { %3938 = vmatmul.mubr.f32.vlgmr.msra.gmra.mrb[10].mxu0 %v3365_v24 }
 0x52d   : > { %4007 = vmatprep.mubr.msk.f32.mxu0 %vm5944_vm0, %v5945_v7  ;;  %5340 = vmatpush3.bf16.msra.mxu0 %v5339_v55  ;;  %v3566_v7 = vld [vmem:[#allocation16 + $0x60] sm:$0xff] }
 0x52e   : > { %5341 = vmatprep.subr.bf16.mxu0 %v5943_v48  ;;  %v5357_v9 = vpack.c.bf16 %v3567_v8, %v3566_v7 }
 0x531   : > { %5343 = vmatpush3.bf16.msra.mxu0 %v5342_v4 }
 0x532   : > { %5344 = vmatprep.subr.bf16.mxu0 %v5943_v48 }
 0x535   : > { %5346 = vmatpush3.bf16.msra.mxu0 %v5345_v38 }
 0x536   : > { %5347 = vmatprep.subr.bf16.mxu0 %v5943_v48 }
 0x539   : > { %5349 = vmatpush3.bf16.msra.mxu0 %v5348_v16 }
 0x53a   : > { %5350 = vmatprep.subr.bf16.mxu0 %v5943_v48 }
 0x53d   : > { %5352 = vmatpush3.bf16.msra.mxu0 %v5351_v0 }
 0x53e   : > { %5353 = vmatprep.subr.bf16.mxu0 %v5943_v48 }
 0x541   : > { %5355 = vmatpush3.bf16.msra.mxu0 %v5354_v5 }
 0x542   : > { %5356 = vmatprep.subr.bf16.mxu0 %v5943_v48 }
 0x545   : > { %5358 = vmatpush3.bf16.msra.mxu0 %v5357_v9 }
 0x546   : > { %5359 = vmatprep.subr.bf16.mxu0 %v5943_v48  ;;  %v3848_v48 = vld [vmem:[#allocation17] ss:$0 sm:$0xff] }
 0x549   : > { %5361 = vmatpush3.bf16.msra.mxu0 %v5360_v17 }
 0x5ff   : > { %v3455_v11 = vpop.f32.mrb[10].mxu0 }
 0x600   : > { %v3456_v12 = vadd.f32 %v3846_v10, %v3455_v11  ;;  %v3939_v34 = vpop.f32.mrb[11].mxu0 }
 0x602   : > { %v3459_v14 = vmax.f32 %v3456_v12, 0.0 }
 0x604   : > { %3973 = vmatmul.mubr.f32.vlgmr.msra.gmra.mrb[10].mxu1 %v3459_v14 }
 0x6d7   : > { %v3549_v59 = vpop.f32.mrb[10].mxu1 }
 0x6d8   : > { %v3550_v21 = vadd.f32 %v3847_v20, %v3549_v59  ;;  %v3974_v22 = vpop.f32.mrb[11].mxu1 }
 0x6da   : > { %v3553_v60 = vmax.f32 %v3550_v21, 0.0 }
 0x6dc   : > { %4008 = vmatmul.mubr.f32.vlgmr.msra.gmra.mrb[12].mxu0 %v3553_v60 }
 0x7af   : > { %v3643_v13 = vpop.f32.mrb[12].mxu0 }
 0x7b0   : > { %v3644_v23 = vadd.f32 %v3848_v48, %v3643_v13  ;;  %v4009_v18 = vpop.f32.mrb[13].mxu0 }
 0x7b2   : > { %3647 = vst [vmem:[%s515_s30] sm:$0xff] %v3644_v23 }
 0x7b3   : > { %5853 = shalt.err (!%p5850_p10)
}
 0x7b4   : > { %s5854_s26 = scalar_lea.hbm %s6459_s2, 128  ;;  %s5858_s15 = scalar_lea.hbm %s6512_s11, 256 }
 0x7b5   : > { %p5855_p2 = scmp.ne.s32.totalorder %s6459_s2, %s5854_s26  ;;  %p5859_p7 = scmp.lt.u32.totalorder %s6459_s2, %s6512_s11 }
 0x7b6   : > { %p5860_p8 = scmp.lt.u32.totalorder %s5858_s15, %s5854_s26  ;;  %p5862_p13 = scmp.lt.u32.totalorder %s5854_s26, %s6459_s2 }
 0x7b7   : > { %p5856_p3 = pnand %p5855_p2, %p6555_p1 }
 0x7b8   : > { %p5861_p11 = por %p5860_p8, %p5859_p7 }
 0x7b9   : > { %p5857_p4 = pneg %p5856_p3 }
 0x7ba   : > { %p5863_p0 = por %p5862_p13, %p5861_p11 }
 0x7bc   : > { %p5864_p6 = pnand %p5863_p0, %p5857_p4 }
 0x7be   : > { %5867 = shalt.err (!%p5864_p6)
}
 0x7bf   : > { %5442 = dma.vmem_to_hbm [thread:$0]  (%p6555_p1), %s6461_s6, 128, %s6459_s2, %s3649_s24  }
 0x7c0 PF: > { %s6556_s22 = sld [smem:[#allocation27_spill]]  ;;  %s6557_s14 = sld [smem:[#allocation31_spill]] }
 0x7c1   : > { %p5499_p5 = scmp.ge.s32.totalorder %s5926_s20, 2 }
 0x7c6   : > { %s3674_s16 = sand.u32 1, %s6556_s22   ;;  %p6558_p9 = scmp.ne.s32.totalorder %s6557_s14, 0 }
 0x7c7   : > { %s3675_s25 = scalar_lea.sflag [#allocation4], %s3674_s16 }
 0x7c8   : > { %p5476_p12 = pnand %p5499_p5, %p6558_p9 }
 0x7ca   : > { %5909 = dma.done.wait (!%p5476_p12), %s3675_s25, 128  }
 0x7cb   : > { %5911 = vsyncadd (!%p5476_p12), %s3675_s25, 4294967168  ;;  %s6559_s20 = sld [smem:[#allocation29_spill]]  ;;  %s6560_s30 = sld [smem:[#allocation28_spill]] }
 0x7cc   : > { %s6561_s19 = sld [smem:[#allocation30_spill]]  ;;  %s6562_s17 = smov %s5918_s18 }
 0x7d1   : > { %p27_p10 = scmp.ge.s32.totalorder %s6559_s20, 4   ;;  %s6563_s18 = smov %s6560_s30 }
 0x7d3   :  { %29 = sbr.rel (!%p27_p10) target bundleno = 14 (0xe), region = 140 }
 0x7da   :  { %3680 = vsyncpa [#allocation3], 1 }
 0x7db   :  { %3682 = vsyncpa [#allocation3 + $0x1], 1 }
 0x7dc   :  { %3683 = vsyncpa [#allocation6], 1 }
 0x7dd   :  { %3684 = vsyncpa [#allocation9], 1 }
 0x7de   :  { %3685 = vsyncpa [#allocation12], 1 }
 0x7df   :  { %3686 = vsyncpa [#allocation15], 1 }
 0x7e0   :  { %3687 = vsyncpa [#allocation18], 1 }
 0x7e1   :  { %3688 = vsyncpa [#allocation4], 1 }
 0x7e2   :  { %3690 = vsyncpa [#allocation4 + $0x1], 1 }

</bundles_post_ra>
